<compile_context>
chip_gen: v5e
topology: v5e:2x2
jax: 0.10.0
libtpu: 0.0.40
codegen_flags: <defaults>
</compile_context>

<pallas_src>
import functools

import jax
import jax.numpy as jnp
from jax.experimental import pallas as pl
from jax.experimental.pallas import tpu as pltpu


def _round_up(x, m):
    return (x + m - 1) // m * m


def _softplus(a):
    # PyTorch F.softplus semantics (beta=1, threshold=20), computed in f32.
    return jnp.where(a > 20.0, a, jnp.log1p(jnp.exp(jnp.minimum(a, 20.0))))


def _choose_m_tile(m, max_tile):
    """M tile: full extent for tiny M, otherwise a multiple of 16 chosen so the
    grid has at least 2 steps (v7x dual-TensorCore sharding + pipeline
    overlap), capped by max_tile (VMEM)."""
    if m <= 32:
        return m                            # single full-extent block
    half = _round_up(-(-m // 2), 16)        # ceil(m/2) rounded up to 16
    return min(max_tile, half)


# ---------------------------------------------------------------------------
# Conv GEMM:  Y = softplus(Xp @ Wblk + bblk),  tiled over M.
# Xp packs `pack` adjacent output pixels per row; Wblk is block-diagonal, so
# the 128-lane output is fully dense real data (no padded junk lanes).
# ---------------------------------------------------------------------------
def _gemm_softplus_kernel(x_ref, w_ref, b_ref, o_ref):
    acc = jnp.dot(x_ref[...], w_ref[...], preferred_element_type=jnp.float32)
    acc = acc + b_ref[...]                 # (1, 128) f32 bias broadcasts over rows
    o_ref[...] = _softplus(acc).astype(o_ref.dtype)


def gemm_softplus(x, w, b, *, max_tile_m=512):
    m, k = x.shape
    kw, n = w.shape
    assert k == kw, (k, kw)
    tm = _choose_m_tile(m, max_tile_m)
    return pl.pallas_call(
        _gemm_softplus_kernel,
        out_shape=jax.ShapeDtypeStruct((m, n), jnp.bfloat16),
        grid=(pl.cdiv(m, tm),),            # partial edge block handled by Pallas
        in_specs=[
            pl.BlockSpec((tm, k), lambda i: (i, 0)),   # packed patches, tiled over M
            pl.BlockSpec((k, n), lambda i: (0, 0)),    # block-diag weight, VMEM-resident
            pl.BlockSpec((1, n), lambda i: (0, 0)),    # packed bias, resident
        ],
        out_specs=pl.BlockSpec((tm, n), lambda i: (i, 0)),
        compiler_params=pltpu.CompilerParams(
            dimension_semantics=("parallel",)),
    )(x, w, b)


def conv2d_softplus(h_nhwc, w_blk, b_blk, cout, pack, *, stride=2, pad=2, ksize=5):
    """Conv2d(5x5, stride 2, pad 2) + softplus.

    Patch extraction stays in XLA (NHWC patches are channel-major, matching
    torch weight.reshape(Cout, Cin*k*k)); the GEMM consumes `pack` pixels per
    row against a block-diagonal weight so the Pallas output is a lane-dense
    (M/pack, 128) slab, and the NHWC un-pack below is a free row-major
    reshape (requires pack | Wo, which holds for 8|16 and 4|8, 4|4).
    # TODO(synk): fold patch extraction into the kernel (in-VMEM im2col).
    """
    b_, _, _, cin = h_nhwc.shape
    patches = jax.lax.conv_general_dilated_patches(
        h_nhwc, (ksize, ksize), (stride, stride), ((pad, pad), (pad, pad)),
        dimension_numbers=("NHWC", "HWIO", "NHWC"))
    ho, wo = patches.shape[1], patches.shape[2]
    f = patches.shape[3]                                     # cin * ksize * ksize
    assert wo % pack == 0 and pack * cout == w_blk.shape[1]
    xp = patches.reshape((b_ * ho * wo) // pack, pack * f)   # row-major pixel packing
    y = gemm_softplus(xp, w_blk, b_blk)                      # (M/pack, pack*cout) bf16
    return y.reshape(b_, ho, wo, cout)                       # row-major unpack == NHWC


# ---------------------------------------------------------------------------
# Fused MLP tail: hx = sp(x@Wx+bx); hz = sp(z@Wz+bz);
#                 h1 = sp(hx@Wj1x + hz@Wj1z + bj1); score = h1@Wj2 + bj2
# One pallas_call; intermediates never leave VMEM / vregs.
# ---------------------------------------------------------------------------
def _tail_kernel(x_ref, z_ref, wx_ref, bx_ref, wz_ref, bz_ref,
                 wj1x_ref, wj1z_ref, bj1_ref, wj2_ref, bj2_ref, o_ref):
    bf16 = jnp.bfloat16
    # Cast to bf16 immediately after each softplus: halves the live
    # intermediate footprint (they feed the MXU as bf16 anyway).
    hx = _softplus(jnp.dot(x_ref[...], wx_ref[...],
                           preferred_element_type=jnp.float32)
                   + bx_ref[...]).astype(bf16)
    hz = _softplus(jnp.dot(z_ref[...].astype(bf16), wz_ref[...],
                           preferred_element_type=jnp.float32)
                   + bz_ref[...]).astype(bf16)
    h1 = _softplus(
        jnp.dot(hx, wj1x_ref[...], preferred_element_type=jnp.float32)
        + jnp.dot(hz, wj1z_ref[...], preferred_element_type=jnp.float32)
        + bj1_ref[...]).astype(bf16)
    o_ref[...] = (jnp.dot(h1, wj2_ref[...], preferred_element_type=jnp.float32)
                  + bj2_ref[...])


def tail_pallas(hflat, eps, pp, *, max_tile_m=512):
    m, kx = hflat.shape
    kz = eps.shape[1]
    n_out = pp["j2_w"].shape[1]
    tm = _choose_m_tile(m, max_tile_m)
    res = lambda i: (0, 0)            # weights / biases resident across the M grid
    out = pl.pallas_call(
        _tail_kernel,
        out_shape=jax.ShapeDtypeStruct((m, n_out), jnp.float32),
        grid=(pl.cdiv(m, tm),),
        in_specs=[
            pl.BlockSpec((tm, kx), lambda i: (i, 0)),
            pl.BlockSpec((tm, kz), lambda i: (i, 0)),
            pl.BlockSpec(pp["fcx_w"].shape, res),
            pl.BlockSpec(pp["fcx_b"].shape, res),
            pl.BlockSpec(pp["fcz_w"].shape, res),
            pl.BlockSpec(pp["fcz_b"].shape, res),
            pl.BlockSpec(pp["j1x_w"].shape, res),
            pl.BlockSpec(pp["j1z_w"].shape, res),
            pl.BlockSpec(pp["j1_b"].shape, res),
            pl.BlockSpec(pp["j2_w"].shape, res),
            pl.BlockSpec(pp["j2_b"].shape, res),
        ],
        out_specs=pl.BlockSpec((tm, n_out), lambda i: (i, 0)),
        compiler_params=pltpu.CompilerParams(
            dimension_semantics=("parallel",)),
    )(hflat, eps, pp["fcx_w"], pp["fcx_b"], pp["fcz_w"], pp["fcz_b"],
      pp["j1x_w"], pp["j1z_w"], pp["j1_b"], pp["j2_w"], pp["j2_b"])
    return out[:, :1]


# ---------------------------------------------------------------------------
# Nu parameters (torch layout) + one-time device-friendly preparation
# ---------------------------------------------------------------------------
def init_nu_params(key, latent_dim):
    ks = jax.random.split(key, 14)
    s = 0.02  # deterministic small normal init (weights_init analogue)
    n = jax.random.normal
    return {
        "c1_w": s * n(ks[0], (16, 1, 5, 5), jnp.float32),
        "c1_b": s * n(ks[1], (16,), jnp.float32),
        "c2_w": s * n(ks[2], (32, 16, 5, 5), jnp.float32),
        "c2_b": s * n(ks[3], (32,), jnp.float32),
        "c3_w": s * n(ks[4], (32, 32, 5, 5), jnp.float32),
        "c3_b": s * n(ks[5], (32,), jnp.float32),
        "fcx_w": s * n(ks[6], (300, 32 * 4 * 4), jnp.float32),   # torch (out, in)
        "fcx_b": s * n(ks[7], (300,), jnp.float32),
        "fcz_w": s * n(ks[8], (300, latent_dim), jnp.float32),
        "fcz_b": s * n(ks[9], (300,), jnp.float32),
        "j1_w": s * n(ks[10], (300, 600), jnp.float32),
        "j1_b": s * n(ks[11], (300,), jnp.float32),
        "j2_w": s * n(ks[12], (1, 300), jnp.float32),
        "j2_b": s * n(ks[13], (1,), jnp.float32),
    }


def prepare_params(p):
    """One-time weight prep: transpose to (K, N), pack/pad, cast to bf16.

    INVARIANT the padded MLP tail relies on: the padded (>=300) columns of
    fcx/fcz/j1 produce softplus(0)=ln2 junk lanes which are consumed ONLY by
    zero rows of the next weight (j1x/j1z/j2 rows >= 300) or by zero j2
    output columns that are sliced off.  Never pad a contraction (K) dim and
    never consume a padded output without matching zero rows / a slice.
    Conv layers have NO junk lanes: their 128-lane outputs are fully real
    thanks to the block-diagonal pixel packing."""
    f32, bf16 = jnp.float32, jnp.bfloat16

    def conv_prep(w, b, pack):
        cout, cin, k, _ = w.shape
        f = cin * k * k
        assert pack * cout == 128, (pack, cout)
        wm = w.reshape(cout, f).T                        # (F, Cout), channel-major rows
        wblk = jnp.kron(jnp.eye(pack, dtype=f32), wm).astype(bf16)   # (pack*F, 128)
        bblk = jnp.tile(b, pack)[None, :].astype(f32)                # (1, 128)
        return wblk, bblk

    c1w, c1b = conv_prep(p["c1_w"], p["c1_b"], 8)   # Cout=16 -> 8 pixels / 128 lanes
    c2w, c2b = conv_prep(p["c2_w"], p["c2_b"], 4)   # Cout=32 -> 4 pixels / 128 lanes
    c3w, c3b = conv_prep(p["c3_w"], p["c3_b"], 4)

    hdim = p["fcx_b"].shape[0]                       # 300
    hp = _round_up(hdim, 128)                        # 384
    op = 128                                         # padded score width

    # fcx consumes our NHWC flatten; permute torch's CHW input ordering once.
    fx = p["fcx_w"].reshape(hdim, 32, 4, 4)                         # (o, c, h, w)
    fx = jnp.transpose(fx, (2, 3, 1, 0)).reshape(32 * 4 * 4, hdim)  # row = h*128+w*32+c
    fcx_w = jnp.zeros((fx.shape[0], hp), f32).at[:, :hdim].set(fx).astype(bf16)
    fcx_b = jnp.zeros((1, hp), f32).at[0, :hdim].set(p["fcx_b"])

    fz = p["fcz_w"].T                                 # (latent_dim, 300)
    fcz_w = jnp.zeros((fz.shape[0], hp), f32).at[:, :hdim].set(fz).astype(bf16)
    fcz_b = jnp.zeros((1, hp), f32).at[0, :hdim].set(p["fcz_b"])

    j1 = p["j1_w"].T                                  # (600, 300): rows 0..299 -> hx
    j1x_w = jnp.zeros((hp, hp), f32).at[:hdim, :hdim].set(j1[:hdim]).astype(bf16)
    j1z_w = jnp.zeros((hp, hp), f32).at[:hdim, :hdim].set(j1[hdim:]).astype(bf16)
    j1_b = jnp.zeros((1, hp), f32).at[0, :hdim].set(p["j1_b"])

    j2 = p["j2_w"].T                                  # (300, 1)
    j2_w = jnp.zeros((hp, op), f32).at[:hdim, :1].set(j2).astype(bf16)
    j2_b = jnp.zeros((1, op), f32).at[0, :1].set(p["j2_b"])

    return dict(c1_w=c1w, c1_b=c1b, c2_w=c2w, c2_b=c2b, c3_w=c3w, c3_b=c3b,
                fcx_w=fcx_w, fcx_b=fcx_b, fcz_w=fcz_w, fcz_b=fcz_b,
                j1x_w=j1x_w, j1z_w=j1z_w, j1_b=j1_b, j2_w=j2_w, j2_b=j2_b)


def nu_forward(pp, x, eps):
    """x: (B, 1, 32, 32) NCHW f32, eps: (B, latent_dim) f32 -> score (B, 1) f32."""
    ndf = 16
    h = jnp.transpose(x, (0, 2, 3, 1)).astype(jnp.bfloat16)        # NHWC, bf16 operands
    h = conv2d_softplus(h, pp["c1_w"], pp["c1_b"], ndf, pack=8)     # (B, 16, 16, 16)
    h = conv2d_softplus(h, pp["c2_w"], pp["c2_b"], 2 * ndf, pack=4)  # (B, 8, 8, 32)
    h = conv2d_softplus(h, pp["c3_w"], pp["c3_b"], 2 * ndf, pack=4)  # (B, 4, 4, 32)
    hflat = h.reshape(h.shape[0], -1)      # NHWC flatten (fcx rows pre-permuted to match)
    return tail_pallas(hflat, eps, pp)     # fused fcx/fcz/concat/j1/j2


if __name__ == "__main__":
    key = jax.random.PRNGKey(0)
    k_p, k_x, k_e = jax.random.split(key, 3)

    batch, latent_dim = 2, 8
    x = jax.random.normal(k_x, (batch, 1, 32, 32), jnp.float32)
    eps = jax.random.normal(k_e, (batch, latent_dim), jnp.float32)

    params = init_nu_params(k_p, latent_dim)
    prepared = prepare_params(params)           # one-time weight prep (packed, bf16)

    fwd = jax.jit(nu_forward)
    score = jax.block_until_ready(fwd(prepared, x, eps))

    assert score.shape == (batch, 1)
    assert bool(jnp.all(jnp.isfinite(score)))
    print("KERNEL_OK")
</pallas_src>

<mosaic_0001>
module attributes {stable_mosaic.version = 11 : i64} {
  func.func @_gemm_softplus_kernel(%arg0: i32, %arg1: memref<32x200xbf16, #tpu.memory_space<vmem>>, %arg2: memref<200x128xbf16, #tpu.memory_space<vmem>>, %arg3: memref<1x128xf32, #tpu.memory_space<vmem>>, %arg4: memref<32x128xbf16, #tpu.memory_space<vmem>>) attributes {dimension_semantics = [#tpu.dimension_semantics<parallel>], iteration_bounds = array<i64: 2>, scalar_prefetch = 0 : i64, scratch_operands = 0 : i64, tpu.core_type = #tpu.core_type<tc>, window_params = [{transform_indices = @transform_0, window_bounds = array<i64: 32, 200>}, {pipeline_mode = #tpu.pipeline_mode<synchronous>, transform_indices = @transform_1, window_bounds = array<i64: 200, 128>}, {pipeline_mode = #tpu.pipeline_mode<synchronous>, transform_indices = @transform_2, window_bounds = array<i64: 1, 128>}, {transform_indices = @transform_3, window_bounds = array<i64: 32, 128>}]} {
    %c0 = arith.constant 0 : index
    %c0_0 = arith.constant 0 : index
    %0 = vector.load %arg1[%c0, %c0_0] : memref<32x200xbf16, #tpu.memory_space<vmem>>, vector<32x200xbf16>
    %c0_1 = arith.constant 0 : index
    %c0_2 = arith.constant 0 : index
    %1 = vector.load %arg2[%c0_1, %c0_2] : memref<200x128xbf16, #tpu.memory_space<vmem>>, vector<200x128xbf16>
    %cst = arith.constant dense<0.000000e+00> : vector<32x128xf32>
    %2 = tpu.matmul %0, %1, %cst {dimension_numbers = #tpu.dot_dimension_numbers<[1], [0], [0], [1], [0, 0, 1, 1], [], []>} : vector<32x200xbf16>, vector<200x128xbf16>, vector<32x128xf32> -> vector<32x128xf32>
    %c0_3 = arith.constant 0 : index
    %c0_4 = arith.constant 0 : index
    %3 = vector.load %arg3[%c0_3, %c0_4] : memref<1x128xf32, #tpu.memory_space<vmem>>, vector<1x128xf32>
    %4 = vector.broadcast %3 : vector<1x128xf32> to vector<32x128xf32>
    %5 = arith.addf %2, %4 : vector<32x128xf32>
    %cst_5 = arith.constant 2.000000e+01 : f32
    %6 = vector.broadcast %cst_5 : f32 to vector<32x128xf32>
    %7 = arith.cmpf ogt, %5, %6 : vector<32x128xf32>
    %cst_6 = arith.constant 2.000000e+01 : f32
    %8 = vector.broadcast %cst_6 : f32 to vector<32x128xf32>
    %9 = arith.minimumf %5, %8 : vector<32x128xf32>
    %10 = math.exp %9 : vector<32x128xf32>
    %11 = math.log1p %10 : vector<32x128xf32>
    %12 = arith.select %7, %5, %11 : vector<32x128xi1>, vector<32x128xf32>
    %13 = arith.truncf %12 : vector<32x128xf32> to vector<32x128xbf16>
    %c0_7 = arith.constant 0 : index
    %c0_8 = arith.constant 0 : index
    %14 = vector.load %arg4[%c0_7, %c0_8] : memref<32x128xbf16, #tpu.memory_space<vmem>>, vector<32x128xbf16>
    tpu.vector_store %arg4[%c0_7, %c0_8], %13 {strides = array<i32>} : memref<32x128xbf16, #tpu.memory_space<vmem>>, vector<32x128xbf16>,
    return
  }
  func.func @transform_0(%arg0: i32) -> (i32, i32) {
    %c0_i32 = arith.constant 0 : i32
    %c0_i32_0 = arith.constant 0 : i32
    return %arg0, %c0_i32 : i32, i32
  }
  func.func @transform_1(%arg0: i32) -> (i32, i32) {
    %c0_i32 = arith.constant 0 : i32
    %c0_i32_0 = arith.constant 0 : i32
    %c0_i32_1 = arith.constant 0 : i32
    return %c0_i32, %c0_i32_0 : i32, i32
  }
  func.func @transform_2(%arg0: i32) -> (i32, i32) {
    %c0_i32 = arith.constant 0 : i32
    %c0_i32_0 = arith.constant 0 : i32
    %c0_i32_1 = arith.constant 0 : i32
    return %c0_i32, %c0_i32_0 : i32, i32
  }
  func.func @transform_3(%arg0: i32) -> (i32, i32) {
    %c0_i32 = arith.constant 0 : i32
    %c0_i32_0 = arith.constant 0 : i32
    return %arg0, %c0_i32 : i32, i32
  }
}

module attributes {stable_mosaic.version = 11 : i64} {
  func.func @_gemm_softplus_kernel(%arg0: i32, %arg1: memref<32x1600xbf16, #tpu.memory_space<vmem>>, %arg2: memref<1600x128xbf16, #tpu.memory_space<vmem>>, %arg3: memref<1x128xf32, #tpu.memory_space<vmem>>, %arg4: memref<32x128xbf16, #tpu.memory_space<vmem>>) attributes {dimension_semantics = [#tpu.dimension_semantics<parallel>], iteration_bounds = array<i64: 1>, scalar_prefetch = 0 : i64, scratch_operands = 0 : i64, tpu.core_type = #tpu.core_type<tc>, window_params = [{transform_indices = @transform_0, window_bounds = array<i64: 32, 1600>}, {pipeline_mode = #tpu.pipeline_mode<synchronous>, transform_indices = @transform_1, window_bounds = array<i64: 1600, 128>}, {pipeline_mode = #tpu.pipeline_mode<synchronous>, transform_indices = @transform_2, window_bounds = array<i64: 1, 128>}, {transform_indices = @transform_3, window_bounds = array<i64: 32, 128>}]} {
    %c0 = arith.constant 0 : index
    %c0_0 = arith.constant 0 : index
    %0 = vector.load %arg1[%c0, %c0_0] : memref<32x1600xbf16, #tpu.memory_space<vmem>>, vector<32x1600xbf16>
    %c0_1 = arith.constant 0 : index
    %c0_2 = arith.constant 0 : index
    %1 = vector.load %arg2[%c0_1, %c0_2] : memref<1600x128xbf16, #tpu.memory_space<vmem>>, vector<1600x128xbf16>
    %cst = arith.constant dense<0.000000e+00> : vector<32x128xf32>
    %2 = tpu.matmul %0, %1, %cst {dimension_numbers = #tpu.dot_dimension_numbers<[1], [0], [0], [1], [0, 0, 1, 1], [], []>} : vector<32x1600xbf16>, vector<1600x128xbf16>, vector<32x128xf32> -> vector<32x128xf32>
    %c0_3 = arith.constant 0 : index
    %c0_4 = arith.constant 0 : index
    %3 = vector.load %arg3[%c0_3, %c0_4] : memref<1x128xf32, #tpu.memory_space<vmem>>, vector<1x128xf32>
    %4 = vector.broadcast %3 : vector<1x128xf32> to vector<32x128xf32>
    %5 = arith.addf %2, %4 : vector<32x128xf32>
    %cst_5 = arith.constant 2.000000e+01 : f32
    %6 = vector.broadcast %cst_5 : f32 to vector<32x128xf32>
    %7 = arith.cmpf ogt, %5, %6 : vector<32x128xf32>
    %cst_6 = arith.constant 2.000000e+01 : f32
    %8 = vector.broadcast %cst_6 : f32 to vector<32x128xf32>
    %9 = arith.minimumf %5, %8 : vector<32x128xf32>
    %10 = math.exp %9 : vector<32x128xf32>
    %11 = math.log1p %10 : vector<32x128xf32>
    %12 = arith.select %7, %5, %11 : vector<32x128xi1>, vector<32x128xf32>
    %13 = arith.truncf %12 : vector<32x128xf32> to vector<32x128xbf16>
    %c0_7 = arith.constant 0 : index
    %c0_8 = arith.constant 0 : index
    %14 = vector.load %arg4[%c0_7, %c0_8] : memref<32x128xbf16, #tpu.memory_space<vmem>>, vector<32x128xbf16>
    tpu.vector_store %arg4[%c0_7, %c0_8], %13 {strides = array<i32>} : memref<32x128xbf16, #tpu.memory_space<vmem>>, vector<32x128xbf16>,
    return
  }
  func.func @transform_0(%arg0: i32) -> (i32, i32) {
    %c0_i32 = arith.constant 0 : i32
    %c0_i32_0 = arith.constant 0 : i32
    return %arg0, %c0_i32 : i32, i32
  }
  func.func @transform_1(%arg0: i32) -> (i32, i32) {
    %c0_i32 = arith.constant 0 : i32
    %c0_i32_0 = arith.constant 0 : i32
    %c0_i32_1 = arith.constant 0 : i32
    return %c0_i32, %c0_i32_0 : i32, i32
  }
  func.func @transform_2(%arg0: i32) -> (i32, i32) {
    %c0_i32 = arith.constant 0 : i32
    %c0_i32_0 = arith.constant 0 : i32
    %c0_i32_1 = arith.constant 0 : i32
    return %c0_i32, %c0_i32_0 : i32, i32
  }
  func.func @transform_3(%arg0: i32) -> (i32, i32) {
    %c0_i32 = arith.constant 0 : i32
    %c0_i32_0 = arith.constant 0 : i32
    return %arg0, %c0_i32 : i32, i32
  }
}

module attributes {stable_mosaic.version = 11 : i64} {
  func.func @_gemm_softplus_kernel(%arg0: i32, %arg1: memref<8x3200xbf16, #tpu.memory_space<vmem>>, %arg2: memref<3200x128xbf16, #tpu.memory_space<vmem>>, %arg3: memref<1x128xf32, #tpu.memory_space<vmem>>, %arg4: memref<8x128xbf16, #tpu.memory_space<vmem>>) attributes {dimension_semantics = [#tpu.dimension_semantics<parallel>], iteration_bounds = array<i64: 1>, scalar_prefetch = 0 : i64, scratch_operands = 0 : i64, tpu.core_type = #tpu.core_type<tc>, window_params = [{transform_indices = @transform_0, window_bounds = array<i64: 8, 3200>}, {pipeline_mode = #tpu.pipeline_mode<synchronous>, transform_indices = @transform_1, window_bounds = array<i64: 3200, 128>}, {pipeline_mode = #tpu.pipeline_mode<synchronous>, transform_indices = @transform_2, window_bounds = array<i64: 1, 128>}, {transform_indices = @transform_3, window_bounds = array<i64: 8, 128>}]} {
    %c0 = arith.constant 0 : index
    %c0_0 = arith.constant 0 : index
    %0 = vector.load %arg1[%c0, %c0_0] : memref<8x3200xbf16, #tpu.memory_space<vmem>>, vector<8x3200xbf16>
    %c0_1 = arith.constant 0 : index
    %c0_2 = arith.constant 0 : index
    %1 = vector.load %arg2[%c0_1, %c0_2] : memref<3200x128xbf16, #tpu.memory_space<vmem>>, vector<3200x128xbf16>
    %cst = arith.constant dense<0.000000e+00> : vector<8x128xf32>
    %2 = tpu.matmul %0, %1, %cst {dimension_numbers = #tpu.dot_dimension_numbers<[1], [0], [0], [1], [0, 0, 1, 1], [], []>} : vector<8x3200xbf16>, vector<3200x128xbf16>, vector<8x128xf32> -> vector<8x128xf32>
    %c0_3 = arith.constant 0 : index
    %c0_4 = arith.constant 0 : index
    %3 = vector.load %arg3[%c0_3, %c0_4] : memref<1x128xf32, #tpu.memory_space<vmem>>, vector<1x128xf32>
    %4 = vector.broadcast %3 : vector<1x128xf32> to vector<8x128xf32>
    %5 = arith.addf %2, %4 : vector<8x128xf32>
    %cst_5 = arith.constant 2.000000e+01 : f32
    %6 = vector.broadcast %cst_5 : f32 to vector<8x128xf32>
    %7 = arith.cmpf ogt, %5, %6 : vector<8x128xf32>
    %cst_6 = arith.constant 2.000000e+01 : f32
    %8 = vector.broadcast %cst_6 : f32 to vector<8x128xf32>
    %9 = arith.minimumf %5, %8 : vector<8x128xf32>
    %10 = math.exp %9 : vector<8x128xf32>
    %11 = math.log1p %10 : vector<8x128xf32>
    %12 = arith.select %7, %5, %11 : vector<8x128xi1>, vector<8x128xf32>
    %13 = arith.truncf %12 : vector<8x128xf32> to vector<8x128xbf16>
    %c0_7 = arith.constant 0 : index
    %c0_8 = arith.constant 0 : index
    %14 = vector.load %arg4[%c0_7, %c0_8] : memref<8x128xbf16, #tpu.memory_space<vmem>>, vector<8x128xbf16>
    tpu.vector_store %arg4[%c0_7, %c0_8], %13 {strides = array<i32>} : memref<8x128xbf16, #tpu.memory_space<vmem>>, vector<8x128xbf16>,
    return
  }
  func.func @transform_0(%arg0: i32) -> (i32, i32) {
    %c0_i32 = arith.constant 0 : i32
    %c0_i32_0 = arith.constant 0 : i32
    return %arg0, %c0_i32 : i32, i32
  }
  func.func @transform_1(%arg0: i32) -> (i32, i32) {
    %c0_i32 = arith.constant 0 : i32
    %c0_i32_0 = arith.constant 0 : i32
    %c0_i32_1 = arith.constant 0 : i32
    return %c0_i32, %c0_i32_0 : i32, i32
  }
  func.func @transform_2(%arg0: i32) -> (i32, i32) {
    %c0_i32 = arith.constant 0 : i32
    %c0_i32_0 = arith.constant 0 : i32
    %c0_i32_1 = arith.constant 0 : i32
    return %c0_i32, %c0_i32_0 : i32, i32
  }
  func.func @transform_3(%arg0: i32) -> (i32, i32) {
    %c0_i32 = arith.constant 0 : i32
    %c0_i32_0 = arith.constant 0 : i32
    return %arg0, %c0_i32 : i32, i32
  }
}

module attributes {stable_mosaic.version = 11 : i64} {
  func.func @_tail_kernel(%arg0: i32, %arg1: memref<2x512xbf16, #tpu.memory_space<vmem>>, %arg2: memref<2x8xf32, #tpu.memory_space<vmem>>, %arg3: memref<512x384xbf16, #tpu.memory_space<vmem>>, %arg4: memref<1x384xf32, #tpu.memory_space<vmem>>, %arg5: memref<8x384xbf16, #tpu.memory_space<vmem>>, %arg6: memref<1x384xf32, #tpu.memory_space<vmem>>, %arg7: memref<384x384xbf16, #tpu.memory_space<vmem>>, %arg8: memref<384x384xbf16, #tpu.memory_space<vmem>>, %arg9: memref<1x384xf32, #tpu.memory_space<vmem>>, %arg10: memref<384x128xbf16, #tpu.memory_space<vmem>>, %arg11: memref<1x128xf32, #tpu.memory_space<vmem>>, %arg12: memref<2x128xf32, #tpu.memory_space<vmem>>) attributes {dimension_semantics = [#tpu.dimension_semantics<parallel>], iteration_bounds = array<i64: 1>, scalar_prefetch = 0 : i64, scratch_operands = 0 : i64, tpu.core_type = #tpu.core_type<tc>, window_params = [{transform_indices = @transform_0, window_bounds = array<i64: 2, 512>}, {transform_indices = @transform_1, window_bounds = array<i64: 2, 8>}, {pipeline_mode = #tpu.pipeline_mode<synchronous>, transform_indices = @transform_2, window_bounds = array<i64: 512, 384>}, {pipeline_mode = #tpu.pipeline_mode<synchronous>, transform_indices = @transform_3, window_bounds = array<i64: 1, 384>}, {pipeline_mode = #tpu.pipeline_mode<synchronous>, transform_indices = @transform_4, window_bounds = array<i64: 8, 384>}, {pipeline_mode = #tpu.pipeline_mode<synchronous>, transform_indices = @transform_5, window_bounds = array<i64: 1, 384>}, {pipeline_mode = #tpu.pipeline_mode<synchronous>, transform_indices = @transform_6, window_bounds = array<i64: 384, 384>}, {pipeline_mode = #tpu.pipeline_mode<synchronous>, transform_indices = @transform_7, window_bounds = array<i64: 384, 384>}, {pipeline_mode = #tpu.pipeline_mode<synchronous>, transform_indices = @transform_8, window_bounds = array<i64: 1, 384>}, {pipeline_mode = #tpu.pipeline_mode<synchronous>, transform_indices = @transform_9, window_bounds = array<i64: 384, 128>}, {pipeline_mode = #tpu.pipeline_mode<synchronous>, transform_indices = @transform_10, window_bounds = array<i64: 1, 128>}, {transform_indices = @transform_11, window_bounds = array<i64: 2, 128>}]} {
    %c0 = arith.constant 0 : index
    %c0_0 = arith.constant 0 : index
    %0 = vector.load %arg1[%c0, %c0_0] : memref<2x512xbf16, #tpu.memory_space<vmem>>, vector<2x512xbf16>
    %c0_1 = arith.constant 0 : index
    %c0_2 = arith.constant 0 : index
    %1 = vector.load %arg3[%c0_1, %c0_2] : memref<512x384xbf16, #tpu.memory_space<vmem>>, vector<512x384xbf16>
    %cst = arith.constant dense<0.000000e+00> : vector<2x384xf32>
    %2 = tpu.matmul %0, %1, %cst {dimension_numbers = #tpu.dot_dimension_numbers<[1], [0], [0], [1], [0, 0, 1, 1], [], []>} : vector<2x512xbf16>, vector<512x384xbf16>, vector<2x384xf32> -> vector<2x384xf32>
    %c0_3 = arith.constant 0 : index
    %c0_4 = arith.constant 0 : index
    %3 = vector.load %arg4[%c0_3, %c0_4] : memref<1x384xf32, #tpu.memory_space<vmem>>, vector<1x384xf32>
    %4 = vector.broadcast %3 : vector<1x384xf32> to vector<2x384xf32>
    %5 = arith.addf %2, %4 : vector<2x384xf32>
    %cst_5 = arith.constant 2.000000e+01 : f32
    %6 = vector.broadcast %cst_5 : f32 to vector<2x384xf32>
    %7 = arith.cmpf ogt, %5, %6 : vector<2x384xf32>
    %cst_6 = arith.constant 2.000000e+01 : f32
    %8 = vector.broadcast %cst_6 : f32 to vector<2x384xf32>
    %9 = arith.minimumf %5, %8 : vector<2x384xf32>
    %10 = math.exp %9 : vector<2x384xf32>
    %11 = math.log1p %10 : vector<2x384xf32>
    %12 = arith.select %7, %5, %11 : vector<2x384xi1>, vector<2x384xf32>
    %13 = arith.truncf %12 : vector<2x384xf32> to vector<2x384xbf16>
    %c0_7 = arith.constant 0 : index
    %c0_8 = arith.constant 0 : index
    %14 = vector.load %arg2[%c0_7, %c0_8] : memref<2x8xf32, #tpu.memory_space<vmem>>, vector<2x8xf32>
    %15 = arith.truncf %14 : vector<2x8xf32> to vector<2x8xbf16>
    %c0_9 = arith.constant 0 : index
    %c0_10 = arith.constant 0 : index
    %16 = vector.load %arg5[%c0_9, %c0_10] : memref<8x384xbf16, #tpu.memory_space<vmem>>, vector<8x384xbf16>
    %cst_11 = arith.constant dense<0.000000e+00> : vector<2x384xf32>
    %17 = tpu.matmul %15, %16, %cst_11 {dimension_numbers = #tpu.dot_dimension_numbers<[1], [0], [0], [1], [0, 0, 1, 1], [], []>} : vector<2x8xbf16>, vector<8x384xbf16>, vector<2x384xf32> -> vector<2x384xf32>
    %c0_12 = arith.constant 0 : index
    %c0_13 = arith.constant 0 : index
    %18 = vector.load %arg6[%c0_12, %c0_13] : memref<1x384xf32, #tpu.memory_space<vmem>>, vector<1x384xf32>
    %19 = vector.broadcast %18 : vector<1x384xf32> to vector<2x384xf32>
    %20 = arith.addf %17, %19 : vector<2x384xf32>
    %cst_14 = arith.constant 2.000000e+01 : f32
    %21 = vector.broadcast %cst_14 : f32 to vector<2x384xf32>
    %22 = arith.cmpf ogt, %20, %21 : vector<2x384xf32>
    %cst_15 = arith.constant 2.000000e+01 : f32
    %23 = vector.broadcast %cst_15 : f32 to vector<2x384xf32>
    %24 = arith.minimumf %20, %23 : vector<2x384xf32>
    %25 = math.exp %24 : vector<2x384xf32>
    %26 = math.log1p %25 : vector<2x384xf32>
    %27 = arith.select %22, %20, %26 : vector<2x384xi1>, vector<2x384xf32>
    %28 = arith.truncf %27 : vector<2x384xf32> to vector<2x384xbf16>
    %c0_16 = arith.constant 0 : index
    %c0_17 = arith.constant 0 : index
    %29 = vector.load %arg7[%c0_16, %c0_17] : memref<384x384xbf16, #tpu.memory_space<vmem>>, vector<384x384xbf16>
    %cst_18 = arith.constant dense<0.000000e+00> : vector<2x384xf32>
    %30 = tpu.matmul %13, %29, %cst_18 {dimension_numbers = #tpu.dot_dimension_numbers<[1], [0], [0], [1], [0, 0, 1, 1], [], []>} : vector<2x384xbf16>, vector<384x384xbf16>, vector<2x384xf32> -> vector<2x384xf32>
    %c0_19 = arith.constant 0 : index
    %c0_20 = arith.constant 0 : index
    %31 = vector.load %arg8[%c0_19, %c0_20] : memref<384x384xbf16, #tpu.memory_space<vmem>>, vector<384x384xbf16>
    %cst_21 = arith.constant dense<0.000000e+00> : vector<2x384xf32>
    %32 = tpu.matmul %28, %31, %cst_21 {dimension_numbers = #tpu.dot_dimension_numbers<[1], [0], [0], [1], [0, 0, 1, 1], [], []>} : vector<2x384xbf16>, vector<384x384xbf16>, vector<2x384xf32> -> vector<2x384xf32>
    %33 = arith.addf %30, %32 : vector<2x384xf32>
    %c0_22 = arith.constant 0 : index
    %c0_23 = arith.constant 0 : index
    %34 = vector.load %arg9[%c0_22, %c0_23] : memref<1x384xf32, #tpu.memory_space<vmem>>, vector<1x384xf32>
    %35 = vector.broadcast %34 : vector<1x384xf32> to vector<2x384xf32>
    %36 = arith.addf %33, %35 : vector<2x384xf32>
    %cst_24 = arith.constant 2.000000e+01 : f32
    %37 = vector.broadcast %cst_24 : f32 to vector<2x384xf32>
    %38 = arith.cmpf ogt, %36, %37 : vector<2x384xf32>
    %cst_25 = arith.constant 2.000000e+01 : f32
    %39 = vector.broadcast %cst_25 : f32 to vector<2x384xf32>
    %40 = arith.minimumf %36, %39 : vector<2x384xf32>
    %41 = math.exp %40 : vector<2x384xf32>
    %42 = math.log1p %41 : vector<2x384xf32>
    %43 = arith.select %38, %36, %42 : vector<2x384xi1>, vector<2x384xf32>
    %44 = arith.truncf %43 : vector<2x384xf32> to vector<2x384xbf16>
    %c0_26 = arith.constant 0 : index
    %c0_27 = arith.constant 0 : index
    %45 = vector.load %arg10[%c0_26, %c0_27] : memref<384x128xbf16, #tpu.memory_space<vmem>>, vector<384x128xbf16>
    %cst_28 = arith.constant dense<0.000000e+00> : vector<2x128xf32>
    %46 = tpu.matmul %44, %45, %cst_28 {dimension_numbers = #tpu.dot_dimension_numbers<[1], [0], [0], [1], [0, 0, 1, 1], [], []>} : vector<2x384xbf16>, vector<384x128xbf16>, vector<2x128xf32> -> vector<2x128xf32>
    %c0_29 = arith.constant 0 : index
    %c0_30 = arith.constant 0 : index
    %47 = vector.load %arg11[%c0_29, %c0_30] : memref<1x128xf32, #tpu.memory_space<vmem>>, vector<1x128xf32>
    %48 = vector.broadcast %47 : vector<1x128xf32> to vector<2x128xf32>
    %49 = arith.addf %46, %48 : vector<2x128xf32>
    %c0_31 = arith.constant 0 : index
    %c0_32 = arith.constant 0 : index
    %50 = vector.load %arg12[%c0_31, %c0_32] : memref<2x128xf32, #tpu.memory_space<vmem>>, vector<2x128xf32>
    tpu.vector_store %arg12[%c0_31, %c0_32], %49 {strides = array<i32>} : memref<2x128xf32, #tpu.memory_space<vmem>>, vector<2x128xf32>,
    return
  }
  func.func @transform_0(%arg0: i32) -> (i32, i32) {
    %c0_i32 = arith.constant 0 : i32
    %c0_i32_0 = arith.constant 0 : i32
    return %arg0, %c0_i32 : i32, i32
  }
  func.func @transform_1(%arg0: i32) -> (i32, i32) {
    %c0_i32 = arith.constant 0 : i32
    %c0_i32_0 = arith.constant 0 : i32
    return %arg0, %c0_i32 : i32, i32
  }
  func.func @transform_2(%arg0: i32) -> (i32, i32) {
    %c0_i32 = arith.constant 0 : i32
    %c0_i32_0 = arith.constant 0 : i32
    %c0_i32_1 = arith.constant 0 : i32
    return %c0_i32, %c0_i32_0 : i32, i32
  }
  func.func @transform_3(%arg0: i32) -> (i32, i32) {
    %c0_i32 = arith.constant 0 : i32
    %c0_i32_0 = arith.constant 0 : i32
    %c0_i32_1 = arith.constant 0 : i32
    return %c0_i32, %c0_i32_0 : i32, i32
  }
  func.func @transform_4(%arg0: i32) -> (i32, i32) {
    %c0_i32 = arith.constant 0 : i32
    %c0_i32_0 = arith.constant 0 : i32
    %c0_i32_1 = arith.constant 0 : i32
    return %c0_i32, %c0_i32_0 : i32, i32
  }
  func.func @transform_5(%arg0: i32) -> (i32, i32) {
    %c0_i32 = arith.constant 0 : i32
    %c0_i32_0 = arith.constant 0 : i32
    %c0_i32_1 = arith.constant 0 : i32
    return %c0_i32, %c0_i32_0 : i32, i32
  }
  func.func @transform_6(%arg0: i32) -> (i32, i32) {
    %c0_i32 = arith.constant 0 : i32
    %c0_i32_0 = arith.constant 0 : i32
    %c0_i32_1 = arith.constant 0 : i32
    return %c0_i32, %c0_i32_0 : i32, i32
  }
  func.func @transform_7(%arg0: i32) -> (i32, i32) {
    %c0_i32 = arith.constant 0 : i32
    %c0_i32_0 = arith.constant 0 : i32
    %c0_i32_1 = arith.constant 0 : i32
    return %c0_i32, %c0_i32_0 : i32, i32
  }
  func.func @transform_8(%arg0: i32) -> (i32, i32) {
    %c0_i32 = arith.constant 0 : i32
    %c0_i32_0 = arith.constant 0 : i32
    %c0_i32_1 = arith.constant 0 : i32
    return %c0_i32, %c0_i32_0 : i32, i32
  }
  func.func @transform_9(%arg0: i32) -> (i32, i32) {
    %c0_i32 = arith.constant 0 : i32
    %c0_i32_0 = arith.constant 0 : i32
    %c0_i32_1 = arith.constant 0 : i32
    return %c0_i32, %c0_i32_0 : i32, i32
  }
  func.func @transform_10(%arg0: i32) -> (i32, i32) {
    %c0_i32 = arith.constant 0 : i32
    %c0_i32_0 = arith.constant 0 : i32
    %c0_i32_1 = arith.constant 0 : i32
    return %c0_i32, %c0_i32_0 : i32, i32
  }
  func.func @transform_11(%arg0: i32) -> (i32, i32) {
    %c0_i32 = arith.constant 0 : i32
    %c0_i32_0 = arith.constant 0 : i32
    return %arg0, %c0_i32 : i32, i32
  }
}

</mosaic_0001>

<bundles_post_ra>
// kernel: nu_forward.4
= control target key start
LH: loop header
LB: loop body
LE: loop exit
PB: predicated region body
PF: predicated region fallthrough
CT: control target
= control target key end

     0   :  { %s645_s12 = smov 0   ;;  %s718_s0 = inlined_call_operand.vmem [shape: bf16[64,200], index: 0, kind: input, shape index: {}]   ;;  %s719_s1 = inlined_call_operand.vmem [shape: bf16[200,128], index: 1, kind: input, shape index: {}]   ;;  %s720_s2 = inlined_call_operand.vmem [shape: f32[1,128], index: 2, kind: input, shape index: {}]   ;;  %s721_s3 = inlined_call_operand.vmem [shape: bf16[64,128], index: 3, kind: output, shape index: {}]  }
   0x1 LB: > { %s473_s13 = sadd.s32 4294967295, %s623_s12   ;;  %p477_p0 = scmp.ge.s32.totalorder %s623_s12, 1  ;;  %s623_s12 = sphi %s645_s12, %s13_s12  }
   0x2   : > { %p139_p1 = scmp.lt.s32.totalorder %s623_s12, 3 }
   0x4   : > { %p140_p2 = pnand %p477_p0, %p139_p1 }
   0x5   : > { %s478_s20 = sshll.u32 (!%p140_p2), %s473_s13, 2 }
   0x6   : > { %143 = sbr.rel (%p140_p2) target bundleno = 214 (0xd6), region = 32  ;;  %p165_p3 = scmp.lt.s32.totalorder (!%p140_p2), %s478_s20, 7 }
   0xb   : > { %v563_v0 = vld [vmem:[%s719_s1 + $0x38] sm:$0xff]  ;;  %v206_v1 = vld [vmem:[%s719_s1 + $0x60] sm:$0xf]  ;;  %v562_v3 = vld [vmem:[%s719_s1 + $0x30] sm:$0xff]  ;;  %vm311_vm0 = vcmask 1043456   ;;  %s723_s20 = smov (!%p165_p3, %s478_s20), 7 }
   0xc   : > { %v278_v2 = vunpack.c.l.b16 %v206_v1  ;;  %315 = vmatpush.bf16.msra.mxu0 %v563_v0  ;;  %579 = vmatpush.bf16.msra.mxu2 %v563_v0  ;;  %v561_v6 = vld [vmem:[%s719_s1 + $0x28] sm:$0xff]  ;;  %v567_v7 = vld [vmem:[%s719_s1 + $0x58] sm:$0xff]  ;;  %v560_v8 = vld [vmem:[%s719_s1 + $0x20] sm:$0xff]  ;;  %s551_s29 = sshll.u32 %s723_s20, 3  ;;  %vm304_vm1 = vcmask 588800   ;;  %s482_s22 = sshll.u32 %s723_s20, 2 }
   0xd   : > { %v566_v9 = vld [vmem:[%s719_s1 + $0x50] sm:$0xff]  ;;  %v559_v10 = vld [vmem:[%s719_s1 + $0x18] sm:$0xff]  ;;  %v565_v11 = vld [vmem:[%s719_s1 + $0x48] sm:$0xff]  ;;  %s169_s9 = scalar_lea.vmem %s718_s0, %s551_s29  ;;  %s175_s25 = scalar_lea.vmem %s721_s3, %s482_s22 }
   0xe   : > { %v291_v4 = vpack.c.b16 %v278_v2, %v278_v2  ;;  %v558_v12 = vld [vmem:[%s719_s1 + $0x10] sm:$0xff]  ;;  %v564_v13 = vld [vmem:[%s719_s1 + $0x40] sm:$0xff]  ;;  %v495_v15 = vld [vmem:[%s169_s9 + $0x18] sm:$0xf0] }
   0xf   : > { %v554_v14 = vld [vmem:[%s169_s9 + $0x14] sm:$0xf]  ;;  %v552_v16 = vld [vmem:[%s169_s9 + $0x4] sm:$0xf]  ;;  %v487_v17 = vld [vmem:[%s169_s9 + $0x8] sm:$0xf0] }
  0x10   : > { %v313_v5 = vsel %vm311_vm0, %v291_v4, 0  ;;  %316 = vmatpush.bf16.msra.mxu0 %v562_v3  ;;  %580 = vmatpush.bf16.msra.mxu2 %v562_v3  ;;  %v557_v18 = vld [vmem:[%s719_s1 + $0x8] sm:$0xff]  ;;  %v498_v19 = vor.u32 %v554_v14, %v495_v15  ;;  %v490_v20 = vor.u32 %v552_v16, %v487_v17  ;;  %v556_v21 = vld [vmem:[%s719_s1] sm:$0xff]  ;;  %v493_v24 = vld [vmem:[%s169_s9 + $0x10] sm:$0xf] }
  0x11   : > { %587 = vmatpush.bf16.msra.mxu3 %v313_v5  ;;  %337 = vmatpush.bf16.msra.mxu1 %v313_v5  ;;  %v485_v22 = vld [vmem:[%s169_s9] sm:$0xf]  ;;  %v553_v23 = vld [vmem:[%s169_s9 + $0x4] sm:$0xf0]  ;;  %v555_v25 = vld [vmem:[%s169_s9 + $0x14] sm:$0xf0] }
  0x12   : > { %v486_v26 = vor.u32 %v553_v23, %v485_v22  ;;  %v494_v27 = vor.u32 %v555_v25, %v493_v24  ;;  %v600_v28 = vld [vmem:[%s720_s2] ss:$0 sm:$0xff] }
  0x14   : > { %317 = vmatpush.bf16.msra.mxu0 %v561_v6  ;;  %581 = vmatpush.bf16.msra.mxu2 %v561_v6 }
  0x15   : > { %588 = vmatpush.bf16.msra.mxu3 %v567_v7  ;;  %338 = vmatpush.bf16.msra.mxu1 %v567_v7 }
  0x18   : > { %318 = vmatpush.bf16.msra.mxu0 %v560_v8  ;;  %582 = vmatpush.bf16.msra.mxu2 %v560_v8 }
  0x19   : > { %589 = vmatpush.bf16.msra.mxu3 %v566_v9  ;;  %339 = vmatpush.bf16.msra.mxu1 %v566_v9 }
  0x1c   : > { %319 = vmatpush.bf16.msra.mxu0 %v559_v10  ;;  %583 = vmatpush.bf16.msra.mxu2 %v559_v10 }
  0x1d   : > { %590 = vmatpush.bf16.msra.mxu3 %v565_v11  ;;  %340 = vmatpush.bf16.msra.mxu1 %v565_v11 }
  0x20   : > { %320 = vmatpush.bf16.msra.mxu0 %v558_v12  ;;  %584 = vmatpush.bf16.msra.mxu2 %v558_v12 }
  0x21   : > { %591 = vmatpush.bf16.msra.mxu3 %v564_v13  ;;  %341 = vmatpush.bf16.msra.mxu1 %v564_v13 }
  0x24   : > { %321 = vmatpush.bf16.msra.mxu0 %v557_v18  ;;  %585 = vmatpush.bf16.msra.mxu2 %v557_v18 }
  0x25   : > { %548 = vmatmul.msk.bf16.vlgmr.msra.gmra.mxu3 %vm304_vm1, %v498_v19  ;;  %547 = vmatmul.msk.bf16.vlgmr.msra.gmra.mxu1 %vm304_vm1, %v490_v20 }
  0x28   : > { %322 = vmatpush.bf16.msra.mxu0 %v556_v21  ;;  %586 = vmatpush.bf16.msra.mxu2 %v556_v21 }
  0x2b   : > { %323 = vmatmul.bf16.vlgmr.msra.gmra.mxu0 %v486_v26  ;;  %328 = vmatmul.bf16.vlgmr.msra.gmra.mxu2 %v494_v27 }
  0xa2   : > { %v343_v29 = vpop.f32.mrf.mxu1 }
  0xa8   : > { %v324_v30 = vpop.f32.mrf.mxu0  ;;  %v348_v34 = vpop.f32.mrf.mxu3 }
  0xa9   : > { %v325_v31 = vadd.f32 %v600_v28, %v324_v30 }
  0xaa   : > { %v345_v41 = vpop.f32.mrf.mxu1 }
  0xab   : > { %v701_v32 = vadd.f32 %v343_v29, %v325_v31 }
  0xad   : > { %v357_v33 = vmin.f32 %v701_v32, 20.0  ;;  %vm353_vm3 = vcmp.gt.f32.partialorder %v701_v32, 20.0 }
  0xae   : > { %v329_v35 = vpop.f32.mrf.mxu2 }
  0xaf   : > { %v361_v36 = vmul.f32 1.442695, %v357_v33  ;;  %v330_v37 = vadd.f32 %v600_v28, %v329_v35 }
  0xb0   : > { %v326_v38 = vpop.f32.mrf.mxu0  ;;  %v350_v51 = vpop.f32.mrf.mxu3 }
  0xb1   : > { %601 = vpow2.f32 %v361_v36  ;;  %v704_v39 = vadd.f32 %v348_v34, %v330_v37  ;;  %v327_v40 = vadd.f32 %v600_v28, %v326_v38 }
  0xb3   : > { %v359_v42 = vmin.f32 %v704_v39, 20.0  ;;  %v346_v43 = vadd.f32 %v345_v41, %v327_v40  ;;  %vm355_vm8 = vcmp.gt.f32.partialorder %v704_v39, 20.0 }
  0xb5   : > { %v365_v44 = vmul.f32 1.442695, %v359_v42  ;;  %v358_v45 = vmin.f32 %v346_v43, 20.0  ;;  %vm354_vm5 = vcmp.gt.f32.partialorder %v346_v43, 20.0 }
  0xb6   : > { %v331_v46 = vpop.f32.mrf.mxu2 }
  0xb7   : > { %v602_v47 = vpop.eup %601  ;;  %603 = vpow2.f32 %v365_v44  ;;  %v363_v48 = vmul.f32 1.442695, %v358_v45  ;;  %v332_v49 = vadd.f32 %v600_v28, %v331_v46 }
  0xb8   : > { %v369_v50 = vadd.f32 1.0, %v602_v47  ;;  %v372_v58 = vmul.f32 -0.5, %v602_v47  ;;  %v375_v63 = vand.u32 2147483647, %v602_v47 }
  0xb9   : > { %605 = vpow2.f32 %v363_v48  ;;  %v351_v52 = vadd.f32 %v350_v51, %v332_v49 }
  0xba   : > { %607 = vlog2.f32 %v369_v50  ;;  %v373_v62 = vadd.f32 1.0, %v372_v58  ;;  %vm376_vm2 = vcmp.lt.f32.partialorder %v375_v63, 0.0004427343 }
  0xbb   : > { %v360_v53 = vmin.f32 %v351_v52, 20.0  ;;  %vm356_vm9 = vcmp.gt.f32.partialorder %v351_v52, 20.0 }
  0xbc   : > { %v374_v7 = vmul.f32 %v602_v47, %v373_v62 }
  0xbd   : > { %v604_v54 = vpop.eup %603  ;;  %v367_v55 = vmul.f32 1.442695, %v360_v53 }
  0xbe   : > { %v387_v56 = vadd.f32 1.0, %v604_v54  ;;  %v390_v2 = vmul.f32 -0.5, %v604_v54  ;;  %v393_v14 = vand.u32 2147483647, %v604_v54 }
  0xbf   : > { %v606_v57 = vpop.eup %605  ;;  %609 = vpow2.f32 %v367_v55 }
  0xc0   : > { %v378_v59 = vadd.f32 1.0, %v606_v57  ;;  %611 = vlog2.f32 %v387_v56  ;;  %v381_v60 = vmul.f32 -0.5, %v606_v57  ;;  %v608_v61 = vpop.eup %607  ;;  %v384_v4 = vand.u32 2147483647, %v606_v57 }
  0xc1   : > { %v371_v1 = vmul.f32 0.6931472, %v608_v61  ;;  %v391_v11 = vadd.f32 1.0, %v390_v2  ;;  %vm394_vm6 = vcmp.lt.f32.partialorder %v393_v14, 0.0004427343 }
  0xc2   : > { %613 = vlog2.f32 %v378_v59  ;;  %v382_v3 = vadd.f32 1.0, %v381_v60  ;;  %vm385_vm4 = vcmp.lt.f32.partialorder %v384_v4, 0.0004427343 }
  0xc3   : > { %v377_v10 = vsel %vm376_vm2, %v374_v7, %v371_v1  ;;  %v392_v21 = vmul.f32 %v604_v54, %v391_v11 }
  0xc4   : > { %v383_v13 = vmul.f32 %v606_v57, %v382_v3  ;;  %v405_v18 = vsel %vm353_vm3, %v701_v32, %v377_v10 }
  0xc5   : > { %v610_v0 = vpop.eup %609 }
  0xc6   : > { %v396_v5 = vadd.f32 1.0, %v610_v0  ;;  %v612_v6 = vpop.eup %611  ;;  %v399_v8 = vmul.f32 -0.5, %v610_v0  ;;  %v402_v20 = vand.u32 2147483647, %v610_v0 }
  0xc7   : > { %v389_v15 = vmul.f32 0.6931472, %v612_v6 }
  0xc8   : > { %v614_v9 = vpop.eup %613  ;;  %615 = vlog2.f32 %v396_v5  ;;  %v400_v17 = vadd.f32 1.0, %v399_v8  ;;  %vm403_vm7 = vcmp.lt.f32.partialorder %v402_v20, 0.0004427343 }
  0xc9   : > { %v380_v12 = vmul.f32 0.6931472, %v614_v9  ;;  %v395_v24 = vsel %vm394_vm6, %v392_v21, %v389_v15 }
  0xca   : > { %v401_v26 = vmul.f32 %v610_v0, %v400_v17  ;;  %v407_v28 = vsel %vm355_vm8, %v704_v39, %v395_v24 }
  0xcb   : > { %v386_v16 = vsel %vm385_vm4, %v383_v13, %v380_v12 }
  0xcc   : > { %v406_v19 = vsel %vm354_vm5, %v346_v43, %v386_v16 }
  0xcd   : > { %v571_v22 = vpack.c.bf16 %v406_v19, %v405_v18 }
  0xce   : > { %v616_v23 = vpop.eup %615 }
  0xcf   : > { %572 = vst [vmem:[%s175_s25] sm:$0xff] %v571_v22   ;;  %v398_v25 = vmul.f32 0.6931472, %v616_v23 }
  0xd1   : > { %v404_v27 = vsel %vm403_vm7, %v401_v26, %v398_v25 }
  0xd2   : > { %v408_v29 = vsel %vm356_vm9, %v351_v52, %v404_v27 }
  0xd3   : > { %v576_v30 = vpack.c.bf16 %v408_v29, %v407_v28 }
  0xd5   : > { %578 = vst [vmem:[%s175_s25 + $0x8] sm:$0xff] %v576_v30  }
  0xd6 PF: > { %s13_s12 = sadd.s32 1, %s623_s12  }
  0xd7   : > { %p10_p4 = scmp.ge.s32.totalorder %s13_s12, 4  }
  0xd9   :  { %12 = sbr.rel (!%p10_p4) target bundleno = 1 (0x1), region = 62 }

// kernel: nu_forward.5
= control target key start
LH: loop header
LB: loop body
LE: loop exit
PB: predicated region body
PF: predicated region fallthrough
CT: control target
= control target key end

     0   :  { %vm977_vm0 = vcmask 523264   ;;  %s2453_s1 = inlined_call_operand.vmem [shape: bf16[1600,128], index: 1, kind: input, shape index: {}]   ;;  %s2454_s0 = inlined_call_operand.vmem [shape: bf16[32,1600], index: 0, kind: input, shape index: {}]   ;;  %s2455_s2 = inlined_call_operand.vmem [shape: f32[1,128], index: 2, kind: input, shape index: {}]   ;;  %s2456_s3 = inlined_call_operand.vmem [shape: bf16[32,128], index: 3, kind: output, shape index: {}]  }
   0x1   :  { %v1838_v0 = vld [vmem:[%s2453_s1 + $0x38] sm:$0xff]  ;;  %v1837_v4 = vld [vmem:[%s2453_s1 + $0x30] sm:$0xff]  ;;  %v1836_v8 = vld [vmem:[%s2453_s1 + $0x28] sm:$0xff] }
   0x2   :  { %v1846_v1 = vld [vmem:[%s2453_s1 + $0x78] sm:$0xff]  ;;  %984 = vmatpush.bf16.msra.mxu0 %v1838_v0  ;;  %v1845_v5 = vld [vmem:[%s2453_s1 + $0x70] sm:$0xff]  ;;  %v1844_v9 = vld [vmem:[%s2453_s1 + $0x68] sm:$0xff] }
   0x3   :  { %v1854_v2 = vld [vmem:[%s2453_s1 + $0xb8] sm:$0xff]  ;;  %1003 = vmatpush.bf16.msra.mxu1 %v1846_v1  ;;  %v1853_v6 = vld [vmem:[%s2453_s1 + $0xb0] sm:$0xff]  ;;  %v1852_v10 = vld [vmem:[%s2453_s1 + $0xa8] sm:$0xff] }
   0x4   :  { %v1862_v3 = vld [vmem:[%s2453_s1 + $0xf8] sm:$0xff]  ;;  %1022 = vmatpush.bf16.msra.mxu2 %v1854_v2  ;;  %v1861_v7 = vld [vmem:[%s2453_s1 + $0xf0] sm:$0xff]  ;;  %v1860_v11 = vld [vmem:[%s2453_s1 + $0xe8] sm:$0xff] }
   0x5   :  { %1041 = vmatpush.bf16.msra.mxu3 %v1862_v3  ;;  %v1835_v12 = vld [vmem:[%s2453_s1 + $0x20] sm:$0xff]  ;;  %v1834_v16 = vld [vmem:[%s2453_s1 + $0x18] sm:$0xff]  ;;  %v1833_v20 = vld [vmem:[%s2453_s1 + $0x10] sm:$0xff] }
   0x6   :  { %985 = vmatpush.bf16.msra.mxu0 %v1837_v4  ;;  %v1843_v13 = vld [vmem:[%s2453_s1 + $0x60] sm:$0xff]  ;;  %v1842_v17 = vld [vmem:[%s2453_s1 + $0x58] sm:$0xff]  ;;  %v1841_v21 = vld [vmem:[%s2453_s1 + $0x50] sm:$0xff] }
   0x7   :  { %1004 = vmatpush.bf16.msra.mxu1 %v1845_v5  ;;  %v1851_v14 = vld [vmem:[%s2453_s1 + $0xa0] sm:$0xff]  ;;  %v1850_v18 = vld [vmem:[%s2453_s1 + $0x98] sm:$0xff]  ;;  %v1849_v22 = vld [vmem:[%s2453_s1 + $0x90] sm:$0xff] }
   0x8   :  { %1023 = vmatpush.bf16.msra.mxu2 %v1853_v6  ;;  %v1859_v15 = vld [vmem:[%s2453_s1 + $0xe0] sm:$0xff]  ;;  %v1858_v19 = vld [vmem:[%s2453_s1 + $0xd8] sm:$0xff]  ;;  %v1857_v23 = vld [vmem:[%s2453_s1 + $0xd0] sm:$0xff] }
   0x9   :  { %1042 = vmatpush.bf16.msra.mxu3 %v1861_v7  ;;  %v1832_v24 = vld [vmem:[%s2453_s1 + $0x8] sm:$0xff]  ;;  %v1831_v28 = vld [vmem:[%s2453_s1] sm:$0xff]  ;;  %v1811_v33 = vld [vmem:[%s2454_s0 + $0x30] sm:$0xf0] }
   0xa   :  { %986 = vmatpush.bf16.msra.mxu0 %v1836_v8  ;;  %v1840_v25 = vld [vmem:[%s2453_s1 + $0x48] sm:$0xff]  ;;  %v1839_v29 = vld [vmem:[%s2453_s1 + $0x40] sm:$0xff]  ;;  %v1303_v35 = vld [vmem:[%s2454_s0 + $0x34] sm:$0xf0] }
   0xb   :  { %1005 = vmatpush.bf16.msra.mxu1 %v1844_v9  ;;  %v1848_v26 = vld [vmem:[%s2453_s1 + $0x88] sm:$0xff]  ;;  %v1847_v30 = vld [vmem:[%s2453_s1 + $0x80] sm:$0xff]  ;;  %v1812_v37 = vld [vmem:[%s2454_s0 + $0x38] sm:$0xf0] }
   0xc   :  { %1024 = vmatpush.bf16.msra.mxu2 %v1852_v10  ;;  %v1856_v27 = vld [vmem:[%s2453_s1 + $0xc8] sm:$0xff]  ;;  %v1855_v31 = vld [vmem:[%s2453_s1 + $0xc0] sm:$0xff]  ;;  %v1870_v40 = vld [vmem:[%s2453_s1 + $0x138] sm:$0xff] }
   0xd   :  { %1043 = vmatpush.bf16.msra.mxu3 %v1860_v11  ;;  %v1301_v32 = vld [vmem:[%s2454_s0] sm:$0xf]  ;;  %v1805_v34 = vld [vmem:[%s2454_s0 + $0x4] sm:$0xf]  ;;  %v1309_v36 = vld [vmem:[%s2454_s0 + $0x8] sm:$0xf] }
   0xe   :  { %987 = vmatpush.bf16.msra.mxu0 %v1835_v12  ;;  %v1806_v38 = vld [vmem:[%s2454_s0 + $0xc] sm:$0xf]  ;;  %v1311_v39 = vld [vmem:[%s2454_s0 + $0x3c] sm:$0xf0]  ;;  %v1878_v41 = vld [vmem:[%s2453_s1 + $0x178] sm:$0xff]  ;;  %v1302_v42 = vor.u32 %v1811_v33, %v1301_v32  ;;  %v1306_v43 = vor.u32 %v1805_v34, %v1303_v35  ;;  %v1310_v44 = vor.u32 %v1812_v37, %v1309_v36 }
   0xf   :  { %1006 = vmatpush.bf16.msra.mxu1 %v1843_v13  ;;  %v1314_v45 = vor.u32 %v1806_v38, %v1311_v39  ;;  %v1886_v46 = vld [vmem:[%s2453_s1 + $0x1b8] sm:$0xff]  ;;  %v1869_v48 = vld [vmem:[%s2453_s1 + $0x130] sm:$0xff]  ;;  %v1868_v52 = vld [vmem:[%s2453_s1 + $0x128] sm:$0xff] }
  0x10   :  { %1025 = vmatpush.bf16.msra.mxu2 %v1851_v14  ;;  %v1894_v47 = vld [vmem:[%s2453_s1 + $0x1f8] sm:$0xff]  ;;  %v1877_v49 = vld [vmem:[%s2453_s1 + $0x170] sm:$0xff]  ;;  %v1876_v53 = vld [vmem:[%s2453_s1 + $0x168] sm:$0xff] }
  0x11   :  { %1044 = vmatpush.bf16.msra.mxu3 %v1859_v15  ;;  %v1885_v50 = vld [vmem:[%s2453_s1 + $0x1b0] sm:$0xff]  ;;  %v1884_v54 = vld [vmem:[%s2453_s1 + $0x1a8] sm:$0xff]  ;;  %v1867_v56 = vld [vmem:[%s2453_s1 + $0x120] sm:$0xff] }
  0x12   :  { %988 = vmatpush.bf16.msra.mxu0 %v1834_v16  ;;  %v1893_v51 = vld [vmem:[%s2453_s1 + $0x1f0] sm:$0xff]  ;;  %v1892_v55 = vld [vmem:[%s2453_s1 + $0x1e8] sm:$0xff]  ;;  %v1875_v57 = vld [vmem:[%s2453_s1 + $0x160] sm:$0xff] }
  0x13   :  { %1007 = vmatpush.bf16.msra.mxu1 %v1842_v17  ;;  %v1883_v58 = vld [vmem:[%s2453_s1 + $0x1a0] sm:$0xff]  ;;  %v1353_v60 = vld [vmem:[%s2454_s0 + $0x68] sm:$0xf]  ;;  %v1824_v61 = vld [vmem:[%s2454_s0 + $0x98] sm:$0xf0] }
  0x14   :  { %1026 = vmatpush.bf16.msra.mxu2 %v1850_v18  ;;  %v1891_v59 = vld [vmem:[%s2453_s1 + $0x1e0] sm:$0xff]  ;;  %v1818_v62 = vld [vmem:[%s2454_s0 + $0x6c] sm:$0xf]  ;;  %v1361_v0 = vld [vmem:[%s2454_s0 + $0x70] sm:$0xf]  ;;  %v1354_v6 = vor.u32 %v1824_v61, %v1353_v60 }
  0x15   :  { %1045 = vmatpush.bf16.msra.mxu3 %v1858_v19  ;;  %v1355_v63 = vld [vmem:[%s2454_s0 + $0x9c] sm:$0xf0]  ;;  %v1825_v1 = vld [vmem:[%s2454_s0 + $0xa0] sm:$0xf0]  ;;  %v1819_v2 = vld [vmem:[%s2454_s0 + $0x74] sm:$0xf] }
  0x16   :  { %989 = vmatpush.bf16.msra.mxu0 %v1833_v20  ;;  %v1363_v3 = vld [vmem:[%s2454_s0 + $0xa4] sm:$0xf0]  ;;  %v1866_v4 = vld [vmem:[%s2453_s1 + $0x118] sm:$0xff]  ;;  %v1358_v7 = vor.u32 %v1818_v62, %v1355_v63  ;;  %v1362_v8 = vor.u32 %v1825_v1, %v1361_v0  ;;  %v1865_v12 = vld [vmem:[%s2453_s1 + $0x110] sm:$0xff] }
  0x17   :  { %1008 = vmatpush.bf16.msra.mxu1 %v1841_v21  ;;  %v1874_v5 = vld [vmem:[%s2453_s1 + $0x158] sm:$0xff]  ;;  %v1366_v9 = vor.u32 %v1819_v2, %v1363_v3  ;;  %v1873_v13 = vld [vmem:[%s2453_s1 + $0x150] sm:$0xff]  ;;  %v1864_v16 = vld [vmem:[%s2453_s1 + $0x108] sm:$0xff] }
  0x18   :  { %1027 = vmatpush.bf16.msra.mxu2 %v1849_v22  ;;  %v1882_v10 = vld [vmem:[%s2453_s1 + $0x198] sm:$0xff]  ;;  %v1881_v14 = vld [vmem:[%s2453_s1 + $0x190] sm:$0xff]  ;;  %v1872_v17 = vld [vmem:[%s2453_s1 + $0x148] sm:$0xff] }
  0x19   :  { %1046 = vmatpush.bf16.msra.mxu3 %v1857_v23  ;;  %v1890_v11 = vld [vmem:[%s2453_s1 + $0x1d8] sm:$0xff]  ;;  %v1889_v15 = vld [vmem:[%s2453_s1 + $0x1d0] sm:$0xff]  ;;  %v1880_v18 = vld [vmem:[%s2453_s1 + $0x188] sm:$0xff] }
  0x1a   :  { %990 = vmatpush.bf16.msra.mxu0 %v1832_v24  ;;  %v1888_v19 = vld [vmem:[%s2453_s1 + $0x1c8] sm:$0xff]  ;;  %v1863_v20 = vld [vmem:[%s2453_s1 + $0x100] sm:$0xff]  ;;  %v1317_v22 = vld [vmem:[%s2454_s0 + $0x10] sm:$0xf] }
  0x1b   :  { %1009 = vmatpush.bf16.msra.mxu1 %v1840_v25  ;;  %v1871_v21 = vld [vmem:[%s2453_s1 + $0x140] sm:$0xff]  ;;  %v1808_v32 = vld [vmem:[%s2454_s0 + $0x1c] sm:$0xf]  ;;  %v1327_v33 = vld [vmem:[%s2454_s0 + $0x4c] sm:$0xf0] }
  0x1c   :  { %1028 = vmatpush.bf16.msra.mxu2 %v1848_v26  ;;  %v1879_v23 = vld [vmem:[%s2453_s1 + $0x180] sm:$0xff]  ;;  %v1902_v26 = vld [vmem:[%s2453_s1 + $0x238] sm:$0xff]  ;;  %v1330_v39 = vor.u32 %v1808_v32, %v1327_v33  ;;  %v1385_v32 = vld [vmem:[%s2454_s0 + $0x88] sm:$0xf] }
  0x1d   :  { %1047 = vmatpush.bf16.msra.mxu3 %v1856_v27  ;;  %v1887_v24 = vld [vmem:[%s2453_s1 + $0x1c0] sm:$0xff]  ;;  %v1910_v27 = vld [vmem:[%s2453_s1 + $0x278] sm:$0xff] }
  0x1e   :  { %991 = vmatpush.bf16.msra.mxu0 %v1831_v28  ;;  %v1813_v25 = vld [vmem:[%s2454_s0 + $0x40] sm:$0xf0]  ;;  %v1807_v28 = vld [vmem:[%s2454_s0 + $0x14] sm:$0xf]  ;;  %v1918_v34 = vld [vmem:[%s2453_s1 + $0x2b8] sm:$0xff] }
  0x1f   :  { %1010 = vmatpush.bf16.msra.mxu1 %v1839_v29  ;;  %v1319_v29 = vld [vmem:[%s2454_s0 + $0x44] sm:$0xf0]  ;;  %v1926_v35 = vld [vmem:[%s2453_s1 + $0x2f8] sm:$0xff]  ;;  %v1318_v36 = vor.u32 %v1813_v25, %v1317_v22 }
  0x20   :  { %1029 = vmatpush.bf16.msra.mxu2 %v1847_v30  ;;  %v1325_v30 = vld [vmem:[%s2454_s0 + $0x18] sm:$0xf]  ;;  %v1322_v37 = vor.u32 %v1807_v28, %v1319_v29  ;;  %v1816_v22 = vld [vmem:[%s2454_s0 + $0x58] sm:$0xf0]  ;;  %v1929_v29 = vld [vmem:[%s2453_s1 + $0x310] sm:$0xff] }
  0x21   :  { %1048 = vmatpush.bf16.msra.mxu3 %v1855_v31  ;;  %992 = vmatmul.bf16.vlgmr.msra.gmra.mxu0 %v1302_v42  ;;  %v1814_v31 = vld [vmem:[%s2454_s0 + $0x48] sm:$0xf0]  ;;  %v1917_v42 = vld [vmem:[%s2453_s1 + $0x2b0] sm:$0xff]  ;;  %v1898_v60 = vld [vmem:[%s2453_s1 + $0x218] sm:$0xff] }
  0x22   :  { %1060 = vmatpush.bf16.msrb.mxu0 %v1870_v40  ;;  %1011 = vmatmul.bf16.vlgmr.msra.gmra.mxu1 %v1306_v43  ;;  %v1326_v38 = vor.u32 %v1814_v31, %v1325_v30  ;;  %v1901_v40 = vld [vmem:[%s2453_s1 + $0x230] sm:$0xff]  ;;  %v1906_v61 = vld [vmem:[%s2453_s1 + $0x258] sm:$0xff]  ;;  %v1928_v30 = vld [vmem:[%s2453_s1 + $0x308] sm:$0xff] }
  0x23   :  { %1079 = vmatpush.bf16.msrb.mxu1 %v1878_v41  ;;  %1030 = vmatmul.bf16.vlgmr.msra.gmra.mxu2 %v1310_v44  ;;  %v1909_v41 = vld [vmem:[%s2453_s1 + $0x270] sm:$0xff]  ;;  %v1900_v44 = vld [vmem:[%s2453_s1 + $0x228] sm:$0xff]  ;;  %v1914_v62 = vld [vmem:[%s2453_s1 + $0x298] sm:$0xff] }
  0x24   :  { %1049 = vmatmul.bf16.vlgmr.msra.gmra.mxu3 %v1314_v45  ;;  %1098 = vmatpush.bf16.msrb.mxu2 %v1886_v46  ;;  %v1925_v43 = vld [vmem:[%s2453_s1 + $0x2f0] sm:$0xff]  ;;  %v1908_v45 = vld [vmem:[%s2453_s1 + $0x268] sm:$0xff]  ;;  %v1922_v63 = vld [vmem:[%s2453_s1 + $0x2d8] sm:$0xff] }
  0x25   :  { %1117 = vmatpush.bf16.msrb.mxu3 %v1894_v47  ;;  %v1916_v46 = vld [vmem:[%s2453_s1 + $0x2a8] sm:$0xff]  ;;  %v1927_v31 = vld [vmem:[%s2453_s1 + $0x300] sm:$0xff]  ;;  %v1828_v33 = vld [vmem:[%s2454_s0 + $0xb8] sm:$0xf0] }
  0x26   :  { %1061 = vmatpush.bf16.msrb.mxu0 %v1869_v48  ;;  %v1924_v47 = vld [vmem:[%s2453_s1 + $0x2e8] sm:$0xff]  ;;  %v1899_v48 = vld [vmem:[%s2453_s1 + $0x220] sm:$0xff] }
  0x27   :  { %1080 = vmatpush.bf16.msrb.mxu1 %v1877_v49  ;;  %v1907_v49 = vld [vmem:[%s2453_s1 + $0x260] sm:$0xff] }
  0x28   :  { %1099 = vmatpush.bf16.msrb.mxu2 %v1885_v50  ;;  %v1915_v50 = vld [vmem:[%s2453_s1 + $0x2a0] sm:$0xff] }
  0x29   :  { %1118 = vmatpush.bf16.msrb.mxu3 %v1893_v51  ;;  %v1923_v51 = vld [vmem:[%s2453_s1 + $0x2e0] sm:$0xff] }
  0x2a   :  { %1062 = vmatpush.bf16.msrb.mxu0 %v1868_v52  ;;  %v1369_v52 = vld [vmem:[%s2454_s0 + $0x78] sm:$0xf] }
  0x2b   :  { %1081 = vmatpush.bf16.msrb.mxu1 %v1876_v53  ;;  %v1826_v53 = vld [vmem:[%s2454_s0 + $0xa8] sm:$0xf0] }
  0x2c   :  { %1100 = vmatpush.bf16.msrb.mxu2 %v1884_v54  ;;  %v1820_v54 = vld [vmem:[%s2454_s0 + $0x7c] sm:$0xf]  ;;  %v1370_v0 = vor.u32 %v1826_v53, %v1369_v52 }
  0x2d   :  { %1119 = vmatpush.bf16.msrb.mxu3 %v1892_v55  ;;  %v1371_v55 = vld [vmem:[%s2454_s0 + $0xac] sm:$0xf0] }
  0x2e   :  { %1063 = vmatpush.bf16.msrb.mxu0 %v1867_v56  ;;  %v1377_v56 = vld [vmem:[%s2454_s0 + $0x80] sm:$0xf]  ;;  %v1374_v1 = vor.u32 %v1820_v54, %v1371_v55 }
  0x2f   :  { %1082 = vmatpush.bf16.msrb.mxu1 %v1875_v57  ;;  %v1827_v57 = vld [vmem:[%s2454_s0 + $0xb0] sm:$0xf0] }
  0x30   :  { %1101 = vmatpush.bf16.msrb.mxu2 %v1883_v58  ;;  %v1821_v58 = vld [vmem:[%s2454_s0 + $0x84] sm:$0xf]  ;;  %v1378_v2 = vor.u32 %v1827_v57, %v1377_v56 }
  0x31   :  { %1120 = vmatpush.bf16.msrb.mxu3 %v1891_v59  ;;  %997 = vmatmul.bf16.gmra.mxu0 %v1354_v6  ;;  %v1379_v59 = vld [vmem:[%s2454_s0 + $0xb4] sm:$0xf0]  ;;  %v1913_v6 = vld [vmem:[%s2453_s1 + $0x290] sm:$0xff] }
  0x32   :  { %1064 = vmatpush.bf16.msrb.mxu0 %v1866_v4  ;;  %1016 = vmatmul.bf16.gmra.mxu1 %v1358_v7  ;;  %v1382_v3 = vor.u32 %v1821_v58, %v1379_v59  ;;  %v1897_v4 = vld [vmem:[%s2453_s1 + $0x210] sm:$0xff] }
  0x33   :  { %1083 = vmatpush.bf16.msrb.mxu1 %v1874_v5  ;;  %1035 = vmatmul.bf16.gmra.mxu2 %v1362_v8  ;;  %v1905_v5 = vld [vmem:[%s2453_s1 + $0x250] sm:$0xff]  ;;  %v1896_v8 = vld [vmem:[%s2453_s1 + $0x208] sm:$0xff] }
  0x34   :  { %1054 = vmatmul.bf16.gmra.mxu3 %v1366_v9  ;;  %1102 = vmatpush.bf16.msrb.mxu2 %v1882_v10  ;;  %v1921_v7 = vld [vmem:[%s2453_s1 + $0x2d0] sm:$0xff]  ;;  %v1904_v9 = vld [vmem:[%s2453_s1 + $0x248] sm:$0xff] }
  0x35   :  { %1121 = vmatpush.bf16.msrb.mxu3 %v1890_v11  ;;  %v1912_v10 = vld [vmem:[%s2453_s1 + $0x288] sm:$0xff] }
  0x36   :  { %1065 = vmatpush.bf16.msrb.mxu0 %v1865_v12  ;;  %v1920_v11 = vld [vmem:[%s2453_s1 + $0x2c8] sm:$0xff]  ;;  %v1895_v12 = vld [vmem:[%s2453_s1 + $0x200] sm:$0xff] }
  0x37   :  { %1084 = vmatpush.bf16.msrb.mxu1 %v1873_v13  ;;  %v1903_v13 = vld [vmem:[%s2453_s1 + $0x240] sm:$0xff] }
  0x38   :  { %1103 = vmatpush.bf16.msrb.mxu2 %v1881_v14  ;;  %v1911_v14 = vld [vmem:[%s2453_s1 + $0x280] sm:$0xff] }
  0x39   :  { %1122 = vmatpush.bf16.msrb.mxu3 %v1889_v15  ;;  %v1919_v15 = vld [vmem:[%s2453_s1 + $0x2c0] sm:$0xff] }
  0x3a   :  { %1066 = vmatpush.bf16.msrb.mxu0 %v1864_v16  ;;  %v1333_v16 = vld [vmem:[%s2454_s0 + $0x20] sm:$0xf] }
  0x3b   :  { %1085 = vmatpush.bf16.msrb.mxu1 %v1872_v17  ;;  %v1815_v17 = vld [vmem:[%s2454_s0 + $0x50] sm:$0xf0] }
  0x3c   :  { %1104 = vmatpush.bf16.msrb.mxu2 %v1880_v18  ;;  %v1930_v18 = vld [vmem:[%s2453_s1 + $0x318] sm:$0xff]  ;;  %v1334_v25 = vor.u32 %v1815_v17, %v1333_v16 }
  0x3d   :  { %1123 = vmatpush.bf16.msrb.mxu3 %v1888_v19  ;;  %v1809_v19 = vld [vmem:[%s2454_s0 + $0x24] sm:$0xf] }
  0x3e   :  { %1067 = vmatpush.bf16.msrb.mxu0 %v1863_v20  ;;  %v1335_v20 = vld [vmem:[%s2454_s0 + $0x54] sm:$0xf0] }
  0x3f   :  { %1086 = vmatpush.bf16.msrb.mxu1 %v1871_v21  ;;  %v1341_v21 = vld [vmem:[%s2454_s0 + $0x28] sm:$0xf] }
  0x40   :  { %1105 = vmatpush.bf16.msrb.mxu2 %v1879_v23  ;;  %v1810_v23 = vld [vmem:[%s2454_s0 + $0x2c] sm:$0xf] }
  0x41   :  { %1124 = vmatpush.bf16.msrb.mxu3 %v1887_v24  ;;  %1068 = vmatmul.bf16.vlgmr.msrb.gmra.mxu0 %v1318_v36  ;;  %v1343_v24 = vld [vmem:[%s2454_s0 + $0x5c] sm:$0xf0]  ;;  %v1393_v36 = vld [vmem:[%s2454_s0 + $0x90] sm:$0xf] }
  0x42   :  { %1136 = vmatpush.bf16.msra.mxu0 %v1902_v26  ;;  %1087 = vmatmul.bf16.vlgmr.msrb.gmra.mxu1 %v1322_v37  ;;  %v1338_v26 = vor.u32 %v1809_v19, %v1335_v20  ;;  %v1346_v28 = vor.u32 %v1810_v23, %v1343_v24  ;;  %v1829_v37 = vld [vmem:[%s2454_s0 + $0xc0] sm:$0xf0] }
  0x43   :  { %1155 = vmatpush.bf16.msra.mxu1 %v1910_v27  ;;  %1106 = vmatmul.bf16.vlgmr.msrb.gmra.mxu2 %v1326_v38  ;;  %v1342_v27 = vor.u32 %v1816_v22, %v1341_v21  ;;  %v1823_v38 = vld [vmem:[%s2454_s0 + $0x94] sm:$0xf] }
  0x44   :  { %1174 = vmatpush.bf16.msra.mxu2 %v1918_v34  ;;  %1125 = vmatmul.bf16.vlgmr.msrb.gmra.mxu3 %v1330_v39  ;;  %v1822_v34 = vld [vmem:[%s2454_s0 + $0x8c] sm:$0xf]  ;;  %v1395_v39 = vld [vmem:[%s2454_s0 + $0xc4] sm:$0xf0] }
  0x45   :  { %1193 = vmatpush.bf16.msra.mxu3 %v1926_v35  ;;  %v1387_v35 = vld [vmem:[%s2454_s0 + $0xbc] sm:$0xf0] }
  0x46   :  { %1137 = vmatpush.bf16.msra.mxu0 %v1901_v40  ;;  %v1386_v40 = vor.u32 %v1828_v33, %v1385_v32 }
  0x47   :  { %1156 = vmatpush.bf16.msra.mxu1 %v1909_v41  ;;  %v1390_v41 = vor.u32 %v1822_v34, %v1387_v35 }
  0x48   :  { %1175 = vmatpush.bf16.msra.mxu2 %v1917_v42  ;;  %v1394_v42 = vor.u32 %v1829_v37, %v1393_v36 }
  0x49   :  { %1194 = vmatpush.bf16.msra.mxu3 %v1925_v43  ;;  %v1398_v43 = vor.u32 %v1823_v38, %v1395_v39 }
  0x4a   :  { %1138 = vmatpush.bf16.msra.mxu0 %v1900_v44  ;;  %v1349_v44 = vld [vmem:[%s2454_s0 + $0x30] sm:$0xf] }
  0x4b   :  { %1157 = vmatpush.bf16.msra.mxu1 %v1908_v45  ;;  %v1817_v45 = vld [vmem:[%s2454_s0 + $0x60] sm:$0xf0] }
  0x4c   :  { %1176 = vmatpush.bf16.msra.mxu2 %v1916_v46  ;;  %v1401_v46 = vld [vmem:[%s2454_s0 + $0x98] sm:$0xf] }
  0x4d   :  { %1195 = vmatpush.bf16.msra.mxu3 %v1924_v47  ;;  %v1830_v47 = vld [vmem:[%s2454_s0 + $0xc8] sm:$0xf0] }
  0x4e   :  { %1139 = vmatpush.bf16.msra.mxu0 %v1899_v48  ;;  %v1350_v48 = vor.u32 %v1817_v45, %v1349_v44 }
  0x4f   :  { %1158 = vmatpush.bf16.msra.mxu1 %v1907_v49  ;;  %v1402_v49 = vor.u32 %v1830_v47, %v1401_v46 }
  0x50   :  { %1177 = vmatpush.bf16.msra.mxu2 %v1915_v50  ;;  %v1946_v50 = vld [vmem:[%s2455_s2] ss:$0 sm:$0xff] }
  0x51   :  { %1196 = vmatpush.bf16.msra.mxu3 %v1923_v51  ;;  %1073 = vmatmul.bf16.gmra.mxu0 %v1370_v0 }
  0x52   :  { %1140 = vmatpush.bf16.msra.mxu0 %v1898_v60  ;;  %1092 = vmatmul.bf16.gmra.mxu1 %v1374_v1 }
  0x53   :  { %1159 = vmatpush.bf16.msra.mxu1 %v1906_v61  ;;  %1111 = vmatmul.bf16.gmra.mxu2 %v1378_v2 }
  0x54   :  { %1178 = vmatpush.bf16.msra.mxu2 %v1914_v62  ;;  %1130 = vmatmul.bf16.gmra.mxu3 %v1382_v3 }
  0x55   :  { %1197 = vmatpush.bf16.msra.mxu3 %v1922_v63 }
  0x56   :  { %1141 = vmatpush.bf16.msra.mxu0 %v1897_v4 }
  0x57   :  { %1160 = vmatpush.bf16.msra.mxu1 %v1905_v5 }
  0x58   :  { %1179 = vmatpush.bf16.msra.mxu2 %v1913_v6 }
  0x59   :  { %1198 = vmatpush.bf16.msra.mxu3 %v1921_v7 }
  0x5a   :  { %1142 = vmatpush.bf16.msra.mxu0 %v1896_v8 }
  0x5b   :  { %1161 = vmatpush.bf16.msra.mxu1 %v1904_v9 }
  0x5c   :  { %1180 = vmatpush.bf16.msra.mxu2 %v1912_v10 }
  0x5d   :  { %1199 = vmatpush.bf16.msra.mxu3 %v1920_v11 }
  0x5e   :  { %1143 = vmatpush.bf16.msra.mxu0 %v1895_v12 }
  0x5f   :  { %1162 = vmatpush.bf16.msra.mxu1 %v1903_v13 }
  0x60   :  { %1181 = vmatpush.bf16.msra.mxu2 %v1911_v14 }
  0x61   :  { %1200 = vmatpush.bf16.msra.mxu3 %v1919_v15  ;;  %1144 = vmatmul.bf16.vlgmr.msra.gmra.mxu0 %v1334_v25 }
  0x62   :  { %1216 = vmatpush.bf16.msrb.mxu0 %v1930_v18  ;;  %1163 = vmatmul.bf16.vlgmr.msra.gmra.mxu1 %v1338_v26 }
  0x63   :  { %1942 = vmatpush.bf16.msrb.mxu1 %v1930_v18  ;;  %1182 = vmatmul.bf16.vlgmr.msra.gmra.mxu2 %v1342_v27 }
  0x64   :  { %1201 = vmatmul.bf16.vlgmr.msra.gmra.mxu3 %v1346_v28 }
  0x66   :  { %1217 = vmatpush.bf16.msrb.mxu0 %v1929_v29 }
  0x67   :  { %1943 = vmatpush.bf16.msrb.mxu1 %v1929_v29 }
  0x6a   :  { %1218 = vmatpush.bf16.msrb.mxu0 %v1928_v30 }
  0x6b   :  { %1944 = vmatpush.bf16.msrb.mxu1 %v1928_v30 }
  0x6e   :  { %1219 = vmatpush.bf16.msrb.mxu0 %v1927_v31 }
  0x6f   :  { %1945 = vmatpush.bf16.msrb.mxu1 %v1927_v31 }
  0x71   :  { %1149 = vmatmul.bf16.gmra.mxu0 %v1386_v40 }
  0x72   :  { %1168 = vmatmul.bf16.gmra.mxu1 %v1390_v41 }
  0x73   :  { %1187 = vmatmul.bf16.gmra.mxu2 %v1394_v42 }
  0x74   :  { %1206 = vmatmul.bf16.gmra.mxu3 %v1398_v43 }
  0x81   :  { %1803 = vmatmul.msk.bf16.vlgmr.msrb.gmra.mxu0 %vm977_vm0, %v1350_v48 }
  0x82   :  { %1804 = vmatmul.msk.bf16.vlgmr.msrb.gmra.mxu1 %vm977_vm0, %v1402_v49 }
  0x9e   :  { %v993_v51 = vpop.f32.mrf.mxu0 }
  0x9f   :  { %v1012_v52 = vpop.f32.mrf.mxu1  ;;  %v994_v53 = vadd.f32 %v1946_v50, %v993_v51 }
  0xa1   :  { %v1013_v54 = vadd.f32 %v1012_v52, %v994_v53 }
  0xa6   :  { %v1031_v55 = vpop.f32.mrf.mxu2  ;;  %v995_v58 = vpop.f32.mrf.mxu0 }
  0xa7   :  { %v1050_v56 = vpop.f32.mrf.mxu3  ;;  %v1032_v57 = vadd.f32 %v1031_v55, %v1013_v54  ;;  %v1014_v59 = vpop.f32.mrf.mxu1  ;;  %v996_v60 = vadd.f32 %v1946_v50, %v995_v58 }
  0xa9   :  { %v1051_v61 = vadd.f32 %v1050_v56, %v1032_v57  ;;  %v1015_v62 = vadd.f32 %v1014_v59, %v996_v60 }
  0xae   :  { %v1033_v63 = vpop.f32.mrf.mxu2  ;;  %v998_v1 = vpop.f32.mrf.mxu0 }
  0xaf   :  { %v1052_v0 = vpop.f32.mrf.mxu3  ;;  %v1017_v2 = vpop.f32.mrf.mxu1  ;;  %v999_v3 = vadd.f32 %v1946_v50, %v998_v1  ;;  %v1034_v39 = vadd.f32 %v1033_v63, %v1015_v62 }
  0xb1   :  { %v1018_v4 = vadd.f32 %v1017_v2, %v999_v3  ;;  %v1053_v43 = vadd.f32 %v1052_v0, %v1034_v39 }
  0xb6   :  { %v1036_v5 = vpop.f32.mrf.mxu2  ;;  %v1000_v7 = vpop.f32.mrf.mxu0 }
  0xb7   :  { %v1055_v6 = vpop.f32.mrf.mxu3  ;;  %v1019_v8 = vpop.f32.mrf.mxu1  ;;  %v1037_v29 = vadd.f32 %v1036_v5, %v1018_v4  ;;  %v1001_v30 = vadd.f32 %v1946_v50, %v1000_v7 }
  0xb9   :  { %v1056_v31 = vadd.f32 %v1055_v6, %v1037_v29  ;;  %v1020_v36 = vadd.f32 %v1019_v8, %v1001_v30 }
  0xbe   :  { %v1038_v9 = vpop.f32.mrf.mxu2  ;;  %v1069_v11 = vpop.f32.mrf.mxu0 }
  0xbf   :  { %v1057_v10 = vpop.f32.mrf.mxu3  ;;  %v1088_v12 = vpop.f32.mrf.mxu1  ;;  %v1070_v37 = vadd.f32 %v1069_v11, %v1051_v61  ;;  %v1039_v40 = vadd.f32 %v1038_v9, %v1020_v36 }
  0xc1   :  { %v1089_v41 = vadd.f32 %v1088_v12, %v1070_v37  ;;  %v1058_v44 = vadd.f32 %v1057_v10, %v1039_v40 }
  0xc6   :  { %v1107_v13 = vpop.f32.mrf.mxu2  ;;  %v1071_v15 = vpop.f32.mrf.mxu0 }
  0xc7   :  { %v1126_v14 = vpop.f32.mrf.mxu3  ;;  %v1090_v16 = vpop.f32.mrf.mxu1  ;;  %v1108_v45 = vadd.f32 %v1107_v13, %v1089_v41  ;;  %v1072_v50 = vadd.f32 %v1071_v15, %v1053_v43 }
  0xc9   :  { %v1127_v53 = vadd.f32 %v1126_v14, %v1108_v45  ;;  %v1091_v55 = vadd.f32 %v1090_v16, %v1072_v50 }
  0xce   :  { %v1109_v17 = vpop.f32.mrf.mxu2  ;;  %v1074_v19 = vpop.f32.mrf.mxu0 }
  0xcf   :  { %v1128_v18 = vpop.f32.mrf.mxu3  ;;  %v1093_v20 = vpop.f32.mrf.mxu1  ;;  %v1075_v38 = vadd.f32 %v1074_v19, %v1056_v31  ;;  %v1110_v59 = vadd.f32 %v1109_v17, %v1091_v55 }
  0xd1   :  { %v1094_v42 = vadd.f32 %v1093_v20, %v1075_v38  ;;  %v1129_v2 = vadd.f32 %v1128_v18, %v1110_v59 }
  0xd6   :  { %v1112_v21 = vpop.f32.mrf.mxu2  ;;  %v1076_v23 = vpop.f32.mrf.mxu0 }
  0xd7   :  { %v1131_v22 = vpop.f32.mrf.mxu3  ;;  %v1095_v24 = vpop.f32.mrf.mxu1  ;;  %v1113_v46 = vadd.f32 %v1112_v21, %v1094_v42  ;;  %v1077_v51 = vadd.f32 %v1076_v23, %v1058_v44 }
  0xd9   :  { %v1132_v54 = vadd.f32 %v1131_v22, %v1113_v46  ;;  %v1096_v56 = vadd.f32 %v1095_v24, %v1077_v51 }
  0xde   :  { %v1114_v25 = vpop.f32.mrf.mxu2  ;;  %v1145_v27 = vpop.f32.mrf.mxu0 }
  0xdf   :  { %v1133_v26 = vpop.f32.mrf.mxu3  ;;  %v1164_v28 = vpop.f32.mrf.mxu1  ;;  %v1146_v57 = vadd.f32 %v1145_v27, %v1127_v53  ;;  %v1115_v60 = vadd.f32 %v1114_v25, %v1096_v56 }
  0xe1   :  { %v1165_v0 = vadd.f32 %v1164_v28, %v1146_v57  ;;  %v1134_v3 = vadd.f32 %v1133_v26, %v1115_v60 }
  0xe6   :  { %v1183_v32 = vpop.f32.mrf.mxu2  ;;  %v1147_v34 = vpop.f32.mrf.mxu0 }
  0xe7   :  { %v1202_v33 = vpop.f32.mrf.mxu3  ;;  %v1166_v35 = vpop.f32.mrf.mxu1  ;;  %v1184_v4 = vadd.f32 %v1183_v32, %v1165_v0  ;;  %v1148_v7 = vadd.f32 %v1147_v34, %v1129_v2 }
  0xe9   :  { %v1203_v9 = vadd.f32 %v1202_v33, %v1184_v4  ;;  %v1167_v14 = vadd.f32 %v1166_v35, %v1148_v7 }
  0xee   :  { %v1185_v47 = vpop.f32.mrf.mxu2  ;;  %v1150_v48 = vpop.f32.mrf.mxu0 }
  0xef   :  { %v1169_v49 = vpop.f32.mrf.mxu1  ;;  %v1204_v52 = vpop.f32.mrf.mxu3  ;;  %v1151_v58 = vadd.f32 %v1150_v48, %v1132_v54  ;;  %v1186_v19 = vadd.f32 %v1185_v47, %v1167_v14 }
  0xf1   :  { %v1170_v1 = vadd.f32 %v1169_v49, %v1151_v58  ;;  %v1205_v25 = vadd.f32 %v1204_v52, %v1186_v19 }
  0xf6   :  { %v1188_v61 = vpop.f32.mrf.mxu2  ;;  %v1152_v62 = vpop.f32.mrf.mxu0 }
  0xf7   :  { %v1171_v63 = vpop.f32.mrf.mxu1  ;;  %v1189_v5 = vadd.f32 %v1188_v61, %v1170_v1  ;;  %v1207_v6 = vpop.f32.mrf.mxu3  ;;  %v1153_v8 = vadd.f32 %v1152_v62, %v1134_v3 }
  0xf9   :  { %v1208_v10 = vadd.f32 %v1207_v6, %v1189_v5  ;;  %v1172_v15 = vadd.f32 %v1171_v63, %v1153_v8 }
  0xfe   :  { %v1190_v11 = vpop.f32.mrf.mxu2  ;;  %v1221_v12 = vpop.f32.mrf.mxu0 }
  0xff   :  { %v1226_v13 = vpop.f32.mrf.mxu1  ;;  %v1222_v16 = vadd.f32 %v1221_v12, %v1203_v9  ;;  %v1191_v20 = vadd.f32 %v1190_v11, %v1172_v15  ;;  %v1209_v24 = vpop.f32.mrf.mxu3 }
 0x100   :  { %v2442_v17 = vadd.f32 %v1226_v13, %v1208_v10 }
 0x101   :  { %v1235_v21 = vmin.f32 %v1222_v16, 20.0  ;;  %v1210_v26 = vadd.f32 %v1209_v24, %v1191_v20  ;;  %vm1231_vm2 = vcmp.gt.f32.partialorder %v1222_v16, 20.0 }
 0x102   :  { %v1237_v18 = vmin.f32 %v2442_v17, 20.0  ;;  %vm1233_vm7 = vcmp.gt.f32.partialorder %v2442_v17, 20.0 }
 0x103   :  { %v1239_v22 = vmul.f32 1.442695, %v1235_v21 }
 0x104   :  { %v1243_v23 = vmul.f32 1.442695, %v1237_v18 }
 0x105   :  { %1947 = vpow2.f32 %v1239_v22 }
 0x106   :  { %1949 = vpow2.f32 %v1243_v23  ;;  %v1223_v27 = vpop.f32.mrf.mxu0 }
 0x107   :  { %v1228_v28 = vpop.f32.mrf.mxu1  ;;  %v1224_v29 = vadd.f32 %v1223_v27, %v1205_v25 }
 0x108   :  { %v1229_v30 = vadd.f32 %v1228_v28, %v1210_v26 }
 0x109   :  { %v1236_v31 = vmin.f32 %v1224_v29, 20.0  ;;  %vm1232_vm5 = vcmp.gt.f32.partialorder %v1224_v29, 20.0 }
 0x10a   :  { %v1238_v32 = vmin.f32 %v1229_v30, 20.0  ;;  %vm1234_vm8 = vcmp.gt.f32.partialorder %v1229_v30, 20.0 }
 0x10b   :  { %v1948_v33 = vpop.eup %1947  ;;  %v1241_v34 = vmul.f32 1.442695, %v1236_v31 }
 0x10c   :  { %v1950_v35 = vpop.eup %1949  ;;  %v1247_v36 = vadd.f32 1.0, %v1948_v33  ;;  %v1245_v37 = vmul.f32 1.442695, %v1238_v32  ;;  %v1250_v39 = vmul.f32 -0.5, %v1948_v33  ;;  %v1253_v47 = vand.u32 2147483647, %v1948_v33 }
 0x10d   :  { %1951 = vpow2.f32 %v1241_v34  ;;  %v1265_v38 = vadd.f32 1.0, %v1950_v35  ;;  %v1268_v46 = vmul.f32 -0.5, %v1950_v35  ;;  %v1271_v56 = vand.u32 2147483647, %v1950_v35 }
 0x10e   :  { %1953 = vlog2.f32 %v1247_v36  ;;  %v1251_v45 = vadd.f32 1.0, %v1250_v39  ;;  %vm1254_vm1 = vcmp.lt.f32.partialorder %v1253_v47, 0.0004427343 }
 0x10f   :  { %1955 = vpow2.f32 %v1245_v37  ;;  %v1269_v54 = vadd.f32 1.0, %v1268_v46  ;;  %vm1272_vm4 = vcmp.lt.f32.partialorder %v1271_v56, 0.0004427343 }
 0x110   :  { %1957 = vlog2.f32 %v1265_v38  ;;  %v1252_v53 = vmul.f32 %v1948_v33, %v1251_v45 }
 0x111   :  { %v1270_v0 = vmul.f32 %v1950_v35, %v1269_v54 }
 0x113   :  { %v1952_v40 = vpop.eup %1951 }
 0x114   :  { %v1256_v41 = vadd.f32 1.0, %v1952_v40  ;;  %v1954_v42 = vpop.eup %1953  ;;  %v1259_v43 = vmul.f32 -0.5, %v1952_v40  ;;  %v1262_v55 = vand.u32 2147483647, %v1952_v40 }
 0x115   :  { %v1956_v44 = vpop.eup %1955  ;;  %v1249_v49 = vmul.f32 0.6931472, %v1954_v42 }
 0x116   :  { %1959 = vlog2.f32 %v1256_v41  ;;  %v1274_v48 = vadd.f32 1.0, %v1956_v44  ;;  %v1277_v50 = vmul.f32 -0.5, %v1956_v44  ;;  %v1958_v51 = vpop.eup %1957  ;;  %v1260_v52 = vadd.f32 1.0, %v1259_v43 }
 0x117   :  { %v1255_v58 = vsel %vm1254_vm1, %v1252_v53, %v1249_v49  ;;  %v1267_v59 = vmul.f32 0.6931472, %v1958_v51  ;;  %v1280_v63 = vand.u32 2147483647, %v1956_v44  ;;  %vm1263_vm3 = vcmp.lt.f32.partialorder %v1262_v55, 0.0004427343 }
 0x118   :  { %1961 = vlog2.f32 %v1274_v48  ;;  %v1278_v60 = vadd.f32 1.0, %v1277_v50  ;;  %v1261_v62 = vmul.f32 %v1952_v40, %v1260_v52  ;;  %v1283_v2 = vsel %vm1231_vm2, %v1222_v16, %v1255_v58 }
 0x119   :  { %v1273_v4 = vsel %vm1272_vm4, %v1270_v0, %v1267_v59  ;;  %vm1281_vm6 = vcmp.lt.f32.partialorder %v1280_v63, 0.0004427343 }
 0x11a   :  { %v1279_v7 = vmul.f32 %v1956_v44, %v1278_v60  ;;  %v1285_v10 = vsel %vm1233_vm7, %v2442_v17, %v1273_v4 }
 0x11c   :  { %v1960_v57 = vpop.eup %1959 }
 0x11d   :  { %v1258_v61 = vmul.f32 0.6931472, %v1960_v57 }
 0x11e   :  { %v1962_v1 = vpop.eup %1961 }
 0x11f   :  { %v1264_v3 = vsel %vm1263_vm3, %v1261_v62, %v1258_v61  ;;  %v1276_v6 = vmul.f32 0.6931472, %v1962_v1 }
 0x120   :  { %v1284_v5 = vsel %vm1232_vm5, %v1224_v29, %v1264_v3 }
 0x121   :  { %v1934_v8 = vpack.c.bf16 %v1284_v5, %v1283_v2  ;;  %v1282_v9 = vsel %vm1281_vm6, %v1279_v7, %v1276_v6 }
 0x122   :  { %v1286_v11 = vsel %vm1234_vm8, %v1229_v30, %v1282_v9 }
 0x123   :  { %1935 = vst [vmem:[%s2456_s3] sm:$0xff] %v1934_v8   ;;  %v1939_v12 = vpack.c.bf16 %v1286_v11, %v1285_v10 }
 0x125   :  { %1941 = vst [vmem:[%s2456_s3 + $0x8] sm:$0xff] %v1939_v12  }

// kernel: nu_forward.6
= control target key start
LH: loop header
LB: loop body
LE: loop exit
PB: predicated region body
PF: predicated region fallthrough
CT: control target
= control target key end

     0   :  { %s3734_s1 = inlined_call_operand.vmem [shape: bf16[3200,128], index: 1, kind: input, shape index: {}]   ;;  %s3735_s0 = inlined_call_operand.vmem [shape: bf16[8,3200], index: 0, kind: input, shape index: {}]   ;;  %s3736_s2 = inlined_call_operand.vmem [shape: f32[1,128], index: 2, kind: input, shape index: {}]   ;;  %s3737_s3 = inlined_call_operand.vmem [shape: bf16[8,128], index: 3, kind: output, shape index: {}]  }
   0x1   :  { %v2871_v0 = vld [vmem:[%s3734_s1 + $0x38] sm:$0xff]  ;;  %v2870_v4 = vld [vmem:[%s3734_s1 + $0x30] sm:$0xff]  ;;  %v2869_v8 = vld [vmem:[%s3734_s1 + $0x28] sm:$0xff] }
   0x2   :  { %v2887_v1 = vld [vmem:[%s3734_s1 + $0xb8] sm:$0xff]  ;;  %1719 = vmatpush.bf16.msra.mxu0 %v2871_v0  ;;  %v2886_v5 = vld [vmem:[%s3734_s1 + $0xb0] sm:$0xff]  ;;  %v2885_v9 = vld [vmem:[%s3734_s1 + $0xa8] sm:$0xff] }
   0x3   :  { %v2879_v2 = vld [vmem:[%s3734_s1 + $0x78] sm:$0xff]  ;;  %1745 = vmatpush.bf16.msra.mxu2 %v2887_v1  ;;  %v2878_v6 = vld [vmem:[%s3734_s1 + $0x70] sm:$0xff]  ;;  %v2877_v10 = vld [vmem:[%s3734_s1 + $0x68] sm:$0xff] }
   0x4   :  { %v2895_v3 = vld [vmem:[%s3734_s1 + $0xf8] sm:$0xff]  ;;  %1732 = vmatpush.bf16.msra.mxu1 %v2879_v2  ;;  %v2894_v7 = vld [vmem:[%s3734_s1 + $0xf0] sm:$0xff]  ;;  %v2893_v11 = vld [vmem:[%s3734_s1 + $0xe8] sm:$0xff] }
   0x5   :  { %1758 = vmatpush.bf16.msra.mxu3 %v2895_v3  ;;  %v2868_v12 = vld [vmem:[%s3734_s1 + $0x20] sm:$0xff]  ;;  %v2867_v16 = vld [vmem:[%s3734_s1 + $0x18] sm:$0xff]  ;;  %v2866_v20 = vld [vmem:[%s3734_s1 + $0x10] sm:$0xff] }
   0x6   :  { %1720 = vmatpush.bf16.msra.mxu0 %v2870_v4  ;;  %v2884_v13 = vld [vmem:[%s3734_s1 + $0xa0] sm:$0xff]  ;;  %v2883_v17 = vld [vmem:[%s3734_s1 + $0x98] sm:$0xff]  ;;  %v2882_v21 = vld [vmem:[%s3734_s1 + $0x90] sm:$0xff] }
   0x7   :  { %1746 = vmatpush.bf16.msra.mxu2 %v2886_v5  ;;  %v2876_v14 = vld [vmem:[%s3734_s1 + $0x60] sm:$0xff]  ;;  %v2875_v18 = vld [vmem:[%s3734_s1 + $0x58] sm:$0xff]  ;;  %v2874_v22 = vld [vmem:[%s3734_s1 + $0x50] sm:$0xff] }
   0x8   :  { %1733 = vmatpush.bf16.msra.mxu1 %v2878_v6  ;;  %v2892_v15 = vld [vmem:[%s3734_s1 + $0xe0] sm:$0xff]  ;;  %v2891_v19 = vld [vmem:[%s3734_s1 + $0xd8] sm:$0xff]  ;;  %v2890_v23 = vld [vmem:[%s3734_s1 + $0xd0] sm:$0xff] }
   0x9   :  { %1759 = vmatpush.bf16.msra.mxu3 %v2894_v7  ;;  %v2865_v24 = vld [vmem:[%s3734_s1 + $0x8] sm:$0xff]  ;;  %v14_v29 = vld [vmem:[%s3735_s0] sm:$0xff]  ;;  %v2903_v34 = vld [vmem:[%s3734_s1 + $0x138] sm:$0xff] }
   0xa   :  { %1721 = vmatpush.bf16.msra.mxu0 %v2869_v8  ;;  %v2881_v25 = vld [vmem:[%s3734_s1 + $0x88] sm:$0xff]  ;;  %v2864_v30 = vld [vmem:[%s3734_s1] sm:$0xff]  ;;  %v444_v33 = vunpack.c.l.b16 %v14_v29  ;;  %v2919_v35 = vld [vmem:[%s3734_s1 + $0x1b8] sm:$0xff]  ;;  %v445_v39 = vunpack.c.h.b16 %v14_v29 }
   0xb   :  { %1747 = vmatpush.bf16.msra.mxu2 %v2885_v9  ;;  %v2873_v26 = vld [vmem:[%s3734_s1 + $0x48] sm:$0xff]  ;;  %v2880_v31 = vld [vmem:[%s3734_s1 + $0x80] sm:$0xff]  ;;  %v2911_v40 = vld [vmem:[%s3734_s1 + $0x178] sm:$0xff] }
   0xc   :  { %1734 = vmatpush.bf16.msra.mxu1 %v2877_v10  ;;  %v2889_v27 = vld [vmem:[%s3734_s1 + $0xc8] sm:$0xff]  ;;  %v2872_v36 = vld [vmem:[%s3734_s1 + $0x40] sm:$0xff]  ;;  %v2927_v41 = vld [vmem:[%s3734_s1 + $0x1f8] sm:$0xff]  ;;  %v469_v43 = vpack.c.b16 %v444_v33, %v444_v33  ;;  %v470_v47 = vpack.c.b16 %v445_v39, %v445_v39 }
   0xd   :  { %1760 = vmatpush.bf16.msra.mxu3 %v2893_v11  ;;  %v15_v28 = vld [vmem:[%s3735_s0 + $0x8] sm:$0xff]  ;;  %v2888_v37 = vld [vmem:[%s3734_s1 + $0xc0] sm:$0xff]  ;;  %v2902_v44 = vld [vmem:[%s3734_s1 + $0x130] sm:$0xff] }
   0xe   :  { %1722 = vmatpush.bf16.msra.mxu0 %v2868_v12  ;;  %v446_v32 = vunpack.c.l.b16 %v15_v28  ;;  %v447_v38 = vunpack.c.h.b16 %v15_v28  ;;  %v2918_v45 = vld [vmem:[%s3734_s1 + $0x1b0] sm:$0xff]  ;;  %v2901_v50 = vld [vmem:[%s3734_s1 + $0x128] sm:$0xff]  ;;  %v2900_v54 = vld [vmem:[%s3734_s1 + $0x120] sm:$0xff] }
   0xf   :  { %1748 = vmatpush.bf16.msra.mxu2 %v2884_v13  ;;  %v2910_v48 = vld [vmem:[%s3734_s1 + $0x170] sm:$0xff]  ;;  %v2917_v51 = vld [vmem:[%s3734_s1 + $0x1a8] sm:$0xff]  ;;  %v2916_v55 = vld [vmem:[%s3734_s1 + $0x1a0] sm:$0xff] }
  0x10   :  { %1735 = vmatpush.bf16.msra.mxu1 %v2876_v14  ;;  %v471_v42 = vpack.c.b16 %v446_v32, %v446_v32  ;;  %v472_v46 = vpack.c.b16 %v447_v38, %v447_v38  ;;  %v2926_v49 = vld [vmem:[%s3734_s1 + $0x1f0] sm:$0xff]  ;;  %v2909_v52 = vld [vmem:[%s3734_s1 + $0x168] sm:$0xff]  ;;  %v2908_v56 = vld [vmem:[%s3734_s1 + $0x160] sm:$0xff] }
  0x11   :  { %1761 = vmatpush.bf16.msra.mxu3 %v2892_v15  ;;  %v2925_v53 = vld [vmem:[%s3734_s1 + $0x1e8] sm:$0xff]  ;;  %v2924_v57 = vld [vmem:[%s3734_s1 + $0x1e0] sm:$0xff]  ;;  %v2899_v58 = vld [vmem:[%s3734_s1 + $0x118] sm:$0xff] }
  0x12   :  { %1723 = vmatpush.bf16.msra.mxu0 %v2867_v16  ;;  %v2915_v59 = vld [vmem:[%s3734_s1 + $0x198] sm:$0xff]  ;;  %v2898_v62 = vld [vmem:[%s3734_s1 + $0x110] sm:$0xff]  ;;  %v2897_v2 = vld [vmem:[%s3734_s1 + $0x108] sm:$0xff] }
  0x13   :  { %1749 = vmatpush.bf16.msra.mxu2 %v2883_v17  ;;  %v2907_v60 = vld [vmem:[%s3734_s1 + $0x158] sm:$0xff]  ;;  %v2914_v63 = vld [vmem:[%s3734_s1 + $0x190] sm:$0xff]  ;;  %v2913_v3 = vld [vmem:[%s3734_s1 + $0x188] sm:$0xff] }
  0x14   :  { %1736 = vmatpush.bf16.msra.mxu1 %v2875_v18  ;;  %v2923_v61 = vld [vmem:[%s3734_s1 + $0x1d8] sm:$0xff]  ;;  %v2906_v0 = vld [vmem:[%s3734_s1 + $0x150] sm:$0xff]  ;;  %v2905_v6 = vld [vmem:[%s3734_s1 + $0x148] sm:$0xff] }
  0x15   :  { %1762 = vmatpush.bf16.msra.mxu3 %v2891_v19  ;;  %v2922_v1 = vld [vmem:[%s3734_s1 + $0x1d0] sm:$0xff]  ;;  %v17_v4 = vld [vmem:[%s3735_s0 + $0x18] sm:$0xff]  ;;  %v2921_v7 = vld [vmem:[%s3734_s1 + $0x1c8] sm:$0xff] }
  0x16   :  { %1724 = vmatpush.bf16.msra.mxu0 %v2866_v20  ;;  %v16_v5 = vld [vmem:[%s3735_s0 + $0x10] sm:$0xff]  ;;  %v2896_v8 = vld [vmem:[%s3734_s1 + $0x100] sm:$0xff]  ;;  %v450_v10 = vunpack.c.l.b16 %v17_v4  ;;  %v2935_v12 = vld [vmem:[%s3734_s1 + $0x238] sm:$0xff]  ;;  %v451_v16 = vunpack.c.h.b16 %v17_v4 }
  0x17   :  { %1750 = vmatpush.bf16.msra.mxu2 %v2882_v21  ;;  %v2912_v9 = vld [vmem:[%s3734_s1 + $0x180] sm:$0xff]  ;;  %v448_v11 = vunpack.c.l.b16 %v16_v5  ;;  %v2951_v13 = vld [vmem:[%s3734_s1 + $0x2b8] sm:$0xff]  ;;  %v449_v17 = vunpack.c.h.b16 %v16_v5  ;;  %v2933_v28 = vld [vmem:[%s3734_s1 + $0x228] sm:$0xff] }
  0x18   :  { %1737 = vmatpush.bf16.msra.mxu1 %v2874_v22  ;;  %v2904_v14 = vld [vmem:[%s3734_s1 + $0x140] sm:$0xff]  ;;  %v2943_v18 = vld [vmem:[%s3734_s1 + $0x278] sm:$0xff]  ;;  %v475_v20 = vpack.c.b16 %v450_v10, %v450_v10  ;;  %v2934_v22 = vld [vmem:[%s3734_s1 + $0x230] sm:$0xff] }
  0x19   :  { %1763 = vmatpush.bf16.msra.mxu3 %v2890_v23  ;;  %v2920_v15 = vld [vmem:[%s3734_s1 + $0x1c0] sm:$0xff]  ;;  %v2959_v19 = vld [vmem:[%s3734_s1 + $0x2f8] sm:$0xff]  ;;  %v473_v21 = vpack.c.b16 %v448_v11, %v448_v11  ;;  %v2950_v23 = vld [vmem:[%s3734_s1 + $0x2b0] sm:$0xff] }
  0x1a   :  { %1725 = vmatpush.bf16.msra.mxu0 %v2865_v24  ;;  %v476_v24 = vpack.c.b16 %v451_v16, %v451_v16  ;;  %v2949_v29 = vld [vmem:[%s3734_s1 + $0x2a8] sm:$0xff]  ;;  %v2932_v32 = vld [vmem:[%s3734_s1 + $0x220] sm:$0xff]  ;;  %v2939_v38 = vld [vmem:[%s3734_s1 + $0x258] sm:$0xff] }
  0x1b   :  { %1751 = vmatpush.bf16.msra.mxu2 %v2881_v25  ;;  %v474_v25 = vpack.c.b16 %v449_v17, %v449_v17  ;;  %v2948_v33 = vld [vmem:[%s3734_s1 + $0x2a0] sm:$0xff]  ;;  %v2955_v39 = vld [vmem:[%s3734_s1 + $0x2d8] sm:$0xff]  ;;  %v2974_v4 = vld [vmem:[%s3734_s1 + $0x370] sm:$0xff] }
  0x1c   :  { %1738 = vmatpush.bf16.msra.mxu1 %v2873_v26  ;;  %v2942_v26 = vld [vmem:[%s3734_s1 + $0x270] sm:$0xff]  ;;  %v2964_v10 = vld [vmem:[%s3734_s1 + $0x320] sm:$0xff]  ;;  %v2971_v16 = vld [vmem:[%s3734_s1 + $0x358] sm:$0xff] }
  0x1d   :  { %1764 = vmatpush.bf16.msra.mxu3 %v2889_v27  ;;  %v2958_v27 = vld [vmem:[%s3734_s1 + $0x2f0] sm:$0xff]  ;;  %v2980_v11 = vld [vmem:[%s3734_s1 + $0x3a0] sm:$0xff]  ;;  %v2987_v17 = vld [vmem:[%s3734_s1 + $0x3d8] sm:$0xff] }
  0x1e   :  { %1726 = vmatpush.bf16.msra.mxu0 %v2864_v30  ;;  %v2941_v30 = vld [vmem:[%s3734_s1 + $0x268] sm:$0xff]  ;;  %v2990_v5 = vld [vmem:[%s3734_s1 + $0x3f0] sm:$0xff] }
  0x1f   :  { %1752 = vmatpush.bf16.msra.mxu2 %v2880_v31  ;;  %v2957_v31 = vld [vmem:[%s3734_s1 + $0x2e8] sm:$0xff] }
  0x20   :  { %1739 = vmatpush.bf16.msra.mxu1 %v2872_v36  ;;  %v2931_v36 = vld [vmem:[%s3734_s1 + $0x218] sm:$0xff] }
  0x21   :  { %1765 = vmatpush.bf16.msra.mxu3 %v2888_v37  ;;  %1727 = vmatmul.bf16.vlgmr.msra.gmra.mxu0 %v469_v43  ;;  %v2947_v37 = vld [vmem:[%s3734_s1 + $0x298] sm:$0xff]  ;;  %v2954_v43 = vld [vmem:[%s3734_s1 + $0x2d0] sm:$0xff] }
  0x22   :  { %1771 = vmatpush.bf16.msrb.mxu0 %v2903_v34  ;;  %1753 = vmatmul.bf16.vlgmr.msra.gmra.mxu2 %v471_v42  ;;  %v2940_v34 = vld [vmem:[%s3734_s1 + $0x260] sm:$0xff]  ;;  %v2938_v42 = vld [vmem:[%s3734_s1 + $0x250] sm:$0xff] }
  0x23   :  { %1797 = vmatpush.bf16.msrb.mxu2 %v2919_v35  ;;  %1740 = vmatmul.bf16.vlgmr.msra.gmra.mxu1 %v470_v47  ;;  %v2956_v35 = vld [vmem:[%s3734_s1 + $0x2e0] sm:$0xff]  ;;  %v19_v47 = vld [vmem:[%s3735_s0 + $0x28] sm:$0xff] }
  0x24   :  { %1784 = vmatpush.bf16.msrb.mxu1 %v2911_v40  ;;  %1766 = vmatmul.bf16.vlgmr.msra.gmra.mxu3 %v472_v46  ;;  %v2930_v40 = vld [vmem:[%s3734_s1 + $0x210] sm:$0xff]  ;;  %v18_v46 = vld [vmem:[%s3735_s0 + $0x20] sm:$0xff] }
  0x25   :  { %1810 = vmatpush.bf16.msrb.mxu3 %v2927_v41  ;;  %v2946_v41 = vld [vmem:[%s3734_s1 + $0x290] sm:$0xff] }
  0x26   :  { %1772 = vmatpush.bf16.msrb.mxu0 %v2902_v44  ;;  %v2929_v44 = vld [vmem:[%s3734_s1 + $0x208] sm:$0xff] }
  0x27   :  { %1798 = vmatpush.bf16.msrb.mxu2 %v2918_v45  ;;  %v2945_v45 = vld [vmem:[%s3734_s1 + $0x288] sm:$0xff] }
  0x28   :  { %1785 = vmatpush.bf16.msrb.mxu1 %v2910_v48  ;;  %v2937_v48 = vld [vmem:[%s3734_s1 + $0x248] sm:$0xff] }
  0x29   :  { %1811 = vmatpush.bf16.msrb.mxu3 %v2926_v49  ;;  %v2953_v49 = vld [vmem:[%s3734_s1 + $0x2c8] sm:$0xff] }
  0x2a   :  { %1773 = vmatpush.bf16.msrb.mxu0 %v2901_v50  ;;  %v452_v50 = vunpack.c.l.b16 %v18_v46 }
  0x2b   :  { %1799 = vmatpush.bf16.msrb.mxu2 %v2917_v51  ;;  %v454_v51 = vunpack.c.l.b16 %v19_v47 }
  0x2c   :  { %1786 = vmatpush.bf16.msrb.mxu1 %v2909_v52  ;;  %v2928_v52 = vld [vmem:[%s3734_s1 + $0x200] sm:$0xff] }
  0x2d   :  { %1812 = vmatpush.bf16.msrb.mxu3 %v2925_v53  ;;  %v2944_v53 = vld [vmem:[%s3734_s1 + $0x280] sm:$0xff] }
  0x2e   :  { %1774 = vmatpush.bf16.msrb.mxu0 %v2900_v54  ;;  %v2967_v54 = vld [vmem:[%s3734_s1 + $0x338] sm:$0xff] }
  0x2f   :  { %1800 = vmatpush.bf16.msrb.mxu2 %v2916_v55  ;;  %v2983_v55 = vld [vmem:[%s3734_s1 + $0x3b8] sm:$0xff] }
  0x30   :  { %1787 = vmatpush.bf16.msrb.mxu1 %v2908_v56  ;;  %v453_v56 = vunpack.c.h.b16 %v18_v46  ;;  %v3006_v46 = vld [vmem:[%s3734_s1 + $0x470] sm:$0xff] }
  0x31   :  { %1813 = vmatpush.bf16.msrb.mxu3 %v2924_v57  ;;  %v455_v57 = vunpack.c.h.b16 %v19_v47  ;;  %v3022_v47 = vld [vmem:[%s3734_s1 + $0x4f0] sm:$0xff] }
  0x32   :  { %1775 = vmatpush.bf16.msrb.mxu0 %v2899_v58  ;;  %v2936_v58 = vld [vmem:[%s3734_s1 + $0x240] sm:$0xff] }
  0x33   :  { %1801 = vmatpush.bf16.msrb.mxu2 %v2915_v59  ;;  %v2952_v59 = vld [vmem:[%s3734_s1 + $0x2c0] sm:$0xff] }
  0x34   :  { %1788 = vmatpush.bf16.msrb.mxu1 %v2907_v60  ;;  %v477_v60 = vpack.c.b16 %v452_v50, %v452_v50  ;;  %v3005_v50 = vld [vmem:[%s3734_s1 + $0x468] sm:$0xff] }
  0x35   :  { %1814 = vmatpush.bf16.msrb.mxu3 %v2923_v61  ;;  %v479_v61 = vpack.c.b16 %v454_v51, %v454_v51  ;;  %v3021_v51 = vld [vmem:[%s3734_s1 + $0x4e8] sm:$0xff] }
  0x36   :  { %1776 = vmatpush.bf16.msrb.mxu0 %v2898_v62  ;;  %v2975_v62 = vld [vmem:[%s3734_s1 + $0x378] sm:$0xff] }
  0x37   :  { %1802 = vmatpush.bf16.msrb.mxu2 %v2914_v63  ;;  %v2991_v63 = vld [vmem:[%s3734_s1 + $0x3f8] sm:$0xff] }
  0x38   :  { %1789 = vmatpush.bf16.msrb.mxu1 %v2906_v0  ;;  %v478_v0 = vpack.c.b16 %v453_v56, %v453_v56  ;;  %v2995_v56 = vld [vmem:[%s3734_s1 + $0x418] sm:$0xff] }
  0x39   :  { %1815 = vmatpush.bf16.msrb.mxu3 %v2922_v1  ;;  %v480_v1 = vpack.c.b16 %v455_v57, %v455_v57  ;;  %v3011_v57 = vld [vmem:[%s3734_s1 + $0x498] sm:$0xff] }
  0x3a   :  { %1777 = vmatpush.bf16.msrb.mxu0 %v2897_v2  ;;  %v2966_v2 = vld [vmem:[%s3734_s1 + $0x330] sm:$0xff] }
  0x3b   :  { %1803 = vmatpush.bf16.msrb.mxu2 %v2913_v3  ;;  %v2982_v3 = vld [vmem:[%s3734_s1 + $0x3b0] sm:$0xff] }
  0x3c   :  { %1790 = vmatpush.bf16.msrb.mxu1 %v2905_v6  ;;  %v2965_v6 = vld [vmem:[%s3734_s1 + $0x328] sm:$0xff] }
  0x3d   :  { %1816 = vmatpush.bf16.msrb.mxu3 %v2921_v7  ;;  %v2981_v7 = vld [vmem:[%s3734_s1 + $0x3a8] sm:$0xff] }
  0x3e   :  { %1778 = vmatpush.bf16.msrb.mxu0 %v2896_v8  ;;  %v2973_v8 = vld [vmem:[%s3734_s1 + $0x368] sm:$0xff] }
  0x3f   :  { %1804 = vmatpush.bf16.msrb.mxu2 %v2912_v9  ;;  %v2989_v9 = vld [vmem:[%s3734_s1 + $0x3e8] sm:$0xff] }
  0x40   :  { %1791 = vmatpush.bf16.msrb.mxu1 %v2904_v14  ;;  %v2963_v14 = vld [vmem:[%s3734_s1 + $0x318] sm:$0xff] }
  0x41   :  { %1817 = vmatpush.bf16.msrb.mxu3 %v2920_v15  ;;  %1779 = vmatmul.bf16.vlgmr.msrb.gmra.mxu0 %v473_v21  ;;  %v2979_v15 = vld [vmem:[%s3734_s1 + $0x398] sm:$0xff]  ;;  %v2986_v21 = vld [vmem:[%s3734_s1 + $0x3d0] sm:$0xff] }
  0x42   :  { %1823 = vmatpush.bf16.msra.mxu0 %v2935_v12  ;;  %1805 = vmatmul.bf16.vlgmr.msrb.gmra.mxu2 %v475_v20  ;;  %v2972_v12 = vld [vmem:[%s3734_s1 + $0x360] sm:$0xff]  ;;  %v2970_v20 = vld [vmem:[%s3734_s1 + $0x350] sm:$0xff] }
  0x43   :  { %1849 = vmatpush.bf16.msra.mxu2 %v2951_v13  ;;  %1792 = vmatmul.bf16.vlgmr.msrb.gmra.mxu1 %v474_v25  ;;  %v2988_v13 = vld [vmem:[%s3734_s1 + $0x3e0] sm:$0xff]  ;;  %v21_v25 = vld [vmem:[%s3735_s0 + $0x38] sm:$0xff] }
  0x44   :  { %1836 = vmatpush.bf16.msra.mxu1 %v2943_v18  ;;  %1818 = vmatmul.bf16.vlgmr.msrb.gmra.mxu3 %v476_v24  ;;  %v2962_v18 = vld [vmem:[%s3734_s1 + $0x310] sm:$0xff] }
  0x45   :  { %1862 = vmatpush.bf16.msra.mxu3 %v2959_v19  ;;  %v2978_v19 = vld [vmem:[%s3734_s1 + $0x390] sm:$0xff] }
  0x46   :  { %1824 = vmatpush.bf16.msra.mxu0 %v2934_v22  ;;  %v2961_v22 = vld [vmem:[%s3734_s1 + $0x308] sm:$0xff]  ;;  %v20_v24 = vld [vmem:[%s3735_s0 + $0x30] sm:$0xff] }
  0x47   :  { %1850 = vmatpush.bf16.msra.mxu2 %v2950_v23  ;;  %v2977_v23 = vld [vmem:[%s3734_s1 + $0x388] sm:$0xff] }
  0x48   :  { %1837 = vmatpush.bf16.msra.mxu1 %v2942_v26  ;;  %v2969_v26 = vld [vmem:[%s3734_s1 + $0x348] sm:$0xff] }
  0x49   :  { %1863 = vmatpush.bf16.msra.mxu3 %v2958_v27  ;;  %v2985_v27 = vld [vmem:[%s3734_s1 + $0x3c8] sm:$0xff] }
  0x4a   :  { %1825 = vmatpush.bf16.msra.mxu0 %v2933_v28  ;;  %v456_v28 = vunpack.c.l.b16 %v20_v24 }
  0x4b   :  { %1851 = vmatpush.bf16.msra.mxu2 %v2949_v29  ;;  %v458_v29 = vunpack.c.l.b16 %v21_v25 }
  0x4c   :  { %1838 = vmatpush.bf16.msra.mxu1 %v2941_v30  ;;  %v2960_v30 = vld [vmem:[%s3734_s1 + $0x300] sm:$0xff] }
  0x4d   :  { %1864 = vmatpush.bf16.msra.mxu3 %v2957_v31  ;;  %v2976_v31 = vld [vmem:[%s3734_s1 + $0x380] sm:$0xff] }
  0x4e   :  { %1826 = vmatpush.bf16.msra.mxu0 %v2932_v32  ;;  %v2999_v32 = vld [vmem:[%s3734_s1 + $0x438] sm:$0xff] }
  0x4f   :  { %1852 = vmatpush.bf16.msra.mxu2 %v2948_v33  ;;  %v3015_v33 = vld [vmem:[%s3734_s1 + $0x4b8] sm:$0xff] }
  0x50   :  { %1839 = vmatpush.bf16.msra.mxu1 %v2940_v34  ;;  %v457_v34 = vunpack.c.h.b16 %v20_v24  ;;  %v3038_v24 = vld [vmem:[%s3734_s1 + $0x570] sm:$0xff] }
  0x51   :  { %1865 = vmatpush.bf16.msra.mxu3 %v2956_v35  ;;  %v459_v35 = vunpack.c.h.b16 %v21_v25  ;;  %v3054_v25 = vld [vmem:[%s3734_s1 + $0x5f0] sm:$0xff] }
  0x52   :  { %1827 = vmatpush.bf16.msra.mxu0 %v2931_v36  ;;  %v2968_v36 = vld [vmem:[%s3734_s1 + $0x340] sm:$0xff] }
  0x53   :  { %1853 = vmatpush.bf16.msra.mxu2 %v2947_v37  ;;  %v2984_v37 = vld [vmem:[%s3734_s1 + $0x3c0] sm:$0xff] }
  0x54   :  { %1840 = vmatpush.bf16.msra.mxu1 %v2939_v38  ;;  %v481_v38 = vpack.c.b16 %v456_v28, %v456_v28  ;;  %v3037_v28 = vld [vmem:[%s3734_s1 + $0x568] sm:$0xff] }
  0x55   :  { %1866 = vmatpush.bf16.msra.mxu3 %v2955_v39  ;;  %v483_v39 = vpack.c.b16 %v458_v29, %v458_v29  ;;  %v3053_v29 = vld [vmem:[%s3734_s1 + $0x5e8] sm:$0xff] }
  0x56   :  { %1828 = vmatpush.bf16.msra.mxu0 %v2930_v40  ;;  %v3007_v40 = vld [vmem:[%s3734_s1 + $0x478] sm:$0xff] }
  0x57   :  { %1854 = vmatpush.bf16.msra.mxu2 %v2946_v41  ;;  %v3023_v41 = vld [vmem:[%s3734_s1 + $0x4f8] sm:$0xff] }
  0x58   :  { %1841 = vmatpush.bf16.msra.mxu1 %v2938_v42  ;;  %v482_v42 = vpack.c.b16 %v457_v34, %v457_v34  ;;  %v3036_v34 = vld [vmem:[%s3734_s1 + $0x560] sm:$0xff] }
  0x59   :  { %1867 = vmatpush.bf16.msra.mxu3 %v2954_v43  ;;  %v484_v43 = vpack.c.b16 %v459_v35, %v459_v35  ;;  %v3052_v35 = vld [vmem:[%s3734_s1 + $0x5e0] sm:$0xff] }
  0x5a   :  { %1829 = vmatpush.bf16.msra.mxu0 %v2929_v44  ;;  %v2998_v44 = vld [vmem:[%s3734_s1 + $0x430] sm:$0xff] }
  0x5b   :  { %1855 = vmatpush.bf16.msra.mxu2 %v2945_v45  ;;  %v3014_v45 = vld [vmem:[%s3734_s1 + $0x4b0] sm:$0xff] }
  0x5c   :  { %1842 = vmatpush.bf16.msra.mxu1 %v2937_v48  ;;  %v2997_v48 = vld [vmem:[%s3734_s1 + $0x428] sm:$0xff] }
  0x5d   :  { %1868 = vmatpush.bf16.msra.mxu3 %v2953_v49  ;;  %v3013_v49 = vld [vmem:[%s3734_s1 + $0x4a8] sm:$0xff] }
  0x5e   :  { %1830 = vmatpush.bf16.msra.mxu0 %v2928_v52  ;;  %v2996_v52 = vld [vmem:[%s3734_s1 + $0x420] sm:$0xff] }
  0x5f   :  { %1856 = vmatpush.bf16.msra.mxu2 %v2944_v53  ;;  %v3012_v53 = vld [vmem:[%s3734_s1 + $0x4a0] sm:$0xff] }
  0x60   :  { %1843 = vmatpush.bf16.msra.mxu1 %v2936_v58  ;;  %v3003_v58 = vld [vmem:[%s3734_s1 + $0x458] sm:$0xff] }
  0x61   :  { %1869 = vmatpush.bf16.msra.mxu3 %v2952_v59  ;;  %1831 = vmatmul.bf16.vlgmr.msra.gmra.mxu0 %v477_v60  ;;  %v3019_v59 = vld [vmem:[%s3734_s1 + $0x4d8] sm:$0xff]  ;;  %v2994_v60 = vld [vmem:[%s3734_s1 + $0x410] sm:$0xff] }
  0x62   :  { %1875 = vmatpush.bf16.msrb.mxu0 %v2967_v54  ;;  %1857 = vmatmul.bf16.vlgmr.msra.gmra.mxu2 %v479_v61  ;;  %v3004_v54 = vld [vmem:[%s3734_s1 + $0x460] sm:$0xff]  ;;  %v3010_v61 = vld [vmem:[%s3734_s1 + $0x490] sm:$0xff] }
  0x63   :  { %1901 = vmatpush.bf16.msrb.mxu2 %v2983_v55  ;;  %1844 = vmatmul.bf16.vlgmr.msra.gmra.mxu1 %v478_v0  ;;  %v3020_v55 = vld [vmem:[%s3734_s1 + $0x4e0] sm:$0xff]  ;;  %v2993_v0 = vld [vmem:[%s3734_s1 + $0x408] sm:$0xff] }
  0x64   :  { %1888 = vmatpush.bf16.msrb.mxu1 %v2975_v62  ;;  %1870 = vmatmul.bf16.vlgmr.msra.gmra.mxu3 %v480_v1  ;;  %v3002_v62 = vld [vmem:[%s3734_s1 + $0x450] sm:$0xff]  ;;  %v3009_v1 = vld [vmem:[%s3734_s1 + $0x488] sm:$0xff] }
  0x65   :  { %1914 = vmatpush.bf16.msrb.mxu3 %v2991_v63  ;;  %v3018_v63 = vld [vmem:[%s3734_s1 + $0x4d0] sm:$0xff] }
  0x66   :  { %1876 = vmatpush.bf16.msrb.mxu0 %v2966_v2  ;;  %v22_v2 = vld [vmem:[%s3735_s0 + $0x40] sm:$0xff] }
  0x67   :  { %1902 = vmatpush.bf16.msrb.mxu2 %v2982_v3  ;;  %v23_v3 = vld [vmem:[%s3735_s0 + $0x48] sm:$0xff] }
  0x68   :  { %1889 = vmatpush.bf16.msrb.mxu1 %v2974_v4  ;;  %v3001_v4 = vld [vmem:[%s3734_s1 + $0x448] sm:$0xff] }
  0x69   :  { %1915 = vmatpush.bf16.msrb.mxu3 %v2990_v5  ;;  %v3017_v5 = vld [vmem:[%s3734_s1 + $0x4c8] sm:$0xff] }
  0x6a   :  { %1877 = vmatpush.bf16.msrb.mxu0 %v2965_v6  ;;  %v460_v6 = vunpack.c.l.b16 %v22_v2 }
  0x6b   :  { %1903 = vmatpush.bf16.msrb.mxu2 %v2981_v7  ;;  %v462_v7 = vunpack.c.l.b16 %v23_v3 }
  0x6c   :  { %1890 = vmatpush.bf16.msrb.mxu1 %v2973_v8  ;;  %v2992_v8 = vld [vmem:[%s3734_s1 + $0x400] sm:$0xff] }
  0x6d   :  { %1916 = vmatpush.bf16.msrb.mxu3 %v2989_v9  ;;  %v3008_v9 = vld [vmem:[%s3734_s1 + $0x480] sm:$0xff] }
  0x6e   :  { %1878 = vmatpush.bf16.msrb.mxu0 %v2964_v10  ;;  %v3031_v10 = vld [vmem:[%s3734_s1 + $0x538] sm:$0xff] }
  0x6f   :  { %1904 = vmatpush.bf16.msrb.mxu2 %v2980_v11  ;;  %v3047_v11 = vld [vmem:[%s3734_s1 + $0x5b8] sm:$0xff] }
  0x70   :  { %1891 = vmatpush.bf16.msrb.mxu1 %v2972_v12  ;;  %v461_v12 = vunpack.c.h.b16 %v22_v2 }
  0x71   :  { %1917 = vmatpush.bf16.msrb.mxu3 %v2988_v13  ;;  %v463_v13 = vunpack.c.h.b16 %v23_v3 }
  0x72   :  { %1879 = vmatpush.bf16.msrb.mxu0 %v2963_v14  ;;  %v3000_v14 = vld [vmem:[%s3734_s1 + $0x440] sm:$0xff] }
  0x73   :  { %1905 = vmatpush.bf16.msrb.mxu2 %v2979_v15  ;;  %v3016_v15 = vld [vmem:[%s3734_s1 + $0x4c0] sm:$0xff] }
  0x74   :  { %1892 = vmatpush.bf16.msrb.mxu1 %v2971_v16  ;;  %v485_v16 = vpack.c.b16 %v460_v6, %v460_v6 }
  0x75   :  { %1918 = vmatpush.bf16.msrb.mxu3 %v2987_v17  ;;  %v487_v17 = vpack.c.b16 %v462_v7, %v462_v7 }
  0x76   :  { %1880 = vmatpush.bf16.msrb.mxu0 %v2962_v18  ;;  %v3039_v18 = vld [vmem:[%s3734_s1 + $0x578] sm:$0xff] }
  0x77   :  { %1906 = vmatpush.bf16.msrb.mxu2 %v2978_v19  ;;  %v3055_v19 = vld [vmem:[%s3734_s1 + $0x5f8] sm:$0xff] }
  0x78   :  { %1893 = vmatpush.bf16.msrb.mxu1 %v2970_v20  ;;  %v486_v20 = vpack.c.b16 %v461_v12, %v461_v12  ;;  %v3060_v12 = vld [vmem:[%s3734_s1 + $0x620] sm:$0xff] }
  0x79   :  { %1919 = vmatpush.bf16.msrb.mxu3 %v2986_v21  ;;  %v488_v21 = vpack.c.b16 %v463_v13, %v463_v13 }
  0x7a   :  { %1881 = vmatpush.bf16.msrb.mxu0 %v2961_v22  ;;  %v3030_v22 = vld [vmem:[%s3734_s1 + $0x530] sm:$0xff] }
  0x7b   :  { %1907 = vmatpush.bf16.msrb.mxu2 %v2977_v23  ;;  %v3046_v23 = vld [vmem:[%s3734_s1 + $0x5b0] sm:$0xff] }
  0x7c   :  { %1894 = vmatpush.bf16.msrb.mxu1 %v2969_v26  ;;  %v3029_v26 = vld [vmem:[%s3734_s1 + $0x528] sm:$0xff] }
  0x7d   :  { %1920 = vmatpush.bf16.msrb.mxu3 %v2985_v27  ;;  %v3045_v27 = vld [vmem:[%s3734_s1 + $0x5a8] sm:$0xff] }
  0x7e   :  { %1882 = vmatpush.bf16.msrb.mxu0 %v2960_v30  ;;  %v3064_v30 = vld [vmem:[%s3736_s2] ss:$0 sm:$0xff] }
  0x7f   :  { %1908 = vmatpush.bf16.msrb.mxu2 %v2976_v31  ;;  %v3028_v31 = vld [vmem:[%s3734_s1 + $0x520] sm:$0xff] }
  0x80   :  { %1895 = vmatpush.bf16.msrb.mxu1 %v2968_v36 }
  0x81   :  { %1921 = vmatpush.bf16.msrb.mxu3 %v2984_v37  ;;  %1883 = vmatmul.bf16.vlgmr.msrb.gmra.mxu0 %v481_v38  ;;  %v3027_v38 = vld [vmem:[%s3734_s1 + $0x518] sm:$0xff] }
  0x82   :  { %1927 = vmatpush.bf16.msra.mxu0 %v2999_v32  ;;  %1909 = vmatmul.bf16.vlgmr.msrb.gmra.mxu2 %v483_v39  ;;  %v3044_v32 = vld [vmem:[%s3734_s1 + $0x5a0] sm:$0xff]  ;;  %v3043_v39 = vld [vmem:[%s3734_s1 + $0x598] sm:$0xff] }
  0x83   :  { %1953 = vmatpush.bf16.msra.mxu2 %v3015_v33  ;;  %1896 = vmatmul.bf16.vlgmr.msrb.gmra.mxu1 %v482_v42  ;;  %v3051_v42 = vld [vmem:[%s3734_s1 + $0x5d8] sm:$0xff] }
  0x84   :  { %1940 = vmatpush.bf16.msra.mxu1 %v3007_v40  ;;  %1922 = vmatmul.bf16.vlgmr.msrb.gmra.mxu3 %v484_v43 }
  0x85   :  { %1966 = vmatpush.bf16.msra.mxu3 %v3023_v41  ;;  %v3035_v41 = vld [vmem:[%s3734_s1 + $0x558] sm:$0xff] }
  0x86   :  { %1928 = vmatpush.bf16.msra.mxu0 %v2998_v44  ;;  %v3026_v44 = vld [vmem:[%s3734_s1 + $0x510] sm:$0xff] }
  0x87   :  { %1954 = vmatpush.bf16.msra.mxu2 %v3014_v45  ;;  %v3042_v45 = vld [vmem:[%s3734_s1 + $0x590] sm:$0xff] }
  0x88   :  { %1941 = vmatpush.bf16.msra.mxu1 %v3006_v46 }
  0x89   :  { %1967 = vmatpush.bf16.msra.mxu3 %v3022_v47 }
  0x8a   :  { %1929 = vmatpush.bf16.msra.mxu0 %v2997_v48 }
  0x8b   :  { %1955 = vmatpush.bf16.msra.mxu2 %v3013_v49  ;;  %v3034_v49 = vld [vmem:[%s3734_s1 + $0x550] sm:$0xff] }
  0x8c   :  { %1942 = vmatpush.bf16.msra.mxu1 %v3005_v50  ;;  %v3050_v50 = vld [vmem:[%s3734_s1 + $0x5d0] sm:$0xff] }
  0x8d   :  { %1968 = vmatpush.bf16.msra.mxu3 %v3021_v51 }
  0x8e   :  { %1930 = vmatpush.bf16.msra.mxu0 %v2996_v52  ;;  %v3025_v52 = vld [vmem:[%s3734_s1 + $0x508] sm:$0xff] }
  0x8f   :  { %1956 = vmatpush.bf16.msra.mxu2 %v3012_v53 }
  0x90   :  { %1943 = vmatpush.bf16.msra.mxu1 %v3004_v54  ;;  %v3041_v54 = vld [vmem:[%s3734_s1 + $0x588] sm:$0xff] }
  0x91   :  { %1969 = vmatpush.bf16.msra.mxu3 %v3020_v55  ;;  %v24_v55 = vld [vmem:[%s3735_s0 + $0x50] sm:$0xff] }
  0x92   :  { %1931 = vmatpush.bf16.msra.mxu0 %v2995_v56  ;;  %v25_v56 = vld [vmem:[%s3735_s0 + $0x58] sm:$0xff] }
  0x93   :  { %1957 = vmatpush.bf16.msra.mxu2 %v3011_v57  ;;  %v3033_v57 = vld [vmem:[%s3734_s1 + $0x548] sm:$0xff]  ;;  %v467_v2 = vunpack.c.h.b16 %v25_v56 }
  0x94   :  { %1944 = vmatpush.bf16.msra.mxu1 %v3003_v58  ;;  %v3049_v58 = vld [vmem:[%s3734_s1 + $0x5c8] sm:$0xff] }
  0x95   :  { %1970 = vmatpush.bf16.msra.mxu3 %v3019_v59  ;;  %v464_v59 = vunpack.c.l.b16 %v24_v55 }
  0x96   :  { %1932 = vmatpush.bf16.msra.mxu0 %v2994_v60  ;;  %v466_v60 = vunpack.c.l.b16 %v25_v56 }
  0x97   :  { %1958 = vmatpush.bf16.msra.mxu2 %v3010_v61  ;;  %v489_v6 = vpack.c.b16 %v464_v59, %v464_v59 }
  0x98   :  { %1945 = vmatpush.bf16.msra.mxu1 %v3002_v62  ;;  %v3024_v62 = vld [vmem:[%s3734_s1 + $0x500] sm:$0xff]  ;;  %v491_v7 = vpack.c.b16 %v466_v60, %v466_v60 }
  0x99   :  { %1971 = vmatpush.bf16.msra.mxu3 %v3018_v63  ;;  %v3040_v63 = vld [vmem:[%s3734_s1 + $0x580] sm:$0xff] }
  0x9a   :  { %1933 = vmatpush.bf16.msra.mxu0 %v2993_v0  ;;  %v3063_v0 = vld [vmem:[%s3734_s1 + $0x638] sm:$0xff] }
  0x9b   :  { %1959 = vmatpush.bf16.msra.mxu2 %v3009_v1  ;;  %v465_v1 = vunpack.c.h.b16 %v24_v55 }
  0x9c   :  { %1946 = vmatpush.bf16.msra.mxu1 %v3001_v4  ;;  %v3032_v4 = vld [vmem:[%s3734_s1 + $0x540] sm:$0xff] }
  0x9d   :  { %1972 = vmatpush.bf16.msra.mxu3 %v3017_v5  ;;  %v3048_v5 = vld [vmem:[%s3734_s1 + $0x5c0] sm:$0xff] }
  0x9e   :  { %1934 = vmatpush.bf16.msra.mxu0 %v2992_v8  ;;  %v1728_v33 = vpop.f32.mrf.mxu0  ;;  %v490_v8 = vpack.c.b16 %v465_v1, %v465_v1 }
  0x9f   :  { %1960 = vmatpush.bf16.msra.mxu2 %v3008_v9  ;;  %v1729_v36 = vadd.f32 %v3064_v30, %v1728_v33  ;;  %v492_v9 = vpack.c.b16 %v467_v2, %v467_v2 }
  0xa0   :  { %1947 = vmatpush.bf16.msra.mxu1 %v3000_v14  ;;  %v1741_v37 = vpop.f32.mrf.mxu1 }
  0xa1   :  { %1973 = vmatpush.bf16.msra.mxu3 %v3016_v15  ;;  %1935 = vmatmul.bf16.vlgmr.msra.gmra.mxu0 %v485_v16  ;;  %v1742_v40 = vadd.f32 %v1741_v37, %v1729_v36 }
  0xa2   :  { %1979 = vmatpush.bf16.msrb.mxu0 %v3031_v10  ;;  %1961 = vmatmul.bf16.vlgmr.msra.gmra.mxu2 %v487_v17  ;;  %v3062_v10 = vld [vmem:[%s3734_s1 + $0x630] sm:$0xff]  ;;  %v3059_v17 = vld [vmem:[%s3734_s1 + $0x618] sm:$0xff] }
  0xa3   :  { %2005 = vmatpush.bf16.msrb.mxu2 %v3047_v11  ;;  %1948 = vmatmul.bf16.vlgmr.msra.gmra.mxu1 %v486_v20  ;;  %v3061_v11 = vld [vmem:[%s3734_s1 + $0x628] sm:$0xff]  ;;  %v3058_v20 = vld [vmem:[%s3734_s1 + $0x610] sm:$0xff] }
  0xa4   :  { %1992 = vmatpush.bf16.msrb.mxu1 %v3039_v18  ;;  %1974 = vmatmul.bf16.vlgmr.msra.gmra.mxu3 %v488_v21 }
  0xa5   :  { %2018 = vmatpush.bf16.msrb.mxu3 %v3055_v19  ;;  %v1754_v43 = vpop.f32.mrf.mxu2 }
  0xa6   :  { %1980 = vmatpush.bf16.msrb.mxu0 %v3030_v22  ;;  %v1755_v46 = vadd.f32 %v1754_v43, %v1742_v40  ;;  %v1730_v48 = vpop.f32.mrf.mxu0 }
  0xa7   :  { %2006 = vmatpush.bf16.msrb.mxu2 %v3046_v23  ;;  %v1767_v47 = vpop.f32.mrf.mxu3 }
  0xa8   :  { %1993 = vmatpush.bf16.msrb.mxu1 %v3038_v24  ;;  %v1768_v51 = vadd.f32 %v1767_v47, %v1755_v46  ;;  %v1743_v53 = vpop.f32.mrf.mxu1 }
  0xa9   :  { %2019 = vmatpush.bf16.msrb.mxu3 %v3054_v25  ;;  %v3057_v25 = vld [vmem:[%s3734_s1 + $0x608] sm:$0xff] }
  0xaa   :  { %1981 = vmatpush.bf16.msrb.mxu0 %v3029_v26  ;;  %v26_v26 = vld [vmem:[%s3735_s0 + $0x60] sm:$0xf] }
  0xab   :  { %2007 = vmatpush.bf16.msrb.mxu2 %v3045_v27 }
  0xac   :  { %1994 = vmatpush.bf16.msrb.mxu1 %v3037_v28  ;;  %v468_v28 = vunpack.c.l.b16 %v26_v26 }
  0xad   :  { %2020 = vmatpush.bf16.msrb.mxu3 %v3053_v29  ;;  %v1756_v61 = vpop.f32.mrf.mxu2  ;;  %v3056_v29 = vld [vmem:[%s3734_s1 + $0x600] sm:$0xff] }
  0xae   :  { %1982 = vmatpush.bf16.msrb.mxu0 %v3028_v31  ;;  %v493_v31 = vpack.c.b16 %v468_v28, %v468_v28 }
  0xaf   :  { %2008 = vmatpush.bf16.msrb.mxu2 %v3044_v32  ;;  %v1769_v3 = vpop.f32.mrf.mxu3 }
  0xb0   :  { %1995 = vmatpush.bf16.msrb.mxu1 %v3036_v34 }
  0xb1   :  { %2021 = vmatpush.bf16.msrb.mxu3 %v3052_v35 }
  0xb2   :  { %1983 = vmatpush.bf16.msrb.mxu0 %v3027_v38 }
  0xb3   :  { %2009 = vmatpush.bf16.msrb.mxu2 %v3043_v39 }
  0xb4   :  { %1996 = vmatpush.bf16.msrb.mxu1 %v3035_v41 }
  0xb5   :  { %2022 = vmatpush.bf16.msrb.mxu3 %v3051_v42 }
  0xb6   :  { %1984 = vmatpush.bf16.msrb.mxu0 %v3026_v44 }
  0xb7   :  { %2010 = vmatpush.bf16.msrb.mxu2 %v3042_v45 }
  0xb8   :  { %1997 = vmatpush.bf16.msrb.mxu1 %v3034_v49 }
  0xb9   :  { %2023 = vmatpush.bf16.msrb.mxu3 %v3050_v50 }
  0xba   :  { %1985 = vmatpush.bf16.msrb.mxu0 %v3025_v52 }
  0xbb   :  { %2011 = vmatpush.bf16.msrb.mxu2 %v3041_v54 }
  0xbc   :  { %1998 = vmatpush.bf16.msrb.mxu1 %v3033_v57 }
  0xbd   :  { %2024 = vmatpush.bf16.msrb.mxu3 %v3049_v58 }
  0xbe   :  { %1986 = vmatpush.bf16.msrb.mxu0 %v3024_v62  ;;  %v1780_v13 = vpop.f32.mrf.mxu0 }
  0xbf   :  { %2012 = vmatpush.bf16.msrb.mxu2 %v3040_v63  ;;  %v1781_v14 = vadd.f32 %v1780_v13, %v1768_v51 }
  0xc0   :  { %1999 = vmatpush.bf16.msrb.mxu1 %v3032_v4  ;;  %v1793_v15 = vpop.f32.mrf.mxu1 }
  0xc1   :  { %2025 = vmatpush.bf16.msrb.mxu3 %v3048_v5  ;;  %1987 = vmatmul.bf16.vlgmr.msrb.gmra.mxu0 %v489_v6  ;;  %v1794_v16 = vadd.f32 %v1793_v15, %v1781_v14 }
  0xc2   :  { %2031 = vmatpush.bf16.msra.mxu0 %v3063_v0  ;;  %2013 = vmatmul.bf16.vlgmr.msrb.gmra.mxu2 %v491_v7 }
  0xc3   :  { %2000 = vmatmul.bf16.vlgmr.msrb.gmra.mxu1 %v490_v8 }
  0xc4   :  { %2026 = vmatmul.bf16.vlgmr.msrb.gmra.mxu3 %v492_v9 }
  0xc5   :  { %v1806_v18 = vpop.f32.mrf.mxu2 }
  0xc6   :  { %2032 = vmatpush.bf16.msra.mxu0 %v3062_v10  ;;  %v1807_v19 = vadd.f32 %v1806_v18, %v1794_v16  ;;  %v1782_v22 = vpop.f32.mrf.mxu0 }
  0xc7   :  { %v1819_v21 = vpop.f32.mrf.mxu3 }
  0xc8   :  { %v1820_v23 = vadd.f32 %v1819_v21, %v1807_v19  ;;  %v1795_v24 = vpop.f32.mrf.mxu1 }
  0xca   :  { %2033 = vmatpush.bf16.msra.mxu0 %v3061_v11 }
  0xcd   :  { %v1808_v27 = vpop.f32.mrf.mxu2 }
  0xce   :  { %2034 = vmatpush.bf16.msra.mxu0 %v3060_v12 }
  0xcf   :  { %v1821_v30 = vpop.f32.mrf.mxu3 }
  0xd2   :  { %2035 = vmatpush.bf16.msra.mxu0 %v3059_v17 }
  0xd6   :  { %2036 = vmatpush.bf16.msra.mxu0 %v3058_v20 }
  0xda   :  { %2037 = vmatpush.bf16.msra.mxu0 %v3057_v25 }
  0xde   :  { %2038 = vmatpush.bf16.msra.mxu0 %v3056_v29  ;;  %v1832_v32 = vpop.f32.mrf.mxu0 }
  0xdf   :  { %v1833_v33 = vadd.f32 %v1832_v32, %v1820_v23 }
  0xe0   :  { %v1845_v34 = vpop.f32.mrf.mxu1 }
  0xe1   :  { %2039 = vmatmul.bf16.vlgmr.msra.gmra.mxu0 %v493_v31  ;;  %v1846_v35 = vadd.f32 %v1845_v34, %v1833_v33 }
  0xe5   :  { %v1858_v36 = vpop.f32.mrf.mxu2 }
  0xe6   :  { %v1859_v37 = vadd.f32 %v1858_v36, %v1846_v35  ;;  %v1834_v39 = vpop.f32.mrf.mxu0 }
  0xe7   :  { %v1871_v38 = vpop.f32.mrf.mxu3 }
  0xe8   :  { %v1872_v40 = vadd.f32 %v1871_v38, %v1859_v37  ;;  %v1847_v41 = vpop.f32.mrf.mxu1 }
  0xed   :  { %v1860_v42 = vpop.f32.mrf.mxu2 }
  0xef   :  { %v1873_v43 = vpop.f32.mrf.mxu3 }
  0xfe   :  { %v1884_v44 = vpop.f32.mrf.mxu0 }
  0xff   :  { %v1885_v45 = vadd.f32 %v1884_v44, %v1872_v40 }
 0x100   :  { %v1897_v46 = vpop.f32.mrf.mxu1 }
 0x101   :  { %v1898_v47 = vadd.f32 %v1897_v46, %v1885_v45 }
 0x105   :  { %v1910_v48 = vpop.f32.mrf.mxu2 }
 0x106   :  { %v1911_v49 = vadd.f32 %v1910_v48, %v1898_v47  ;;  %v1886_v51 = vpop.f32.mrf.mxu0 }
 0x107   :  { %v1923_v50 = vpop.f32.mrf.mxu3 }
 0x108   :  { %v1924_v52 = vadd.f32 %v1923_v50, %v1911_v49  ;;  %v1899_v53 = vpop.f32.mrf.mxu1 }
 0x10d   :  { %v1912_v54 = vpop.f32.mrf.mxu2 }
 0x10f   :  { %v1925_v55 = vpop.f32.mrf.mxu3 }
 0x11e   :  { %v1936_v56 = vpop.f32.mrf.mxu0 }
 0x11f   :  { %v1937_v3 = vadd.f32 %v1936_v56, %v1924_v52 }
 0x120   :  { %v1949_v57 = vpop.f32.mrf.mxu1 }
 0x121   :  { %v1950_v7 = vadd.f32 %v1949_v57, %v1937_v3 }
 0x125   :  { %v1962_v58 = vpop.f32.mrf.mxu2 }
 0x126   :  { %v1938_v60 = vpop.f32.mrf.mxu0  ;;  %v1963_v8 = vadd.f32 %v1962_v58, %v1950_v7 }
 0x127   :  { %v1975_v59 = vpop.f32.mrf.mxu3 }
 0x128   :  { %v1951_v61 = vpop.f32.mrf.mxu1  ;;  %v1976_v11 = vadd.f32 %v1975_v59, %v1963_v8 }
 0x12d   :  { %v1964_v62 = vpop.f32.mrf.mxu2 }
 0x12f   :  { %v1977_v63 = vpop.f32.mrf.mxu3 }
 0x13e   :  { %v1988_v0 = vpop.f32.mrf.mxu0 }
 0x13f   :  { %v1989_v12 = vadd.f32 %v1988_v0, %v1976_v11 }
 0x140   :  { %v2001_v1 = vpop.f32.mrf.mxu1 }
 0x141   :  { %v2002_v13 = vadd.f32 %v2001_v1, %v1989_v12 }
 0x145   :  { %v2014_v2 = vpop.f32.mrf.mxu2 }
 0x146   :  { %v1990_v5 = vpop.f32.mrf.mxu0  ;;  %v2015_v14 = vadd.f32 %v2014_v2, %v2002_v13 }
 0x147   :  { %v2027_v4 = vpop.f32.mrf.mxu3 }
 0x148   :  { %v2003_v6 = vpop.f32.mrf.mxu1  ;;  %v2028_v15 = vadd.f32 %v2027_v4, %v2015_v14 }
 0x14d   :  { %v2016_v9 = vpop.f32.mrf.mxu2 }
 0x14f   :  { %v2029_v10 = vpop.f32.mrf.mxu3 }
 0x15e   :  { %v2040_v16 = vpop.f32.mrf.mxu0 }
 0x15f   :  { %v2041_v17 = vadd.f32 %v2040_v16, %v2028_v15 }
 0x161   :  { %v2045_v18 = vmin.f32 %v2041_v17, 20.0  ;;  %vm2044_vm1 = vcmp.gt.f32.partialorder %v2041_v17, 20.0 }
 0x163   :  { %v2046_v19 = vmul.f32 1.442695, %v2045_v18 }
 0x165   :  { %3065 = vpow2.f32 %v2046_v19 }
 0x166   :  { %v2042_v20 = vpop.f32.mrf.mxu0 }
 0x16b   :  { %v3066_v21 = vpop.eup %3065 }
 0x16c   :  { %v2048_v22 = vadd.f32 1.0, %v3066_v21  ;;  %v2051_v23 = vmul.f32 -0.5, %v3066_v21  ;;  %v2054_v25 = vand.u32 2147483647, %v3066_v21 }
 0x16e   :  { %3067 = vlog2.f32 %v2048_v22  ;;  %v2052_v24 = vadd.f32 1.0, %v2051_v23  ;;  %vm2055_vm0 = vcmp.lt.f32.partialorder %v2054_v25, 0.0004427343 }
 0x170   :  { %v2053_v28 = vmul.f32 %v3066_v21, %v2052_v24 }
 0x174   :  { %v3068_v26 = vpop.eup %3067 }
 0x175   :  { %v2050_v27 = vmul.f32 0.6931472, %v3068_v26 }
 0x177   :  { %v2056_v29 = vsel %vm2055_vm0, %v2053_v28, %v2050_v27 }
 0x178   :  { %v2057_v30 = vsel %vm2044_vm1, %v2041_v17, %v2056_v29 }
 0x179   :  { %v2058_v31 = vpack.c.bf16 %v2057_v30, %v2057_v30 }
 0x17b   :  { %2059 = vst [vmem:[%s3737_s3] sm:$0xf] %v2058_v31 }

// kernel: nu_forward.7
= control target key start
LH: loop header
LB: loop body
LE: loop exit
PB: predicated region body
PF: predicated region fallthrough
CT: control target
= control target key end

     0   :  { %vm923_vm0 = vcmask 1043456   ;;  %vm919_vm1 = vcmask 64512   ;;  %s5630_s2 = inlined_call_operand.vmem [shape: bf16[512,384], index: 2, kind: input, shape index: {}]   ;;  %s5631_s0 = inlined_call_operand.vmem [shape: bf16[2,512], index: 0, kind: input, shape index: {}]   ;;  %s5632_s4 = inlined_call_operand.vmem [shape: bf16[8,384], index: 4, kind: input, shape index: {}]   ;;  %s5633_s1 = inlined_call_operand.vmem [shape: f32[2,8], index: 1, kind: input, shape index: {}]   ;;  %s5634_s3 = inlined_call_operand.vmem [shape: f32[1,384], index: 3, kind: input, shape index: {}]   ;;  %s5635_s7 = inlined_call_operand.vmem [shape: bf16[384,384], index: 7, kind: input, shape index: {}]   ;;  %s5636_s5 = inlined_call_operand.vmem [shape: f32[1,384], index: 5, kind: input, shape index: {}]   ;;  %s5637_s6 = inlined_call_operand.vmem [shape: bf16[384,384], index: 6, kind: input, shape index: {}]   ;;  %s5638_s10 = inlined_call_operand.vmem [shape: f32[1,128], index: 10, kind: input, shape index: {}]   ;;  %s5639_s9 = inlined_call_operand.vmem [shape: bf16[384,128], index: 9, kind: input, shape index: {}]   ;;  %s5640_s8 = inlined_call_operand.vmem [shape: f32[1,384], index: 8, kind: input, shape index: {}]   ;;  %s5641_s11 = inlined_call_operand.vmem [shape: f32[2,128], index: 11, kind: output, shape index: {}]  }
   0x1   :  { %v2593_v0 = vld [vmem:[%s5630_s2 + $0xa8] sm:$0xf]  ;;  %v3588_v1 = vld [vmem:[%s5630_s2 + $0xb0] sm:$0xf0]  ;;  %v2581_v11 = vld [vmem:[%s5630_s2 + $0x90] sm:$0xf] }
   0x2   :  { %v2689_v2 = vld [vmem:[%s5630_s2 + $0x168] sm:$0xf]  ;;  %v2594_v3 = vor.u32 %v3588_v1, %v2593_v0  ;;  %v3612_v4 = vld [vmem:[%s5630_s2 + $0x170] sm:$0xf0]  ;;  %v3585_v13 = vld [vmem:[%s5630_s2 + $0x98] sm:$0xf0] }
   0x3   :  { %v2785_v5 = vld [vmem:[%s5630_s2 + $0x228] sm:$0xf]  ;;  %v3636_v6 = vld [vmem:[%s5630_s2 + $0x230] sm:$0xf0]  ;;  %v2690_v7 = vor.u32 %v3612_v4, %v2689_v2  ;;  %v2677_v14 = vld [vmem:[%s5630_s2 + $0x150] sm:$0xf]  ;;  %v2582_v16 = vor.u32 %v3585_v13, %v2581_v11 }
   0x4   :  { %v2786_v8 = vor.u32 %v3636_v6, %v2785_v5  ;;  %v2881_v9 = vld [vmem:[%s5630_s2 + $0x2e8] sm:$0xf]  ;;  %v3660_v10 = vld [vmem:[%s5630_s2 + $0x2f0] sm:$0xf0]  ;;  %698 = vmatpush.bf16.msra.mxu0 %v2594_v3  ;;  %v3609_v15 = vld [vmem:[%s5630_s2 + $0x158] sm:$0xf0] }
   0x5   :  { %v2882_v12 = vor.u32 %v3660_v10, %v2881_v9  ;;  %711 = vmatpush.bf16.msra.mxu1 %v2690_v7  ;;  %v2678_v17 = vor.u32 %v3609_v15, %v2677_v14  ;;  %v2773_v18 = vld [vmem:[%s5630_s2 + $0x210] sm:$0xf]  ;;  %v3633_v19 = vld [vmem:[%s5630_s2 + $0x218] sm:$0xf0]  ;;  %v2569_v23 = vld [vmem:[%s5630_s2 + $0x78] sm:$0xf] }
   0x6   :  { %724 = vmatpush.bf16.msra.mxu2 %v2786_v8  ;;  %v2869_v20 = vld [vmem:[%s5630_s2 + $0x2d0] sm:$0xf]  ;;  %v2774_v21 = vor.u32 %v3633_v19, %v2773_v18  ;;  %v3657_v22 = vld [vmem:[%s5630_s2 + $0x2d8] sm:$0xf0]  ;;  %v3582_v24 = vld [vmem:[%s5630_s2 + $0x80] sm:$0xf0] }
   0x7   :  { %737 = vmatpush.bf16.msra.mxu3 %v2882_v12  ;;  %v2870_v25 = vor.u32 %v3657_v22, %v2869_v20  ;;  %v2665_v26 = vld [vmem:[%s5630_s2 + $0x138] sm:$0xf]  ;;  %v3606_v27 = vld [vmem:[%s5630_s2 + $0x140] sm:$0xf0]  ;;  %v2570_v29 = vor.u32 %v3582_v24, %v2569_v23  ;;  %v2557_v35 = vld [vmem:[%s5630_s2 + $0x60] sm:$0xf] }
   0x8   :  { %v2761_v28 = vld [vmem:[%s5630_s2 + $0x1f8] sm:$0xf]  ;;  %699 = vmatpush.bf16.msra.mxu0 %v2582_v16  ;;  %v3630_v30 = vld [vmem:[%s5630_s2 + $0x200] sm:$0xf0]  ;;  %v2666_v33 = vor.u32 %v3606_v27, %v2665_v26  ;;  %v3579_v36 = vld [vmem:[%s5630_s2 + $0x68] sm:$0xf0] }
   0x9   :  { %v2857_v31 = vld [vmem:[%s5630_s2 + $0x2b8] sm:$0xf]  ;;  %v3654_v32 = vld [vmem:[%s5630_s2 + $0x2c0] sm:$0xf0]  ;;  %712 = vmatpush.bf16.msra.mxu1 %v2678_v17  ;;  %v2762_v34 = vor.u32 %v3630_v30, %v2761_v28  ;;  %v2653_v37 = vld [vmem:[%s5630_s2 + $0x120] sm:$0xf]  ;;  %v2558_v44 = vor.u32 %v3579_v36, %v2557_v35 }
   0xa   :  { %725 = vmatpush.bf16.msra.mxu2 %v2774_v21  ;;  %v2858_v38 = vor.u32 %v3654_v32, %v2857_v31  ;;  %v3603_v39 = vld [vmem:[%s5630_s2 + $0x128] sm:$0xf0]  ;;  %v2749_v40 = vld [vmem:[%s5630_s2 + $0x1e0] sm:$0xf]  ;;  %v2545_v47 = vld [vmem:[%s5630_s2 + $0x48] sm:$0xf] }
   0xb   :  { %738 = vmatpush.bf16.msra.mxu3 %v2870_v25  ;;  %v3627_v41 = vld [vmem:[%s5630_s2 + $0x1e8] sm:$0xf0]  ;;  %v2845_v42 = vld [vmem:[%s5630_s2 + $0x2a0] sm:$0xf]  ;;  %v2654_v45 = vor.u32 %v3603_v39, %v2653_v37  ;;  %v3576_v48 = vld [vmem:[%s5630_s2 + $0x50] sm:$0xf0] }
   0xc   :  { %v3651_v43 = vld [vmem:[%s5630_s2 + $0x2a8] sm:$0xf0]  ;;  %700 = vmatpush.bf16.msra.mxu0 %v2570_v29  ;;  %v2750_v46 = vor.u32 %v3627_v41, %v2749_v40  ;;  %v2641_v49 = vld [vmem:[%s5630_s2 + $0x108] sm:$0xf]  ;;  %v3600_v51 = vld [vmem:[%s5630_s2 + $0x110] sm:$0xf0]  ;;  %v2546_v56 = vor.u32 %v3576_v48, %v2545_v47 }
   0xd   :  { %713 = vmatpush.bf16.msra.mxu1 %v2666_v33  ;;  %v2846_v50 = vor.u32 %v3651_v43, %v2845_v42  ;;  %v2737_v52 = vld [vmem:[%s5630_s2 + $0x1c8] sm:$0xf]  ;;  %v3624_v53 = vld [vmem:[%s5630_s2 + $0x1d0] sm:$0xf0]  ;;  %v2642_v57 = vor.u32 %v3600_v51, %v2641_v49  ;;  %v2533_v59 = vld [vmem:[%s5630_s2 + $0x30] sm:$0xf] }
   0xe   :  { %726 = vmatpush.bf16.msra.mxu2 %v2762_v34  ;;  %v2833_v54 = vld [vmem:[%s5630_s2 + $0x288] sm:$0xf]  ;;  %v3648_v55 = vld [vmem:[%s5630_s2 + $0x290] sm:$0xf0]  ;;  %v2738_v58 = vor.u32 %v3624_v53, %v2737_v52  ;;  %v3573_v60 = vld [vmem:[%s5630_s2 + $0x38] sm:$0xf0] }
   0xf   :  { %739 = vmatpush.bf16.msra.mxu3 %v2858_v38  ;;  %v2629_v61 = vld [vmem:[%s5630_s2 + $0xf0] sm:$0xf]  ;;  %v2834_v62 = vor.u32 %v3648_v55, %v2833_v54  ;;  %v3597_v63 = vld [vmem:[%s5630_s2 + $0xf8] sm:$0xf0]  ;;  %v2534_v4 = vor.u32 %v3573_v60, %v2533_v59  ;;  %v2521_v7 = vld [vmem:[%s5630_s2 + $0x18] sm:$0xf] }
  0x10   :  { %701 = vmatpush.bf16.msra.mxu0 %v2558_v44  ;;  %v2725_v0 = vld [vmem:[%s5630_s2 + $0x1b0] sm:$0xf]  ;;  %v3621_v1 = vld [vmem:[%s5630_s2 + $0x1b8] sm:$0xf0]  ;;  %v2630_v5 = vor.u32 %v3597_v63, %v2629_v61  ;;  %v3570_v8 = vld [vmem:[%s5630_s2 + $0x20] sm:$0xf0] }
  0x11   :  { %714 = vmatpush.bf16.msra.mxu1 %v2654_v45  ;;  %v2821_v2 = vld [vmem:[%s5630_s2 + $0x270] sm:$0xf]  ;;  %v3645_v3 = vld [vmem:[%s5630_s2 + $0x278] sm:$0xf0]  ;;  %v2726_v6 = vor.u32 %v3621_v1, %v2725_v0  ;;  %v2617_v9 = vld [vmem:[%s5630_s2 + $0xd8] sm:$0xf]  ;;  %v2522_v17 = vor.u32 %v3570_v8, %v2521_v7 }
  0x12   :  { %727 = vmatpush.bf16.msra.mxu2 %v2750_v46  ;;  %v2822_v10 = vor.u32 %v3645_v3, %v2821_v2  ;;  %v3594_v11 = vld [vmem:[%s5630_s2 + $0xe0] sm:$0xf0]  ;;  %v2713_v12 = vld [vmem:[%s5630_s2 + $0x198] sm:$0xf]  ;;  %v2509_v16 = vld [vmem:[%s5630_s2] sm:$0xf] }
  0x13   :  { %740 = vmatpush.bf16.msra.mxu3 %v2846_v50  ;;  %v3618_v13 = vld [vmem:[%s5630_s2 + $0x1a0] sm:$0xf0]  ;;  %v2809_v14 = vld [vmem:[%s5630_s2 + $0x258] sm:$0xf]  ;;  %v3567_v18 = vld [vmem:[%s5630_s2 + $0x8] sm:$0xf0]  ;;  %v2618_v21 = vor.u32 %v3594_v11, %v2617_v9 }
  0x14   :  { %702 = vmatpush.bf16.msra.mxu0 %v2546_v56  ;;  %v3642_v15 = vld [vmem:[%s5630_s2 + $0x260] sm:$0xf0]  ;;  %v2605_v19 = vld [vmem:[%s5630_s2 + $0xc0] sm:$0xf]  ;;  %v3591_v20 = vld [vmem:[%s5630_s2 + $0xc8] sm:$0xf0]  ;;  %v2714_v22 = vor.u32 %v3618_v13, %v2713_v12  ;;  %v2510_v32 = vor.u32 %v3567_v18, %v2509_v16 }
  0x15   :  { %715 = vmatpush.bf16.msra.mxu1 %v2642_v57  ;;  %v2701_v23 = vld [vmem:[%s5630_s2 + $0x180] sm:$0xf]  ;;  %v3615_v24 = vld [vmem:[%s5630_s2 + $0x188] sm:$0xf0]  ;;  %v2810_v26 = vor.u32 %v3642_v15, %v2809_v14  ;;  %v2595_v28 = vld [vmem:[%s5630_s2 + $0xb4] sm:$0xf0]  ;;  %v2606_v36 = vor.u32 %v3591_v20, %v2605_v19 }
  0x16   :  { %728 = vmatpush.bf16.msra.mxu2 %v2738_v58  ;;  %v39_v25 = vld [vmem:[%s5631_s0] sm:$0xf]  ;;  %v3587_v27 = vld [vmem:[%s5630_s2 + $0xac] sm:$0xf]  ;;  %v2691_v30 = vld [vmem:[%s5630_s2 + $0x174] sm:$0xf0]  ;;  %v2702_v37 = vor.u32 %v3615_v24, %v2701_v23 }
  0x17   :  { %741 = vmatpush.bf16.msra.mxu3 %v2834_v62  ;;  %177 = vst [vmem:[#allocation1] ss:$9 sm:$0xff] %v39_v25  ;;  %v3611_v29 = vld [vmem:[%s5630_s2 + $0x16c] sm:$0xf]  ;;  %v2787_v33 = vld [vmem:[%s5630_s2 + $0x234] sm:$0xf0]  ;;  %v2598_v40 = vor.u32 %v3587_v27, %v2595_v28 }
  0x18   :  { %703 = vmatpush.bf16.msra.mxu0 %v2534_v4  ;;  %v3635_v31 = vld [vmem:[%s5630_s2 + $0x22c] sm:$0xf]  ;;  %v2797_v34 = vld [vmem:[%s5630_s2 + $0x240] sm:$0xf]  ;;  %v2883_v39 = vld [vmem:[%s5630_s2 + $0x2f4] sm:$0xf0]  ;;  %v2694_v41 = vor.u32 %v3611_v29, %v2691_v30 }
  0x19   :  { %716 = vmatpush.bf16.msra.mxu1 %v2630_v5  ;;  %v3639_v35 = vld [vmem:[%s5630_s2 + $0x248] sm:$0xf0]  ;;  %v3584_v42 = vld [vmem:[%s5630_s2 + $0x94] sm:$0xf]  ;;  %v2790_v43 = vor.u32 %v3635_v31, %v2787_v33  ;;  %v2583_v45 = vld [vmem:[%s5630_s2 + $0x9c] sm:$0xf0] }
  0x1a   :  { %729 = vmatpush.bf16.msra.mxu2 %v2726_v6  ;;  %v3659_v38 = vld [vmem:[%s5630_s2 + $0x2ec] sm:$0xf]  ;;  %v2798_v44 = vor.u32 %v3639_v35, %v2797_v34  ;;  %v3608_v46 = vld [vmem:[%s5630_s2 + $0x154] sm:$0xf]  ;;  %v2679_v47 = vld [vmem:[%s5630_s2 + $0x15c] sm:$0xf0]  ;;  %v2586_v54 = vor.u32 %v3584_v42, %v2583_v45 }
  0x1b   :  { %742 = vmatpush.bf16.msra.mxu3 %v2822_v10  ;;  %v2886_v48 = vor.u32 %v3659_v38, %v2883_v39  ;;  %v3632_v49 = vld [vmem:[%s5630_s2 + $0x214] sm:$0xf]  ;;  %v2775_v50 = vld [vmem:[%s5630_s2 + $0x21c] sm:$0xf0]  ;;  %v2682_v55 = vor.u32 %v3608_v46, %v2679_v47  ;;  %v3581_v58 = vld [vmem:[%s5630_s2 + $0x7c] sm:$0xf] }
  0x1c   :  { %704 = vmatpush.bf16.msra.mxu0 %v2522_v17  ;;  %v3656_v52 = vld [vmem:[%s5630_s2 + $0x2d4] sm:$0xf]  ;;  %v2871_v53 = vld [vmem:[%s5630_s2 + $0x2dc] sm:$0xf0]  ;;  %v2778_v59 = vor.u32 %v3632_v49, %v2775_v50  ;;  %v2571_v60 = vld [vmem:[%s5630_s2 + $0x84] sm:$0xf0] }
  0x1d   :  { %717 = vmatpush.bf16.msra.mxu1 %v2618_v21  ;;  %v3605_v61 = vld [vmem:[%s5630_s2 + $0x13c] sm:$0xf]  ;;  %v2667_v62 = vld [vmem:[%s5630_s2 + $0x144] sm:$0xf0]  ;;  %v2874_v0 = vor.u32 %v3656_v52, %v2871_v53  ;;  %v2574_v5 = vor.u32 %v3581_v58, %v2571_v60  ;;  %v3578_v7 = vld [vmem:[%s5630_s2 + $0x64] sm:$0xf] }
  0x1e   :  { %730 = vmatpush.bf16.msra.mxu2 %v2714_v22  ;;  %v4164_v51 = vld [vmem:[#allocation1 + $0x12] sm:$0xff]  ;;  %v4172_v56 = vld [vmem:[#allocation1] sm:$0xff]  ;;  %v4174_v57 = vld [vmem:[#allocation1 + $0x9] sm:$0xff]  ;;  %v2670_v6 = vor.u32 %v3605_v61, %v2667_v62 }
  0x1f   :  { %743 = vmatpush.bf16.msra.mxu3 %v2810_v26  ;;  %v4189_v63 = vld [vmem:[#allocation1 + $0x1b] sm:$0xff]  ;;  %v2763_v2 = vld [vmem:[%s5630_s2 + $0x204] sm:$0xf0]  ;;  %v2559_v9 = vld [vmem:[%s5630_s2 + $0x6c] sm:$0xf0] }
  0x20   :  { %705 = vmatpush.bf16.msra.mxu0 %v2510_v32  ;;  %v3629_v1 = vld [vmem:[%s5630_s2 + $0x1fc] sm:$0xf]  ;;  %v2859_v4 = vld [vmem:[%s5630_s2 + $0x2c4] sm:$0xf0]  ;;  %v3602_v10 = vld [vmem:[%s5630_s2 + $0x124] sm:$0xf]  ;;  %v2562_v17 = vor.u32 %v3578_v7, %v2559_v9 }
  0x21   :  { %718 = vmatpush.bf16.msra.mxu1 %v2606_v36  ;;  %v3653_v3 = vld [vmem:[%s5630_s2 + $0x2bc] sm:$0xf]  ;;  %v2766_v8 = vor.u32 %v3629_v1, %v2763_v2  ;;  %v2655_v11 = vld [vmem:[%s5630_s2 + $0x12c] sm:$0xf0]  ;;  %v3626_v13 = vld [vmem:[%s5630_s2 + $0x1e4] sm:$0xf] }
  0x22   :  { %731 = vmatpush.bf16.msra.mxu2 %v2702_v37  ;;  %v2862_v12 = vor.u32 %v3653_v3, %v2859_v4  ;;  %v2751_v14 = vld [vmem:[%s5630_s2 + $0x1ec] sm:$0xf0]  ;;  %v3650_v15 = vld [vmem:[%s5630_s2 + $0x2a4] sm:$0xf]  ;;  %v2658_v18 = vor.u32 %v3602_v10, %v2655_v11  ;;  %v3575_v19 = vld [vmem:[%s5630_s2 + $0x4c] sm:$0xf] }
  0x23   :  { %744 = vmatpush.bf16.msra.mxu3 %v2798_v44  ;;  %706 = vmatmul.bf16.vlgmr.msra.gmra.mxu0 %v4172_v56  ;;  %v2847_v16 = vld [vmem:[%s5630_s2 + $0x2ac] sm:$0xf0]  ;;  %v2754_v20 = vor.u32 %v3626_v13, %v2751_v14  ;;  %v2547_v21 = vld [vmem:[%s5630_s2 + $0x54] sm:$0xf0]  ;;  %v3599_v22 = vld [vmem:[%s5630_s2 + $0x10c] sm:$0xf] }
  0x24   :  { %750 = vmatpush.bf16.msrb.mxu0 %v2598_v40  ;;  %719 = vmatmul.bf16.vlgmr.msra.gmra.mxu1 %v4174_v57  ;;  %v2643_v23 = vld [vmem:[%s5630_s2 + $0x114] sm:$0xf0]  ;;  %v2850_v24 = vor.u32 %v3650_v15, %v2847_v16  ;;  %v3623_v25 = vld [vmem:[%s5630_s2 + $0x1cc] sm:$0xf]  ;;  %v2550_v29 = vor.u32 %v3575_v19, %v2547_v21  ;;  %v3572_v31 = vld [vmem:[%s5630_s2 + $0x34] sm:$0xf] }
  0x25   :  { %763 = vmatpush.bf16.msrb.mxu1 %v2694_v41  ;;  %732 = vmatmul.bf16.vlgmr.msra.gmra.mxu2 %v4164_v51  ;;  %v2739_v26 = vld [vmem:[%s5630_s2 + $0x1d4] sm:$0xf0]  ;;  %v3647_v27 = vld [vmem:[%s5630_s2 + $0x28c] sm:$0xf]  ;;  %v2646_v30 = vor.u32 %v3599_v22, %v2643_v23  ;;  %v2535_v33 = vld [vmem:[%s5630_s2 + $0x3c] sm:$0xf0] }
  0x26   :  { %776 = vmatpush.bf16.msrb.mxu2 %v2790_v43  ;;  %745 = vmatmul.bf16.vlgmr.msra.gmra.mxu3 %v4189_v63  ;;  %v2835_v28 = vld [vmem:[%s5630_s2 + $0x294] sm:$0xf0]  ;;  %v2742_v32 = vor.u32 %v3623_v25, %v2739_v26  ;;  %v3596_v34 = vld [vmem:[%s5630_s2 + $0xf4] sm:$0xf]  ;;  %v2631_v35 = vld [vmem:[%s5630_s2 + $0xfc] sm:$0xf0]  ;;  %v2538_v41 = vor.u32 %v3572_v31, %v2535_v33 }
  0x27   :  { %789 = vmatpush.bf16.msrb.mxu3 %v2886_v48  ;;  %v2838_v36 = vor.u32 %v3647_v27, %v2835_v28  ;;  %v3620_v37 = vld [vmem:[%s5630_s2 + $0x1b4] sm:$0xf]  ;;  %v2727_v38 = vld [vmem:[%s5630_s2 + $0x1bc] sm:$0xf0]  ;;  %v2634_v42 = vor.u32 %v3596_v34, %v2631_v35  ;;  %v3569_v43 = vld [vmem:[%s5630_s2 + $0x1c] sm:$0xf] }
  0x28   :  { %751 = vmatpush.bf16.msrb.mxu0 %v2586_v54  ;;  %v3644_v39 = vld [vmem:[%s5630_s2 + $0x274] sm:$0xf]  ;;  %v2823_v40 = vld [vmem:[%s5630_s2 + $0x27c] sm:$0xf0]  ;;  %v2730_v44 = vor.u32 %v3620_v37, %v2727_v38  ;;  %v2523_v45 = vld [vmem:[%s5630_s2 + $0x24] sm:$0xf0] }
  0x29   :  { %764 = vmatpush.bf16.msrb.mxu1 %v2682_v55  ;;  %v3593_v46 = vld [vmem:[%s5630_s2 + $0xdc] sm:$0xf]  ;;  %v2619_v47 = vld [vmem:[%s5630_s2 + $0xe4] sm:$0xf0]  ;;  %v2826_v48 = vor.u32 %v3644_v39, %v2823_v40  ;;  %v2526_v54 = vor.u32 %v3569_v43, %v2523_v45  ;;  %v3566_v58 = vld [vmem:[%s5630_s2 + $0x4] sm:$0xf] }
  0x2a   :  { %777 = vmatpush.bf16.msrb.mxu2 %v2778_v59  ;;  %v3617_v49 = vld [vmem:[%s5630_s2 + $0x19c] sm:$0xf]  ;;  %v2715_v50 = vld [vmem:[%s5630_s2 + $0x1a4] sm:$0xf0]  ;;  %v2622_v55 = vor.u32 %v3593_v46, %v2619_v47  ;;  %v2511_v59 = vld [vmem:[%s5630_s2 + $0xc] sm:$0xf0] }
  0x2b   :  { %790 = vmatpush.bf16.msrb.mxu3 %v2874_v0  ;;  %v3641_v52 = vld [vmem:[%s5630_s2 + $0x25c] sm:$0xf]  ;;  %v2811_v53 = vld [vmem:[%s5630_s2 + $0x264] sm:$0xf0]  ;;  %v3590_v60 = vld [vmem:[%s5630_s2 + $0xc4] sm:$0xf]  ;;  %v2718_v61 = vor.u32 %v3617_v49, %v2715_v50  ;;  %v2514_v9 = vor.u32 %v3566_v58, %v2511_v59 }
  0x2c   :  { %752 = vmatpush.bf16.msrb.mxu0 %v2574_v5  ;;  %v2607_v62 = vld [vmem:[%s5630_s2 + $0xcc] sm:$0xf0]  ;;  %v3614_v0 = vld [vmem:[%s5630_s2 + $0x184] sm:$0xf]  ;;  %v2814_v2 = vor.u32 %v3641_v52, %v2811_v53  ;;  %v3589_v4 = vld [vmem:[%s5630_s2 + $0xb8] sm:$0xf0] }
  0x2d   :  { %765 = vmatpush.bf16.msrb.mxu1 %v2670_v6  ;;  %v2703_v1 = vld [vmem:[%s5630_s2 + $0x18c] sm:$0xf0]  ;;  %v3613_v6 = vld [vmem:[%s5630_s2 + $0x178] sm:$0xf0]  ;;  %v2610_v10 = vor.u32 %v3590_v60, %v2607_v62  ;;  %v3638_v11 = vld [vmem:[%s5630_s2 + $0x244] sm:$0xf] }
  0x2e   :  { %778 = vmatpush.bf16.msrb.mxu2 %v2766_v8  ;;  %v2601_v3 = vld [vmem:[%s5630_s2 + $0xb0] sm:$0xf]  ;;  %v3637_v8 = vld [vmem:[%s5630_s2 + $0x238] sm:$0xf0]  ;;  %v2706_v13 = vor.u32 %v3614_v0, %v2703_v1  ;;  %v2589_v19 = vld [vmem:[%s5630_s2 + $0x98] sm:$0xf] }
  0x2f   :  { %791 = vmatpush.bf16.msrb.mxu3 %v2862_v12  ;;  %v2697_v5 = vld [vmem:[%s5630_s2 + $0x170] sm:$0xf]  ;;  %v2602_v14 = vor.u32 %v3589_v4, %v2601_v3  ;;  %v3661_v16 = vld [vmem:[%s5630_s2 + $0x2f8] sm:$0xf0]  ;;  %v2685_v22 = vld [vmem:[%s5630_s2 + $0x158] sm:$0xf] }
  0x30   :  { %753 = vmatpush.bf16.msrb.mxu0 %v2562_v17  ;;  %v2793_v7 = vld [vmem:[%s5630_s2 + $0x230] sm:$0xf]  ;;  %v2698_v17 = vor.u32 %v3613_v6, %v2697_v5  ;;  %v3610_v23 = vld [vmem:[%s5630_s2 + $0x160] sm:$0xf0]  ;;  %v2781_v25 = vld [vmem:[%s5630_s2 + $0x218] sm:$0xf] }
  0x31   :  { %766 = vmatpush.bf16.msrb.mxu1 %v2658_v18  ;;  %v2799_v12 = vld [vmem:[%s5630_s2 + $0x24c] sm:$0xf0]  ;;  %v2794_v18 = vor.u32 %v3637_v8, %v2793_v7  ;;  %v3634_v26 = vld [vmem:[%s5630_s2 + $0x220] sm:$0xf0]  ;;  %v2877_v28 = vld [vmem:[%s5630_s2 + $0x2d8] sm:$0xf] }
  0x32   :  { %779 = vmatpush.bf16.msrb.mxu2 %v2754_v20  ;;  %v2889_v15 = vld [vmem:[%s5630_s2 + $0x2f0] sm:$0xf]  ;;  %v3586_v20 = vld [vmem:[%s5630_s2 + $0xa0] sm:$0xf0]  ;;  %v2802_v21 = vor.u32 %v3638_v11, %v2799_v12  ;;  %v2577_v31 = vld [vmem:[%s5630_s2 + $0x80] sm:$0xf]  ;;  %v2782_v33 = vor.u32 %v3634_v26, %v2781_v25 }
  0x33   :  { %792 = vmatpush.bf16.msrb.mxu3 %v2850_v24  ;;  %v2890_v24 = vor.u32 %v3661_v16, %v2889_v15  ;;  %v2590_v27 = vor.u32 %v3586_v20, %v2589_v19  ;;  %v2673_v34 = vld [vmem:[%s5630_s2 + $0x140] sm:$0xf]  ;;  %v3607_v35 = vld [vmem:[%s5630_s2 + $0x148] sm:$0xf0]  ;;  %v2565_v43 = vld [vmem:[%s5630_s2 + $0x68] sm:$0xf] }
  0x34   :  { %754 = vmatpush.bf16.msrb.mxu0 %v2550_v29  ;;  %v3658_v29 = vld [vmem:[%s5630_s2 + $0x2e0] sm:$0xf0]  ;;  %v2769_v37 = vld [vmem:[%s5630_s2 + $0x200] sm:$0xf]  ;;  %v3631_v38 = vld [vmem:[%s5630_s2 + $0x208] sm:$0xf0] }
  0x35   :  { %767 = vmatpush.bf16.msrb.mxu1 %v2646_v30  ;;  %v2686_v30 = vor.u32 %v3610_v23, %v2685_v22  ;;  %v2865_v40 = vld [vmem:[%s5630_s2 + $0x2c0] sm:$0xf]  ;;  %v2770_v45 = vor.u32 %v3631_v38, %v2769_v37  ;;  %v2661_v46 = vld [vmem:[%s5630_s2 + $0x128] sm:$0xf]  ;;  %v3604_v47 = vld [vmem:[%s5630_s2 + $0x130] sm:$0xf0] }
  0x36   :  { %780 = vmatpush.bf16.msrb.mxu2 %v2742_v32  ;;  %v3583_v32 = vld [vmem:[%s5630_s2 + $0x88] sm:$0xf0]  ;;  %v2757_v49 = vld [vmem:[%s5630_s2 + $0x1e8] sm:$0xf]  ;;  %v3628_v50 = vld [vmem:[%s5630_s2 + $0x1f0] sm:$0xf0] }
  0x37   :  { %793 = vmatpush.bf16.msrb.mxu3 %v2838_v36  ;;  %v2878_v36 = vor.u32 %v3658_v29, %v2877_v28  ;;  %v2578_v39 = vor.u32 %v3583_v32, %v2577_v31  ;;  %v2853_v53 = vld [vmem:[%s5630_s2 + $0x2a8] sm:$0xf]  ;;  %v2553_v58 = vld [vmem:[%s5630_s2 + $0x50] sm:$0xf]  ;;  %v3577_v59 = vld [vmem:[%s5630_s2 + $0x58] sm:$0xf0]  ;;  %v2758_v60 = vor.u32 %v3628_v50, %v2757_v49 }
  0x38   :  { %755 = vmatpush.bf16.msrb.mxu0 %v2538_v41  ;;  %v3655_v41 = vld [vmem:[%s5630_s2 + $0x2c8] sm:$0xf0]  ;;  %v3601_v62 = vld [vmem:[%s5630_s2 + $0x118] sm:$0xf0]  ;;  %v2745_v1 = vld [vmem:[%s5630_s2 + $0x1d0] sm:$0xf]  ;;  %v2554_v3 = vor.u32 %v3577_v59, %v2553_v58 }
  0x39   :  { %768 = vmatpush.bf16.msrb.mxu1 %v2634_v42  ;;  %v2674_v42 = vor.u32 %v3607_v35, %v2673_v34  ;;  %v2841_v4 = vld [vmem:[%s5630_s2 + $0x290] sm:$0xf]  ;;  %v3649_v5 = vld [vmem:[%s5630_s2 + $0x298] sm:$0xf0]  ;;  %v2541_v7 = vld [vmem:[%s5630_s2 + $0x38] sm:$0xf] }
  0x3a   :  { %781 = vmatpush.bf16.msrb.mxu2 %v2730_v44  ;;  %v3580_v44 = vld [vmem:[%s5630_s2 + $0x70] sm:$0xf0]  ;;  %v3574_v8 = vld [vmem:[%s5630_s2 + $0x40] sm:$0xf0]  ;;  %v2842_v12 = vor.u32 %v3649_v5, %v2841_v4  ;;  %v2529_v20 = vld [vmem:[%s5630_s2 + $0x20] sm:$0xf] }
  0x3b   :  { %794 = vmatpush.bf16.msrb.mxu3 %v2826_v48  ;;  %v2866_v48 = vor.u32 %v3655_v41, %v2865_v40  ;;  %v2566_v52 = vor.u32 %v3580_v44, %v2565_v43  ;;  %v3598_v11 = vld [vmem:[%s5630_s2 + $0x100] sm:$0xf0]  ;;  %v2542_v16 = vor.u32 %v3574_v8, %v2541_v7  ;;  %v2625_v23 = vld [vmem:[%s5630_s2 + $0xe0] sm:$0xf]  ;;  %v902_v26 = vld [vmem:[%s5632_s4 + $0x8] sm:$0xf] }
  0x3c   :  { %756 = vmatpush.bf16.msrb.mxu0 %v2526_v54  ;;  %v3652_v54 = vld [vmem:[%s5630_s2 + $0x2b0] sm:$0xf0]  ;;  %v901_v15 = vld [vmem:[%s5632_s4] sm:$0xff]  ;;  %v3619_v29 = vld [vmem:[%s5630_s2 + $0x1a8] sm:$0xf0]  ;;  %v915_v37 = vunpack.c.l.b16 %v902_v26 }
  0x3d   :  { %769 = vmatpush.bf16.msrb.mxu1 %v2622_v55  ;;  %v2662_v55 = vor.u32 %v3604_v47, %v2661_v46  ;;  %v2854_v0 = vor.u32 %v3652_v54, %v2853_v53  ;;  %v913_v25 = vunpack.c.l.b16 %v901_v15  ;;  %v2721_v28 = vld [vmem:[%s5630_s2 + $0x1a0] sm:$0xf]  ;;  %v2517_v35 = vld [vmem:[%s5630_s2 + $0x8] sm:$0xf]  ;;  %v3592_v40 = vld [vmem:[%s5630_s2 + $0xd0] sm:$0xf0] }
  0x3e   :  { %782 = vmatpush.bf16.msrb.mxu2 %v2718_v61  ;;  %v2649_v61 = vld [vmem:[%s5630_s2 + $0x110] sm:$0xf]  ;;  %v2817_v32 = vld [vmem:[%s5630_s2 + $0x260] sm:$0xf]  ;;  %v2722_v38 = vor.u32 %v3619_v29, %v2721_v28  ;;  %v2709_v43 = vld [vmem:[%s5630_s2 + $0x188] sm:$0xf]  ;;  %v918_v50 = vpack.c.b16 %v915_v37, %v915_v37 }
  0x3f   :  { %795 = vmatpush.bf16.msrb.mxu3 %v2814_v2  ;;  %v3625_v2 = vld [vmem:[%s5630_s2 + $0x1d8] sm:$0xf0]  ;;  %v2650_v6 = vor.u32 %v3601_v62, %v2649_v61  ;;  %v916_v41 = vpack.c.b16 %v913_v25, %v913_v25  ;;  %v3616_v44 = vld [vmem:[%s5630_s2 + $0x190] sm:$0xf0]  ;;  %v2805_v47 = vld [vmem:[%s5630_s2 + $0x248] sm:$0xf] }
  0x40   :  { %757 = vmatpush.bf16.msrb.mxu0 %v2514_v9  ;;  %v2746_v9 = vor.u32 %v3625_v2, %v2745_v1  ;;  %v931_v58 = vsel %vm923_vm0, %v918_v50, 0  ;;  %v899_v59 = vld [vmem:[%s5633_s1] sm:$0x3]  ;;  %v3756_v7 = vld [vmem:[%s5635_s7 + $0xb0] sm:$0xf0] }
  0x41   :  { %770 = vmatpush.bf16.msrb.mxu1 %v2610_v10  ;;  %v2637_v10 = vld [vmem:[%s5630_s2 + $0xf8] sm:$0xf]  ;;  %v925_v53 = vsel %vm923_vm0, %v916_v41, 0  ;;  %v3172_v26 = vld [vmem:[%s5635_s7 + $0x228] sm:$0xf] }
  0x42   :  { %783 = vmatpush.bf16.msrb.mxu2 %v2706_v13  ;;  %v2733_v13 = vld [vmem:[%s5630_s2 + $0x1b8] sm:$0xf]  ;;  %v2638_v19 = vor.u32 %v3598_v11, %v2637_v10  ;;  %v3780_v10 = vld [vmem:[%s5635_s7 + $0x170] sm:$0xf0]  ;;  %v3755_v11 = vld [vmem:[%s5635_s7 + $0xac] sm:$0xf] }
  0x43   :  { %796 = vmatpush.bf16.msrb.mxu3 %v2802_v21  ;;  %758 = vmatmul.bf16.vlgmr.msrb.gmra.mxu0 %v4172_v56  ;;  %v3571_v21 = vld [vmem:[%s5630_s2 + $0x28] sm:$0xf0]  ;;  %v2956_v29 = vld [vmem:[%s5635_s7 + $0x78] sm:$0xf]  ;;  %v2944_v41 = vld [vmem:[%s5635_s7 + $0x60] sm:$0xf] }
  0x44   :  { %802 = vmatpush.bf16.msra.mxu0 %v2602_v14  ;;  %771 = vmatmul.bf16.vlgmr.msrb.gmra.mxu1 %v4174_v57  ;;  %v3622_v14 = vld [vmem:[%s5630_s2 + $0x1c0] sm:$0xf0]  ;;  %v2530_v31 = vor.u32 %v3571_v21, %v2529_v20  ;;  %v3777_v21 = vld [vmem:[%s5635_s7 + $0x158] sm:$0xf0]  ;;  %v3148_v50 = vld [vmem:[%s5635_s7 + $0x1f8] sm:$0xf] }
  0x45   :  { %815 = vmatpush.bf16.msra.mxu1 %v2698_v17  ;;  %784 = vmatmul.bf16.vlgmr.msrb.gmra.mxu2 %v4164_v51  ;;  %v2829_v17 = vld [vmem:[%s5630_s2 + $0x278] sm:$0xf]  ;;  %v2734_v22 = vor.u32 %v3622_v14, %v2733_v13 }
  0x46   :  { %828 = vmatpush.bf16.msra.mxu2 %v2794_v18  ;;  %797 = vmatmul.bf16.vlgmr.msrb.gmra.mxu3 %v4189_v63  ;;  %v3646_v18 = vld [vmem:[%s5630_s2 + $0x280] sm:$0xf0]  ;;  %v2982_v14 = vld [vmem:[%s5635_s7 + $0xb4] sm:$0xf0] }
  0x47   :  { %841 = vmatpush.bf16.msra.mxu3 %v2890_v24  ;;  %v3595_v24 = vld [vmem:[%s5630_s2 + $0xe8] sm:$0xf0] }
  0x48   :  { %803 = vmatpush.bf16.msra.mxu0 %v2590_v27  ;;  %v2830_v27 = vor.u32 %v3646_v18, %v2829_v17  ;;  %v2626_v34 = vor.u32 %v3595_v24, %v2625_v23  ;;  %v3753_v17 = vld [vmem:[%s5635_s7 + $0x98] sm:$0xf0]  ;;  %v3064_v18 = vld [vmem:[%s5635_s7 + $0x150] sm:$0xf]  ;;  %v2970_v23 = vld [vmem:[%s5635_s7 + $0x9c] sm:$0xf0] }
  0x49   :  { %816 = vmatpush.bf16.msra.mxu1 %v2686_v30  ;;  %v914_v30 = vunpack.c.h.b16 %v901_v15  ;;  %v2985_v15 = vor.u32 %v3755_v11, %v2982_v14  ;;  %v3065_v24 = vor.u32 %v3777_v21, %v3064_v18  ;;  %v3016_v11 = vld [vmem:[%s5635_s7 + $0xf0] sm:$0xf]  ;;  %v2908_v21 = vld [vmem:[%s5635_s7 + $0x18] sm:$0xf] }
  0x4a   :  { %829 = vmatpush.bf16.msra.mxu2 %v2782_v33  ;;  %v3643_v33 = vld [vmem:[%s5630_s2 + $0x268] sm:$0xf0] }
  0x4b   :  { %842 = vmatpush.bf16.msra.mxu3 %v2878_v36  ;;  %v3568_v36 = vld [vmem:[%s5630_s2 + $0x10] sm:$0xf0] }
  0x4c   :  { %804 = vmatpush.bf16.msra.mxu0 %v2578_v39  ;;  %v2613_v39 = vld [vmem:[%s5630_s2 + $0xc8] sm:$0xf]  ;;  %v2518_v46 = vor.u32 %v3568_v36, %v2517_v35 }
  0x4d   :  { %817 = vmatpush.bf16.msra.mxu1 %v2674_v42  ;;  %v2818_v42 = vor.u32 %v3643_v33, %v2817_v32  ;;  %v2614_v49 = vor.u32 %v3592_v40, %v2613_v39  ;;  %v3774_v33 = vld [vmem:[%s5635_s7 + $0x140] sm:$0xf0]  ;;  %v2958_v35 = vld [vmem:[%s5635_s7 + $0x84] sm:$0xf0]  ;;  %v3801_v39 = vld [vmem:[%s5635_s7 + $0x218] sm:$0xf0] }
  0x4e   :  { %830 = vmatpush.bf16.msra.mxu2 %v2770_v45  ;;  %v917_v45 = vpack.c.b16 %v914_v30, %v914_v30  ;;  %v3750_v30 = vld [vmem:[%s5635_s7 + $0x80] sm:$0xf0] }
  0x4f   :  { %843 = vmatpush.bf16.msra.mxu3 %v2866_v48  ;;  %v3640_v48 = vld [vmem:[%s5630_s2 + $0x250] sm:$0xf0]  ;;  %v2957_v32 = vor.u32 %v3750_v30, %v2956_v29  ;;  %v2910_v29 = vld [vmem:[%s5635_s7 + $0x24] sm:$0xf0] }
  0x50   :  { %805 = vmatpush.bf16.msra.mxu0 %v2566_v52  ;;  %v2710_v52 = vor.u32 %v3616_v44, %v2709_v43  ;;  %v2806_v54 = vor.u32 %v3640_v48, %v2805_v47  ;;  %v3040_v43 = vld [vmem:[%s5635_s7 + $0x120] sm:$0xf]  ;;  %v3746_v48 = vld [vmem:[%s5635_s7 + $0x64] sm:$0xf] }
  0x51   :  { %818 = vmatpush.bf16.msra.mxu1 %v2662_v55  ;;  %v928_v55 = vsel %vm923_vm0, %v917_v45, 0 }
  0x52   :  { %831 = vmatpush.bf16.msra.mxu2 %v2758_v60  ;;  %v900_v60 = vpack.c.bf16 %v899_v59, %v899_v59  ;;  %v3028_v59 = vld [vmem:[%s5635_s7 + $0x108] sm:$0xf] }
  0x53   :  { %844 = vmatpush.bf16.msra.mxu3 %v2854_v0 }
  0x54   :  { %806 = vmatpush.bf16.msra.mxu0 %v2554_v3 }
  0x55   :  { %819 = vmatpush.bf16.msra.mxu1 %v2650_v6  ;;  %v2980_v6 = vld [vmem:[%s5635_s7 + $0xa8] sm:$0xf] }
  0x56   :  { %832 = vmatpush.bf16.msra.mxu2 %v2746_v9  ;;  %v2981_v8 = vor.u32 %v3756_v7, %v2980_v6  ;;  %v3076_v9 = vld [vmem:[%s5635_s7 + $0x168] sm:$0xf] }
  0x57   :  { %845 = vmatpush.bf16.msra.mxu3 %v2842_v12  ;;  %v3077_v13 = vor.u32 %v3780_v10, %v3076_v9  ;;  %v3741_v9 = vld [vmem:[%s5635_s7 + $0x38] sm:$0xf0] }
  0x58   :  { %807 = vmatpush.bf16.msra.mxu0 %v2542_v16  ;;  %v2968_v16 = vld [vmem:[%s5635_s7 + $0x90] sm:$0xf] }
  0x59   :  { %820 = vmatpush.bf16.msra.mxu1 %v2638_v19  ;;  %v2969_v20 = vor.u32 %v3753_v17, %v2968_v16  ;;  %v3124_v16 = vld [vmem:[%s5635_s7 + $0x1c8] sm:$0xf]  ;;  %v3792_v17 = vld [vmem:[%s5635_s7 + $0x1d0] sm:$0xf0] }
  0x5a   :  { %833 = vmatpush.bf16.msra.mxu2 %v2734_v22  ;;  %v3752_v22 = vld [vmem:[%s5635_s7 + $0x94] sm:$0xf] }
  0x5b   :  { %846 = vmatpush.bf16.msra.mxu3 %v2830_v27  ;;  %v2973_v25 = vor.u32 %v3752_v22, %v2970_v23  ;;  %v3804_v27 = vld [vmem:[%s5635_s7 + $0x230] sm:$0xf0]  ;;  %v3738_v22 = vld [vmem:[%s5635_s7 + $0x20] sm:$0xf0]  ;;  %v3004_v23 = vld [vmem:[%s5635_s7 + $0xd8] sm:$0xf] }
  0x5c   :  { %808 = vmatpush.bf16.msra.mxu0 %v2530_v31  ;;  %v3173_v28 = vor.u32 %v3804_v27, %v3172_v26  ;;  %v3052_v31 = vld [vmem:[%s5635_s7 + $0x138] sm:$0xf]  ;;  %v2909_v26 = vor.u32 %v3738_v22, %v2908_v21  ;;  %v3762_v27 = vld [vmem:[%s5635_s7 + $0xe0] sm:$0xf0]  ;;  %v3775_v21 = vld [vmem:[%s5635_s7 + $0x148] sm:$0xf0] }
  0x5d   :  { %821 = vmatpush.bf16.msra.mxu1 %v2626_v34  ;;  %v3749_v34 = vld [vmem:[%s5635_s7 + $0x7c] sm:$0xf]  ;;  %v3053_v36 = vor.u32 %v3774_v33, %v3052_v31  ;;  %v3005_v31 = vor.u32 %v3762_v27, %v3004_v23  ;;  %v3112_v33 = vld [vmem:[%s5635_s7 + $0x1b0] sm:$0xf]  ;;  %v2976_v22 = vld [vmem:[%s5635_s7 + $0x98] sm:$0xf] }
  0x5e   :  { %834 = vmatpush.bf16.msra.mxu2 %v2722_v38  ;;  %v2961_v37 = vor.u32 %v3749_v34, %v2958_v35  ;;  %v3160_v38 = vld [vmem:[%s5635_s7 + $0x210] sm:$0xf]  ;;  %v3789_v34 = vld [vmem:[%s5635_s7 + $0x1b8] sm:$0xf0] }
  0x5f   :  { %847 = vmatpush.bf16.msra.mxu3 %v2818_v42  ;;  %v3161_v40 = vor.u32 %v3801_v39, %v3160_v38  ;;  %v3747_v42 = vld [vmem:[%s5635_s7 + $0x68] sm:$0xf0]  ;;  %v2896_v38 = vld [vmem:[%s5635_s7] sm:$0xf]  ;;  %v3042_v27 = vld [vmem:[%s5635_s7 + $0x12c] sm:$0xf0] }
  0x60   :  { %809 = vmatpush.bf16.msra.mxu0 %v2518_v46  ;;  %v2945_v45 = vor.u32 %v3747_v42, %v2944_v41  ;;  %v3771_v46 = vld [vmem:[%s5635_s7 + $0x128] sm:$0xf0] }
  0x61   :  { %822 = vmatpush.bf16.msra.mxu1 %v2614_v49  ;;  %v3041_v47 = vor.u32 %v3771_v46, %v3040_v43  ;;  %v2946_v49 = vld [vmem:[%s5635_s7 + $0x6c] sm:$0xf0]  ;;  %v3735_v39 = vld [vmem:[%s5635_s7 + $0x8] sm:$0xf0]  ;;  %v3734_v43 = vld [vmem:[%s5635_s7 + $0x4] sm:$0xf] }
  0x62   :  { %835 = vmatpush.bf16.msra.mxu2 %v2710_v52  ;;  %v2949_v52 = vor.u32 %v3746_v48, %v2946_v49  ;;  %v2897_v41 = vor.u32 %v3735_v39, %v2896_v38  ;;  %v3759_v42 = vld [vmem:[%s5635_s7 + $0xc8] sm:$0xf0]  ;;  %v3078_v48 = vld [vmem:[%s5635_s7 + $0x174] sm:$0xf0] }
  0x63   :  { %848 = vmatpush.bf16.msra.mxu3 %v2806_v54  ;;  %810 = vmatmul.bf16.vlgmr.msra.gmra.mxu0 %v4172_v56  ;;  %v4541_v56 = vld [vmem:[%s5634_s3] sm:$0x7]  ;;  %v3779_v46 = vld [vmem:[%s5635_s7 + $0x16c] sm:$0xf] }
  0x64   :  { %940 = vmatpush.bf16.msrb.mxu0 %v925_v53  ;;  %823 = vmatmul.bf16.vlgmr.msra.gmra.mxu1 %v4174_v57  ;;  %v170_v57 = vperm.slane %v4541_v56, 0  ;;  %v171_v44 = vperm.slane %v4541_v56, 1  ;;  %v3798_v53 = vld [vmem:[%s5635_s7 + $0x200] sm:$0xf0]  ;;  %v3767_v39 = vld [vmem:[%s5635_s7 + $0x10c] sm:$0xf] }
  0x65   :  { %953 = vmatpush.bf16.msrb.mxu1 %v928_v55  ;;  %836 = vmatmul.bf16.vlgmr.msra.gmra.mxu2 %v4164_v51  ;;  %v3149_v54 = vor.u32 %v3798_v53, %v3148_v50  ;;  %v2932_v55 = vld [vmem:[%s5635_s7 + $0x48] sm:$0xf]  ;;  %v3081_v50 = vor.u32 %v3779_v46, %v3078_v48  ;;  %v3174_v53 = vld [vmem:[%s5635_s7 + $0x234] sm:$0xf0]  ;;  %v3769_v46 = vld [vmem:[%s5635_s7 + $0x118] sm:$0xf0] }
  0x66   :  { %966 = vmatpush.bf16.msrb.mxu2 %v931_v58  ;;  %849 = vmatmul.bf16.vlgmr.msra.gmra.mxu3 %v4189_v63  ;;  %v3744_v58 = vld [vmem:[%s5635_s7 + $0x50] sm:$0xf0] }
  0x67   :  { %1593 = vmatpush.bf16.msrb.mxu3 %v2981_v8  ;;  %v2920_v8 = vld [vmem:[%s5635_s7 + $0x30] sm:$0xf] }
  0x68   :  { %1606 = vmatpush.bf16.msra.mxu0 %v3077_v13  ;;  %v2921_v10 = vor.u32 %v3741_v9, %v2920_v8  ;;  %v3740_v13 = vld [vmem:[%s5635_s7 + $0x34] sm:$0xf]  ;;  %v3088_v8 = vld [vmem:[%s5635_s7 + $0x180] sm:$0xf]  ;;  %v3783_v9 = vld [vmem:[%s5635_s7 + $0x188] sm:$0xf0] }
  0x69   :  { %1619 = vmatpush.bf16.msra.mxu1 %v3173_v28  ;;  %v3737_v28 = vld [vmem:[%s5635_s7 + $0x1c] sm:$0xf] }
  0x6a   :  { %1632 = vmatpush.bf16.msra.mxu2 %v2985_v15  ;;  %v2922_v15 = vld [vmem:[%s5635_s7 + $0x3c] sm:$0xf0] }
  0x6b   :  { %1594 = vmatpush.bf16.msrb.mxu3 %v2969_v20  ;;  %v2925_v18 = vor.u32 %v3740_v13, %v2922_v15  ;;  %v3773_v13 = vld [vmem:[%s5635_s7 + $0x13c] sm:$0xf]  ;;  %v3054_v15 = vld [vmem:[%s5635_s7 + $0x144] sm:$0xf0] }
  0x6c   :  { %1607 = vmatpush.bf16.msra.mxu0 %v3065_v24 }
  0x6d   :  { %1620 = vmatpush.bf16.msra.mxu1 %v3161_v40  ;;  %v2992_v40 = vld [vmem:[%s5635_s7 + $0xc0] sm:$0xf] }
  0x6e   :  { %1633 = vmatpush.bf16.msra.mxu2 %v2973_v25 }
  0x6f   :  { %1595 = vmatpush.bf16.msrb.mxu3 %v2957_v32  ;;  %v2913_v32 = vor.u32 %v3737_v28, %v2910_v29  ;;  %v3794_v28 = vld [vmem:[%s5635_s7 + $0x1e4] sm:$0xf] }
  0x70   :  { %1608 = vmatpush.bf16.msra.mxu0 %v3053_v36 }
  0x71   :  { %1621 = vmatpush.bf16.msra.mxu1 %v3149_v54  ;;  %v3084_v54 = vld [vmem:[%s5635_s7 + $0x170] sm:$0xf] }
  0x72   :  { %1634 = vmatpush.bf16.msra.mxu2 %v2961_v37  ;;  %v3113_v37 = vor.u32 %v3789_v34, %v3112_v33  ;;  %v3772_v33 = vld [vmem:[%s5635_s7 + $0x130] sm:$0xf0]  ;;  %v2964_v34 = vld [vmem:[%s5635_s7 + $0x80] sm:$0xf] }
  0x73   :  { %2891 = vmatmul.msk.bf16.vlgmr.msrb.gmra.mxu0 %vm919_vm1, %v900_v60  ;;  %1596 = vmatpush.bf16.msrb.mxu3 %v2945_v45  ;;  %v2898_v45 = vld [vmem:[%s5635_s7 + $0xc] sm:$0xf0] }
  0x74   :  { %2892 = vmatmul.msk.bf16.vlgmr.msrb.gmra.mxu1 %vm919_vm1, %v900_v60  ;;  %1609 = vmatpush.bf16.msra.mxu0 %v3041_v47  ;;  %v2901_v47 = vor.u32 %v3734_v43, %v2898_v45  ;;  %v3036_v45 = vld [vmem:[%s5635_s7 + $0x110] sm:$0xf] }
  0x75   :  { %2893 = vmatmul.msk.bf16.vlgmr.msrb.gmra.mxu2 %vm919_vm1, %v900_v60 }
  0x76   :  { %1635 = vmatpush.bf16.msra.mxu2 %v2949_v52  ;;  %v3803_v52 = vld [vmem:[%s5635_s7 + $0x22c] sm:$0xf] }
  0xa0   :  { %v707_v61 = vpop.f32.mrf.mxu0 }
  0xa1   :  { %v720_v51 = vpop.f32.mrf.mxu1  ;;  %v708_v62 = vadd.f32 %v707_v61, %v170_v57  ;;  %v2933_v57 = vor.u32 %v3744_v58, %v2932_v55  ;;  %v3768_v61 = vld [vmem:[%s5635_s7 + $0x110] sm:$0xf0]  ;;  %v3177_v55 = vor.u32 %v3803_v52, %v3174_v53  ;;  %v3781_v58 = vld [vmem:[%s5635_s7 + $0x178] sm:$0xf0]  ;;  %v3037_v52 = vor.u32 %v3769_v46, %v3036_v45 }
  0xa3   :  { %v721_v63 = vadd.f32 %v720_v51, %v708_v62  ;;  %v3743_v51 = vld [vmem:[%s5635_s7 + $0x4c] sm:$0xf]  ;;  %v2934_v62 = vld [vmem:[%s5635_s7 + $0x54] sm:$0xf0]  ;;  %1597 = vmatpush.bf16.msrb.mxu3 %v2933_v57 }
  0xa7   :  { %1598 = vmatpush.bf16.msrb.mxu3 %v2921_v10  ;;  %v2988_v10 = vld [vmem:[%s5635_s7 + $0xb0] sm:$0xf] }
  0xa8   :  { %v733_v0 = vpop.f32.mrf.mxu2  ;;  %v709_v3 = vpop.f32.mrf.mxu0 }
  0xa9   :  { %v734_v1 = vadd.f32 %v733_v0, %v721_v63  ;;  %v746_v2 = vpop.f32.mrf.mxu3  ;;  %v722_v5 = vpop.f32.mrf.mxu1  ;;  %v3029_v0 = vor.u32 %v3768_v61, %v3028_v59  ;;  %v3795_v3 = vld [vmem:[%s5635_s7 + $0x1e8] sm:$0xf0]  ;;  %v3100_v59 = vld [vmem:[%s5635_s7 + $0x198] sm:$0xf]  ;;  %v3085_v61 = vor.u32 %v3781_v58, %v3084_v54  ;;  %v3764_v54 = vld [vmem:[%s5635_s7 + $0xf4] sm:$0xf] }
  0xab   :  { %v4544_v4 = vadd.f32 %v746_v2, %v734_v1  ;;  %v2937_v1 = vor.u32 %v3743_v51, %v2934_v62  ;;  %v3136_v2 = vld [vmem:[%s5635_s7 + $0x1e0] sm:$0xf]  ;;  %1610 = vmatpush.bf16.msra.mxu0 %v3029_v0  ;;  %1599 = vmatpush.bf16.msrb.mxu3 %v2909_v26  ;;  %v3776_v62 = vld [vmem:[%s5635_s7 + $0x154] sm:$0xf]  ;;  %v3770_v26 = vld [vmem:[%s5635_s7 + $0x124] sm:$0xf] }
  0xac   :  { %v3137_v6 = vor.u32 %v3795_v3, %v3136_v2  ;;  %v3800_v0 = vld [vmem:[%s5635_s7 + $0x214] sm:$0xf]  ;;  %v3162_v2 = vld [vmem:[%s5635_s7 + $0x21c] sm:$0xf0]  ;;  %v3072_v3 = vld [vmem:[%s5635_s7 + $0x158] sm:$0xf]  ;;  %v3045_v29 = vor.u32 %v3770_v26, %v3042_v27 }
  0xad   :  { %1636 = vmatpush.bf16.msra.mxu2 %v2937_v1  ;;  %v3760_v26 = vld [vmem:[%s5635_s7 + $0xd0] sm:$0xf0]  ;;  %vm854_vm9 = vcmp.gt.f32.partialorder %v4544_v4, 20.0 }
  0xae   :  { %1622 = vmatpush.bf16.msra.mxu1 %v3137_v6  ;;  %v3165_v6 = vor.u32 %v3800_v0, %v3162_v2  ;;  %v3761_v2 = vld [vmem:[%s5635_s7 + $0xdc] sm:$0xf] }
  0xaf   :  { %1600 = vmatpush.bf16.msrb.mxu3 %v2897_v41  ;;  %v3791_v41 = vld [vmem:[%s5635_s7 + $0x1cc] sm:$0xf] }
  0xb0   :  { %v735_v12 = vpop.f32.mrf.mxu2 }
  0xb1   :  { %v748_v19 = vpop.f32.mrf.mxu3  ;;  %v3765_v12 = vld [vmem:[%s5635_s7 + $0xf8] sm:$0xf0]  ;;  %1637 = vmatpush.bf16.msra.mxu2 %v2925_v18  ;;  %v3057_v18 = vor.u32 %v3773_v13, %v3054_v15  ;;  %v2928_v15 = vld [vmem:[%s5635_s7 + $0x38] sm:$0xf] }
  0xb2   :  { %v3017_v14 = vor.u32 %v3765_v12, %v3016_v11  ;;  %v3125_v19 = vor.u32 %v3792_v17, %v3124_v16  ;;  %v3089_v11 = vor.u32 %v3783_v9, %v3088_v8  ;;  %v3757_v12 = vld [vmem:[%s5635_s7 + $0xb8] sm:$0xf0]  ;;  %v3150_v17 = vld [vmem:[%s5635_s7 + $0x204] sm:$0xf0] }
  0xb3   :  { %1645 = vmatpush.bf16.msra.mxu3 %v3081_v50  ;;  %v3797_v16 = vld [vmem:[%s5635_s7 + $0x1fc] sm:$0xf]  ;;  %v3748_v50 = vld [vmem:[%s5635_s7 + $0x70] sm:$0xf0]  ;;  %v3102_v9 = vld [vmem:[%s5635_s7 + $0x1a4] sm:$0xf0] }
  0xb4   :  { %1611 = vmatpush.bf16.msra.mxu0 %v3017_v14  ;;  %1623 = vmatpush.bf16.msra.mxu1 %v3125_v19  ;;  %v2989_v14 = vor.u32 %v3757_v12, %v2988_v10  ;;  %v3153_v19 = vor.u32 %v3797_v16, %v3150_v17  ;;  %v3012_v10 = vld [vmem:[%s5635_s7 + $0xe0] sm:$0xf]  ;;  %v3742_v16 = vld [vmem:[%s5635_s7 + $0x40] sm:$0xf0] }
  0xb5   :  { %1638 = vmatpush.bf16.msra.mxu2 %v2913_v32  ;;  %v3048_v32 = vld [vmem:[%s5635_s7 + $0x128] sm:$0xf]  ;;  %v903_v17 = vld [vmem:[%s5636_s5] sm:$0x7] }
  0xb6   :  { %v905_v27 = vperm.slane %v903_v17, 0 }
  0xb8   :  { %1612 = vmatpush.bf16.msra.mxu0 %v3005_v31  ;;  %1624 = vmatpush.bf16.msra.mxu1 %v3113_v37  ;;  %v3751_v37 = vld [vmem:[%s5635_s7 + $0x88] sm:$0xf0] }
  0xb9   :  { %1639 = vmatpush.bf16.msra.mxu2 %v2901_v47  ;;  %v2965_v38 = vor.u32 %v3751_v37, %v2964_v34 }
  0xbd   :  { %1684 = vmatpush.bf16.msrb.mxu2 %v3085_v61 }
  0xc0   :  { %v759_v60 = vpop.f32.mrf.mxu0 }
  0xc1   :  { %v760_v63 = vadd.f32 %v759_v60, %v171_v44  ;;  %v772_v5 = vpop.f32.mrf.mxu1  ;;  %v2993_v44 = vor.u32 %v3759_v42, %v2992_v40  ;;  %v3786_v60 = vld [vmem:[%s5635_s7 + $0x1a0] sm:$0xf0]  ;;  %v3030_v40 = vld [vmem:[%s5635_s7 + $0x114] sm:$0xf0] }
  0xc2   :  { %v3101_v51 = vor.u32 %v3786_v60, %v3100_v59  ;;  %v3033_v43 = vor.u32 %v3767_v39, %v3030_v40  ;;  %v3788_v59 = vld [vmem:[%s5635_s7 + $0x1b4] sm:$0xf]  ;;  %v3114_v60 = vld [vmem:[%s5635_s7 + $0x1bc] sm:$0xf0] }
  0xc3   :  { %v773_v7 = vadd.f32 %v772_v5, %v760_v63  ;;  %1613 = vmatpush.bf16.msra.mxu0 %v2993_v44  ;;  %v3066_v63 = vld [vmem:[%s5635_s7 + $0x15c] sm:$0xf0]  ;;  %v3778_v5 = vld [vmem:[%s5635_s7 + $0x160] sm:$0xf0]  ;;  %v3126_v44 = vld [vmem:[%s5635_s7 + $0x1d4] sm:$0xf0]  ;;  %v3117_v61 = vor.u32 %v3788_v59, %v3114_v60 }
  0xc4   :  { %v3069_v1 = vor.u32 %v3776_v62, %v3066_v63  ;;  %1625 = vmatpush.bf16.msra.mxu1 %v3101_v51  ;;  %v3129_v48 = vor.u32 %v3791_v41, %v3126_v44  ;;  %v3766_v51 = vld [vmem:[%s5635_s7 + $0x100] sm:$0xf0]  ;;  %v2940_v62 = vld [vmem:[%s5635_s7 + $0x50] sm:$0xf]  ;;  %v3745_v63 = vld [vmem:[%s5635_s7 + $0x58] sm:$0xf0] }
  0xc6   :  { %1646 = vmatpush.bf16.msra.mxu3 %v3069_v1  ;;  %v2941_v1 = vor.u32 %v3745_v63, %v2940_v62  ;;  %v857_v62 = vmin.f32 %v4544_v4, 20.0 }
  0xc7   :  { %1658 = vmatpush.bf16.msrb.mxu0 %v3177_v55  ;;  %v3018_v55 = vld [vmem:[%s5635_s7 + $0xfc] sm:$0xf0] }
  0xc8   :  { %v785_v20 = vpop.f32.mrf.mxu2  ;;  %v761_v25 = vpop.f32.mrf.mxu0  ;;  %1626 = vmatpush.bf16.msra.mxu1 %v3089_v11  ;;  %v3021_v58 = vor.u32 %v3764_v54, %v3018_v55  ;;  %v3763_v11 = vld [vmem:[%s5635_s7 + $0xe8] sm:$0xf0] }
  0xc9   :  { %v786_v24 = vadd.f32 %v785_v20, %v773_v7  ;;  %v798_v30 = vpop.f32.mrf.mxu3  ;;  %v774_v36 = vpop.f32.mrf.mxu1  ;;  %v3073_v7 = vor.u32 %v3778_v5, %v3072_v3  ;;  %v3060_v20 = vld [vmem:[%s5635_s7 + $0x140] sm:$0xf]  ;;  %v3006_v3 = vld [vmem:[%s5635_s7 + $0xe4] sm:$0xf0]  ;;  %v3785_v5 = vld [vmem:[%s5635_s7 + $0x19c] sm:$0xf] }
  0xca   :  { %v3061_v23 = vor.u32 %v3775_v21, %v3060_v20  ;;  %1647 = vmatpush.bf16.msra.mxu3 %v3057_v18  ;;  %v3049_v36 = vor.u32 %v3772_v33, %v3048_v32  ;;  %v3009_v8 = vor.u32 %v3761_v2, %v3006_v3  ;;  %v3013_v18 = vor.u32 %v3763_v11, %v3012_v10  ;;  %v3758_v20 = vld [vmem:[%s5635_s7 + $0xc4] sm:$0xf]  ;;  %v2994_v21 = vld [vmem:[%s5635_s7 + $0xcc] sm:$0xf0] }
  0xcb   :  { %v4709_v35 = vadd.f32 %v798_v30, %v786_v24  ;;  %1659 = vmatpush.bf16.msrb.mxu0 %v3165_v6  ;;  %1685 = vmatpush.bf16.msrb.mxu2 %v3073_v7  ;;  %v3754_v24 = vld [vmem:[%s5635_s7 + $0xa0] sm:$0xf0]  ;;  %v3138_v30 = vld [vmem:[%s5635_s7 + $0x1ec] sm:$0xf0]  ;;  %v172_v32 = vperm.slane %v4541_v56, 2 }
  0xcc   :  { %1671 = vmatpush.bf16.msrb.mxu1 %v2989_v14  ;;  %v2977_v25 = vor.u32 %v3754_v24, %v2976_v22  ;;  %v3141_v31 = vor.u32 %v3794_v28, %v3138_v30  ;;  %v3105_v14 = vor.u32 %v3785_v5, %v3102_v9  ;;  %v3782_v22 = vld [vmem:[%s5635_s7 + $0x184] sm:$0xf]  ;;  %v3090_v24 = vld [vmem:[%s5635_s7 + $0x18c] sm:$0xf0]  ;;  %v2904_v56 = vld [vmem:[%s5635_s7 + $0x8] sm:$0xf] }
  0xcd   :  { %v3093_v28 = vor.u32 %v3782_v22, %v3090_v24  ;;  %v860_v5 = vmul.f32 1.442695, %v857_v62  ;;  %v3678_v62 = vld [vmem:[%s5637_s6 + $0x80] sm:$0xf0]  ;;  %vm855_vm13 = vcmp.gt.f32.partialorder %v4709_v35, 20.0 }
  0xce   :  { %1648 = vmatpush.bf16.msra.mxu3 %v3045_v29  ;;  %v906_v29 = vperm.slane %v903_v17, 1 }
  0xcf   :  { %1660 = vmatpush.bf16.msrb.mxu0 %v3153_v19  ;;  %1686 = vmatpush.bf16.msrb.mxu2 %v3061_v23  ;;  %v2929_v19 = vor.u32 %v3742_v16, %v2928_v15  ;;  %v2997_v23 = vor.u32 %v3758_v20, %v2994_v21  ;;  %v3684_v20 = vld [vmem:[%s5637_s6 + $0xb0] sm:$0xf0]  ;;  %v3460_v21 = vld [vmem:[%s5637_s6 + $0x228] sm:$0xf] }
  0xd0   :  { %v787_v49 = vpop.f32.mrf.mxu2  ;;  %1672 = vmatpush.bf16.msrb.mxu1 %v2977_v25  ;;  %v3000_v25 = vld [vmem:[%s5635_s7 + $0xc8] sm:$0xf] }
  0xd1   :  { %v800_v57 = vpop.f32.mrf.mxu3  ;;  %v2952_v49 = vld [vmem:[%s5635_s7 + $0x68] sm:$0xf]  ;;  %v3001_v30 = vor.u32 %v3760_v26, %v3000_v25 }
  0xd2   :  { %v2953_v53 = vor.u32 %v3748_v50, %v2952_v49  ;;  %1649 = vmatpush.bf16.msra.mxu3 %v3033_v43  ;;  %v3024_v57 = vld [vmem:[%s5635_s7 + $0xf8] sm:$0xf]  ;;  %v3736_v43 = vld [vmem:[%s5635_s7 + $0x10] sm:$0xf0]  ;;  %v907_v50 = vperm.slane %v903_v17, 2 }
  0xd3   :  { %1661 = vmatpush.bf16.msrb.mxu0 %v3141_v31  ;;  %1687 = vmatpush.bf16.msrb.mxu2 %v3049_v36  ;;  %v3025_v0 = vor.u32 %v3766_v51, %v3024_v57  ;;  %v2916_v31 = vld [vmem:[%s5635_s7 + $0x20] sm:$0xf]  ;;  %v3739_v36 = vld [vmem:[%s5635_s7 + $0x28] sm:$0xf0]  ;;  %v2905_v45 = vor.u32 %v3736_v43, %v2904_v56  ;;  %v3802_v56 = vld [vmem:[%s5635_s7 + $0x220] sm:$0xf0] }
  0xd4   :  { %1673 = vmatpush.bf16.msrb.mxu1 %v2965_v38  ;;  %v2917_v39 = vor.u32 %v3739_v36, %v2916_v31 }
  0xd6   :  { %1650 = vmatpush.bf16.msra.mxu3 %v3021_v58 }
  0xd7   :  { %1662 = vmatpush.bf16.msrb.mxu0 %v3129_v48  ;;  %1688 = vmatpush.bf16.msrb.mxu2 %v3037_v52 }
  0xd8   :  { %1674 = vmatpush.bf16.msrb.mxu1 %v2953_v53 }
  0xda   :  { %1651 = vmatpush.bf16.msra.mxu3 %v3009_v8 }
  0xdb   :  { %1663 = vmatpush.bf16.msrb.mxu0 %v3117_v61  ;;  %1689 = vmatpush.bf16.msrb.mxu2 %v3025_v0 }
  0xdc   :  { %1675 = vmatpush.bf16.msrb.mxu1 %v2941_v1 }
  0xde   :  { %1652 = vmatpush.bf16.msra.mxu3 %v2997_v23 }
  0xdf   :  { %1664 = vmatpush.bf16.msrb.mxu0 %v3105_v14  ;;  %1690 = vmatpush.bf16.msrb.mxu2 %v3013_v18  ;;  %v3805_v14 = vld [vmem:[%s5635_s7 + $0x238] sm:$0xf0] }
  0xe0   :  { %v4840_v42 = vpop.f32.mrf.mxu0  ;;  %1676 = vmatpush.bf16.msrb.mxu1 %v2929_v19  ;;  %v3268_v19 = vld [vmem:[%s5637_s6 + $0xa8] sm:$0xf] }
  0xe1   :  { %v4851_v47 = vpop.f32.mrf.mxu1  ;;  %v812_v46 = vadd.f32 %v4840_v42, %v172_v32 }
  0xe3   :  { %1665 = vmatpush.bf16.msrb.mxu0 %v3093_v28  ;;  %1691 = vmatpush.bf16.msrb.mxu2 %v3001_v30  ;;  %v825_v53 = vadd.f32 %v4851_v47, %v812_v46  ;;  %v3729_v46 = vld [vmem:[%s5637_s6 + $0x218] sm:$0xf0] }
  0xe4   :  { %1677 = vmatpush.bf16.msrb.mxu1 %v2917_v39 }
  0xe8   :  { %v4892_v6 = vpop.f32.mrf.mxu2  ;;  %v813_v7 = vpop.f32.mrf.mxu0  ;;  %1678 = vmatpush.bf16.msrb.mxu1 %v2905_v45  ;;  %v3448_v45 = vld [vmem:[%s5637_s6 + $0x210] sm:$0xf] }
  0xe9   :  { %v826_v12 = vpop.f32.mrf.mxu1  ;;  %v850_v13 = vpop.f32.mrf.mxu3  ;;  %v838_v60 = vadd.f32 %v4892_v6, %v825_v53 }
  0xea   :  { %v858_v12 = vmin.f32 %v4709_v35, 20.0 }
  0xeb   :  { %v4956_v63 = vadd.f32 %v850_v13, %v838_v60  ;;  %v3180_v13 = vld [vmem:[%s5635_s7 + $0x230] sm:$0xf]  ;;  %v3799_v60 = vld [vmem:[%s5635_s7 + $0x208] sm:$0xf0] }
  0xec   :  { %v3181_v30 = vor.u32 %v3805_v14, %v3180_v13  ;;  %v3796_v13 = vld [vmem:[%s5635_s7 + $0x1f0] sm:$0xf0]  ;;  %v3232_v14 = vld [vmem:[%s5637_s6 + $0x60] sm:$0xf] }
  0xed   :  { %v859_v6 = vmin.f32 %v4956_v63, 20.0  ;;  %vm856_vm11 = vcmp.gt.f32.partialorder %v4956_v63, 20.0 }
  0xef   :  { %v864_v23 = vmul.f32 1.442695, %v859_v6 }
  0xf0   :  { %v839_v33 = vpop.f32.mrf.mxu2  ;;  %v942_v34 = vpop.f32.mrf.mxu0 }
  0xf1   :  { %v4937_v37 = vadd.f32 %v942_v34, %v905_v27  ;;  %v955_v38 = vpop.f32.mrf.mxu1  ;;  %v852_v40 = vpop.f32.mrf.mxu3  ;;  %v3732_v27 = vld [vmem:[%s5637_s6 + $0x230] sm:$0xf0] }
  0xf2   :  { %v4939_v41 = vadd.f32 %v955_v38, %v906_v29  ;;  %v3269_v38 = vor.u32 %v3684_v20, %v3268_v19  ;;  %v3461_v39 = vor.u32 %v3732_v27, %v3460_v21  ;;  %v3168_v40 = vld [vmem:[%s5635_s7 + $0x218] sm:$0xf]  ;;  %v3702_v27 = vld [vmem:[%s5637_s6 + $0x140] sm:$0xf0] }
  0xf3   :  { %v975_v44 = vmin.f32 %v4937_v37, 20.0  ;;  %vm972_vm4 = vcmp.gt.f32.partialorder %v4937_v37, 20.0 }
  0xf4   :  { %v976_v48 = vmin.f32 %v4939_v41, 20.0  ;;  %vm973_vm5 = vcmp.gt.f32.partialorder %v4939_v41, 20.0 }
  0xf5   :  { %v978_v49 = vmul.f32 1.442695, %v975_v44 }
  0xf6   :  { %v980_v52 = vmul.f32 1.442695, %v976_v48  ;;  %v862_v48 = vmul.f32 1.442695, %v858_v12 }
  0xf7   :  { %3831 = vpow2.f32 %v978_v49 }
  0xf8   :  { %3833 = vpow2.f32 %v980_v52  ;;  %v968_v54 = vpop.f32.mrf.mxu2  ;;  %v944_v55 = vpop.f32.mrf.mxu0  ;;  %v3708_v52 = vld [vmem:[%s5637_s6 + $0x170] sm:$0xf0] }
  0xf9   :  { %v4951_v58 = vadd.f32 %v968_v54, %v907_v50  ;;  %v957_v59 = vpop.f32.mrf.mxu1  ;;  %v3364_v50 = vld [vmem:[%s5637_s6 + $0x168] sm:$0xf]  ;;  %v3169_v55 = vor.u32 %v3802_v56, %v3168_v40  ;;  %v3208_v54 = vld [vmem:[%s5637_s6 + $0x30] sm:$0xf] }
  0xfa   :  { %v3156_v59 = vld [vmem:[%s5635_s7 + $0x200] sm:$0xf] }
  0xfb   :  { %v977_v57 = vmin.f32 %v4951_v58, 20.0  ;;  %vm974_vm7 = vcmp.gt.f32.partialorder %v4951_v58, 20.0  ;;  %v3157_v6 = vor.u32 %v3799_v60, %v3156_v59  ;;  %v3400_v60 = vld [vmem:[%s5637_s6 + $0x1b0] sm:$0xf] }
  0xfd   :  { %v3832_v42 = vpop.eup %3831  ;;  %v982_v61 = vmul.f32 1.442695, %v977_v57 }
  0xfe   :  { %v3834_v51 = vpop.eup %3833  ;;  %v984_v0 = vadd.f32 1.0, %v3832_v42  ;;  %v987_v1 = vmul.f32 -0.5, %v3832_v42  ;;  %v990_v10 = vand.u32 2147483647, %v3832_v42 }
  0xff   :  { %v993_v47 = vadd.f32 1.0, %v3834_v51  ;;  %v996_v2 = vmul.f32 -0.5, %v3834_v51  ;;  %3835 = vpow2.f32 %v982_v61  ;;  %v999_v9 = vand.u32 2147483647, %v3834_v51 }
 0x100   :  { %3837 = vlog2.f32 %v984_v0  ;;  %v970_v3 = vpop.f32.mrf.mxu2  ;;  %v988_v8 = vadd.f32 1.0, %v987_v1  ;;  %vm991_vm3 = vcmp.lt.f32.partialorder %v990_v10, 0.0004427343  ;;  %v3449_v61 = vor.u32 %v3729_v46, %v3448_v45  ;;  %v3436_v0 = vld [vmem:[%s5637_s6 + $0x1f8] sm:$0xf] }
 0x101   :  { %3839 = vlog2.f32 %v993_v47  ;;  %v997_v7 = vadd.f32 1.0, %v996_v2  ;;  %vm1000_vm2 = vcmp.lt.f32.partialorder %v999_v9, 0.0004427343  ;;  %v3726_v1 = vld [vmem:[%s5637_s6 + $0x200] sm:$0xf0] }
 0x102   :  { %3841 = vpow2.f32 %v860_v5  ;;  %v989_v25 = vmul.f32 %v3832_v42, %v988_v8  ;;  %v3352_v8 = vld [vmem:[%s5637_s6 + $0x150] sm:$0xf]  ;;  %v3705_v9 = vld [vmem:[%s5637_s6 + $0x158] sm:$0xf0]  ;;  %v3437_v12 = vor.u32 %v3726_v1, %v3436_v0 }
 0x103   :  { %v998_v16 = vmul.f32 %v3834_v51, %v997_v7  ;;  %v3244_v51 = vld [vmem:[%s5637_s6 + $0x78] sm:$0xf]  ;;  %v3365_v7 = vor.u32 %v3708_v52, %v3364_v50  ;;  %v3353_v21 = vor.u32 %v3705_v9, %v3352_v8  ;;  %v3666_v9 = vld [vmem:[%s5637_s6 + $0x20] sm:$0xf0] }
 0x104   :  { %v3120_v50 = vld [vmem:[%s5635_s7 + $0x1b8] sm:$0xf] }
 0x105   :  { %v3836_v11 = vpop.eup %3835  ;;  %v3196_v8 = vld [vmem:[%s5637_s6 + $0x18] sm:$0xf] }
 0x106   :  { %v3838_v15 = vpop.eup %3837  ;;  %v1002_v17 = vadd.f32 1.0, %v3836_v11  ;;  %v1005_v18 = vmul.f32 -0.5, %v3836_v11  ;;  %v1008_v33 = vand.u32 2147483647, %v3836_v11 }
 0x107   :  { %v3840_v22 = vpop.eup %3839  ;;  %v986_v24 = vmul.f32 0.6931472, %v3838_v15  ;;  %v3675_v15 = vld [vmem:[%s5637_s6 + $0x68] sm:$0xf0] }
 0x108   :  { %v995_v26 = vmul.f32 0.6931472, %v3840_v22  ;;  %3843 = vlog2.f32 %v1002_v17  ;;  %v1006_v29 = vadd.f32 1.0, %v1005_v18  ;;  %v4993_v43 = vpop.eup %3841  ;;  %vm5014_vm6 = vcmp.lt.f32.partialorder %v1008_v33, 0.0004427343 }
 0x109   :  { %v992_v28 = vsel %vm991_vm3, %v989_v25, %v986_v24  ;;  %3845 = vpow2.f32 %v864_v23  ;;  %v866_v47 = vadd.f32 1.0, %v4993_v43  ;;  %v3723_v17 = vld [vmem:[%s5637_s6 + $0x1e8] sm:$0xf0]  ;;  %v869_v18 = vmul.f32 -0.5, %v4993_v43  ;;  %v3412_v33 = vld [vmem:[%s5637_s6 + $0x1c8] sm:$0xf] }
 0x10a   :  { %v1011_v31 = vsel %vm972_vm4, %v4937_v37, %v992_v28  ;;  %v1001_v32 = vsel %vm1000_vm2, %v998_v16, %v995_v26  ;;  %v3256_v37 = vld [vmem:[%s5637_s6 + $0x90] sm:$0xf]  ;;  %v1007_v49 = vmul.f32 %v3836_v11, %v1006_v29  ;;  %3847 = vpow2.f32 %v862_v48  ;;  %v3424_v16 = vld [vmem:[%s5637_s6 + $0x1e0] sm:$0xf]  ;;  %v3340_v26 = vld [vmem:[%s5637_s6 + $0x138] sm:$0xf] }
 0x10b   :  { %v4981_v34 = vpack.c.bf16 %v1011_v31, %v1011_v31  ;;  %v1012_v36 = vsel %vm973_vm5, %v4939_v41, %v1001_v32  ;;  %v3681_v41 = vld [vmem:[%s5637_s6 + $0x98] sm:$0xf0]  ;;  %v3245_v11 = vor.u32 %v3678_v62, %v3244_v51  ;;  %3849 = vlog2.f32 %v866_v47  ;;  %v3132_v28 = vld [vmem:[%s5635_s7 + $0x1d0] sm:$0xf]  ;;  %v3672_v31 = vld [vmem:[%s5637_s6 + $0x50] sm:$0xf0] }
 0x10c   :  { %v4995_v44 = vpack.c.bf16 %v1012_v36, %v1012_v36  ;;  %v3257_v42 = vor.u32 %v3681_v41, %v3256_v37  ;;  %v872_v20 = vand.u32 2147483647, %v4993_v43  ;;  %v3233_v24 = vor.u32 %v3675_v15, %v3232_v14  ;;  %v3793_v29 = vld [vmem:[%s5635_s7 + $0x1d8] sm:$0xf0]  ;;  %v3720_v36 = vld [vmem:[%s5637_s6 + $0x1d0] sm:$0xf0] }
 0x10d   :  { %1601 = vmatmul.bf16.vlgmr.msrb.gmra.mxu3 %v4981_v34  ;;  %1640 = vmatmul.bf16.vlgmr.msra.gmra.mxu2 %v4981_v34  ;;  %v3425_v25 = vor.u32 %v3723_v17, %v3424_v16  ;;  %v870_v32 = vadd.f32 1.0, %v869_v18  ;;  %v3341_v56 = vor.u32 %v3702_v27, %v3340_v26  ;;  %v3133_v45 = vor.u32 %v3793_v29, %v3132_v28  ;;  %v3328_v48 = vld [vmem:[%s5637_s6 + $0x120] sm:$0xf]  ;;  %v3316_v47 = vld [vmem:[%s5637_s6 + $0x108] sm:$0xf] }
 0x10e   :  { %v3844_v53 = vpop.eup %3843  ;;  %1614 = vmatmul.bf16.vlgmr.msra.gmra.mxu0 %v4995_v44  ;;  %1697 = vmatpush.bf16.msrb.mxu3 %v3181_v30  ;;  %v3220_v30 = vld [vmem:[%s5637_s6 + $0x48] sm:$0xf]  ;;  %vm5103_vm8 = vcmp.lt.f32.partialorder %v872_v20, 0.0004427343  ;;  %v3413_v52 = vor.u32 %v3720_v36, %v3412_v33  ;;  %v3304_v16 = vld [vmem:[%s5637_s6 + $0xf0] sm:$0xf] }
 0x10f   :  { %v1004_v57 = vmul.f32 0.6931472, %v3844_v53  ;;  %2094 = vmatpush.bf16.msra.mxu0 %v3269_v38  ;;  %2120 = vmatpush.bf16.msra.mxu2 %v3461_v39  ;;  %v5041_v3 = vpop.eup %3845  ;;  %v3221_v46 = vor.u32 %v3672_v31, %v3220_v30  ;;  %v3790_v53 = vld [vmem:[%s5635_s7 + $0x1c0] sm:$0xf0]  ;;  %v3693_v17 = vld [vmem:[%s5637_s6 + $0xf8] sm:$0xf0] }
 0x110   :  { %v884_v19 = vadd.f32 1.0, %v5041_v3  ;;  %v5074_v23 = vpop.eup %3847  ;;  %v887_v40 = vmul.f32 -0.5, %v5041_v3  ;;  %v890_v59 = vand.u32 2147483647, %v5041_v3  ;;  %v3121_v0 = vor.u32 %v3790_v53, %v3120_v50  ;;  %v3096_v20 = vld [vmem:[%s5635_s7 + $0x188] sm:$0xf] }
 0x111   :  { %v1010_v2 = vsel %vm5014_vm6, %v1007_v49, %v1004_v57  ;;  %v875_v38 = vadd.f32 1.0, %v5074_v23  ;;  %v878_v39 = vmul.f32 -0.5, %v5074_v23  ;;  %v3850_v37 = vpop.eup %3849  ;;  %v3699_v49 = vld [vmem:[%s5637_s6 + $0x128] sm:$0xf0]  ;;  %v3717_v57 = vld [vmem:[%s5637_s6 + $0x1b8] sm:$0xf0] }
 0x112   :  { %v1013_v5 = vsel %vm974_vm7, %v4951_v58, %v1010_v2  ;;  %1698 = vmatpush.bf16.msrb.mxu3 %v3169_v55  ;;  %v3144_v58 = vld [vmem:[%s5635_s7 + $0x1e8] sm:$0xf]  ;;  %3851 = vlog2.f32 %v884_v19  ;;  %v3669_v55 = vld [vmem:[%s5637_s6 + $0x38] sm:$0xf0]  ;;  %v888_v51 = vadd.f32 1.0, %v887_v40  ;;  %v3329_v62 = vor.u32 %v3699_v49, %v3328_v48 }
 0x113   :  { %v5050_v10 = vpack.c.bf16 %v1013_v5, %v1013_v5  ;;  %2095 = vmatpush.bf16.msra.mxu0 %v3257_v42  ;;  %2121 = vmatpush.bf16.msra.mxu2 %v3449_v61  ;;  %v3145_v22 = vor.u32 %v3796_v13, %v3144_v58  ;;  %v5135_v42 = vmul.f32 0.6931472, %v3850_v37  ;;  %v5137_v61 = vadd.f32 1.0, %v878_v39  ;;  %v3696_v2 = vld [vmem:[%s5637_s6 + $0x110] sm:$0xf0] }
 0x114   :  { %3853 = vlog2.f32 %v875_v38  ;;  %v3209_v1 = vor.u32 %v3669_v55, %v3208_v54  ;;  %v3108_v5 = vld [vmem:[%s5635_s7 + $0x1a0] sm:$0xf]  ;;  %vm5158_vm10 = vcmp.lt.f32.partialorder %v890_v59, 0.0004427343  ;;  %v3714_v58 = vld [vmem:[%s5637_s6 + $0x1a0] sm:$0xf0]  ;;  %v871_v13 = vmul.f32 %v4993_v43, %v870_v32 }
 0x115   :  { %1627 = vmatmul.bf16.vlgmr.msra.gmra.mxu1 %v5050_v10  ;;  %v3317_v15 = vor.u32 %v3696_v2, %v3316_v47  ;;  %v3197_v19 = vor.u32 %v3666_v9, %v3196_v8  ;;  %v3784_v43 = vld [vmem:[%s5635_s7 + $0x190] sm:$0xf0]  ;;  %v3711_v26 = vld [vmem:[%s5637_s6 + $0x188] sm:$0xf0]  ;;  %v889_v28 = vmul.f32 %v5041_v3, %v888_v51  ;;  %v3270_v30 = vld [vmem:[%s5637_s6 + $0xb4] sm:$0xf0]  ;;  %v3305_v3 = vor.u32 %v3693_v17, %v3304_v16 }
 0x116   :  { %2107 = vmatpush.bf16.msra.mxu1 %v3365_v7  ;;  %1699 = vmatpush.bf16.msrb.mxu3 %v3157_v6  ;;  %v3401_v7 = vor.u32 %v3717_v57, %v3400_v60  ;;  %v3787_v6 = vld [vmem:[%s5635_s7 + $0x1a8] sm:$0xf0]  ;;  %v874_v32 = vsel %vm5103_vm8, %v871_v13, %v5135_v42  ;;  %v3276_v33 = vld [vmem:[%s5637_s6 + $0xb0] sm:$0xf]  ;;  %v3685_v36 = vld [vmem:[%s5637_s6 + $0xb8] sm:$0xf0]  ;;  %v3097_v40 = vor.u32 %v3784_v43, %v3096_v20 }
 0x117   :  { %2096 = vmatpush.bf16.msra.mxu0 %v3245_v11  ;;  %2122 = vmatpush.bf16.msra.mxu2 %v3437_v12  ;;  %v3388_v12 = vld [vmem:[%s5637_s6 + $0x198] sm:$0xf]  ;;  %v3109_v18 = vor.u32 %v3787_v6, %v3108_v5  ;;  %v3683_v29 = vld [vmem:[%s5637_s6 + $0xac] sm:$0xf]  ;;  %v881_v38 = vand.u32 2147483647, %v5074_v23  ;;  %v893_v49 = vsel %vm854_vm9, %v4544_v4, %v874_v32  ;;  %v880_v59 = vmul.f32 %v5074_v23, %v5137_v61 }
 0x118   :  { %v3707_v31 = vld [vmem:[%s5637_s6 + $0x16c] sm:$0xf]  ;;  %v3292_v37 = vld [vmem:[%s5637_s6 + $0xd8] sm:$0xf]  ;;  %v3690_v41 = vld [vmem:[%s5637_s6 + $0xe0] sm:$0xf0]  ;;  %v3273_v48 = vor.u32 %v3683_v29, %v3270_v30  ;;  %v5260_v61 = vpack.c.bf16 %v893_v49, %v893_v49 }
 0x119   :  { %v3680_v53 = vld [vmem:[%s5637_s6 + $0x94] sm:$0xf]  ;;  %v3258_v54 = vld [vmem:[%s5637_s6 + $0x9c] sm:$0xf0]  ;;  %v3293_v4 = vor.u32 %v3690_v41, %v3292_v37  ;;  %v3264_v42 = vld [vmem:[%s5637_s6 + $0x98] sm:$0xf] }
 0x11a   :  { %2108 = vmatpush.bf16.msra.mxu1 %v3353_v21  ;;  %1700 = vmatpush.bf16.msrb.mxu3 %v3145_v22  ;;  %v3184_v21 = vld [vmem:[%s5637_s6] sm:$0xf]  ;;  %v3389_v22 = vor.u32 %v3714_v58, %v3388_v12  ;;  %v3704_v55 = vld [vmem:[%s5637_s6 + $0x154] sm:$0xf]  ;;  %v3682_v51 = vld [vmem:[%s5637_s6 + $0xa0] sm:$0xf0] }
 0x11b   :  { %2097 = vmatpush.bf16.msra.mxu0 %v3233_v24  ;;  %2123 = vmatpush.bf16.msra.mxu2 %v3425_v25  ;;  %v3663_v24 = vld [vmem:[%s5637_s6 + $0x8] sm:$0xf0]  ;;  %v3376_v25 = vld [vmem:[%s5637_s6 + $0x180] sm:$0xf]  ;;  %vm5250_vm12 = vcmp.lt.f32.partialorder %v881_v38, 0.0004427343  ;;  %v3265_v5 = vor.u32 %v3682_v51, %v3264_v42 }
 0x11c   :  { %v3354_v57 = vld [vmem:[%s5637_s6 + $0x15c] sm:$0xf0]  ;;  %v3687_v23 = vld [vmem:[%s5637_s6 + $0xc8] sm:$0xf0]  ;;  %v3246_v6 = vld [vmem:[%s5637_s6 + $0x84] sm:$0xf0] }
 0x11d   :  { %1653 = vmatmul.bf16.vlgmr.msra.gmra.mxu3 %v4995_v44  ;;  %1692 = vmatmul.bf16.vlgmr.msrb.gmra.mxu2 %v4995_v44  ;;  %v3852_v44 = vpop.eup %3851  ;;  %v3357_v2 = vor.u32 %v3704_v55, %v3354_v57  ;;  %v3701_v8 = vld [vmem:[%s5637_s6 + $0x13c] sm:$0xf]  ;;  %v3342_v12 = vld [vmem:[%s5637_s6 + $0x144] sm:$0xf0]  ;;  %v3252_v58 = vld [vmem:[%s5637_s6 + $0x80] sm:$0xf] }
 0x11e   :  { %2109 = vmatpush.bf16.msra.mxu1 %v3341_v56  ;;  %1666 = vmatmul.bf16.vlgmr.msrb.gmra.mxu0 %v5050_v10  ;;  %v886_v14 = vmul.f32 0.6931472, %v3852_v44  ;;  %v3854_v27 = vpop.eup %3853  ;;  %v3185_v56 = vor.u32 %v3663_v24, %v3184_v21  ;;  %v3261_v44 = vor.u32 %v3680_v53, %v3258_v54  ;;  %v3679_v13 = vld [vmem:[%s5637_s6 + $0x88] sm:$0xf0]  ;;  %v3450_v16 = vld [vmem:[%s5637_s6 + $0x21c] sm:$0xf0] }
 0x11f   :  { %1701 = vmatpush.bf16.msrb.mxu3 %v3133_v45  ;;  %2098 = vmatpush.bf16.msra.mxu0 %v3221_v46  ;;  %v877_v45 = vmul.f32 0.6931472, %v3854_v27  ;;  %v3377_v46 = vor.u32 %v3711_v26, %v3376_v25  ;;  %v3674_v20 = vld [vmem:[%s5637_s6 + $0x64] sm:$0xf]  ;;  %v3234_v43 = vld [vmem:[%s5637_s6 + $0x6c] sm:$0xf0] }
 0x120   :  { %2124 = vmatpush.bf16.msra.mxu2 %v3413_v52  ;;  %v892_v39 = vsel %vm5158_vm10, %v889_v28, %v886_v14  ;;  %v3277_v52 = vor.u32 %v3685_v36, %v3276_v33  ;;  %v3698_v21 = vld [vmem:[%s5637_s6 + $0x124] sm:$0xf]  ;;  %v3676_v24 = vld [vmem:[%s5637_s6 + $0x70] sm:$0xf0]  ;;  %v3237_v27 = vor.u32 %v3674_v20, %v3234_v43  ;;  %v3725_v28 = vld [vmem:[%s5637_s6 + $0x1fc] sm:$0xf] }
 0x121   :  { %v895_v60 = vsel %vm856_vm11, %v4956_v63, %v892_v39  ;;  %v3280_v63 = vld [vmem:[%s5637_s6 + $0xc0] sm:$0xf]  ;;  %v883_v9 = vsel %vm5250_vm12, %v880_v59, %v877_v45  ;;  %v3438_v29 = vld [vmem:[%s5637_s6 + $0x204] sm:$0xf0]  ;;  %v3671_v32 = vld [vmem:[%s5637_s6 + $0x4c] sm:$0xf] }
 0x122   :  { %2110 = vmatpush.bf16.msra.mxu1 %v3329_v62  ;;  %v5268_v47 = vpack.c.bf16 %v895_v60, %v895_v60  ;;  %v3281_v11 = vor.u32 %v3687_v23, %v3280_v63  ;;  %v894_v17 = vsel %vm855_vm13, %v4709_v35, %v883_v9  ;;  %v3330_v35 = vld [vmem:[%s5637_s6 + $0x12c] sm:$0xf0]  ;;  %v3318_v33 = vld [vmem:[%s5637_s6 + $0x114] sm:$0xf0]  ;;  %v3673_v38 = vld [vmem:[%s5637_s6 + $0x58] sm:$0xf0]  ;;  %v3441_v39 = vor.u32 %v3725_v28, %v3438_v29 }
 0x123   :  { %1702 = vmatpush.bf16.msrb.mxu3 %v3121_v0  ;;  %2099 = vmatpush.bf16.msra.mxu0 %v3209_v1  ;;  %v3731_v0 = vld [vmem:[%s5637_s6 + $0x22c] sm:$0xf]  ;;  %v3462_v1 = vld [vmem:[%s5637_s6 + $0x234] sm:$0xf0]  ;;  %v5319_v26 = vpack.c.bf16 %v894_v17, %v894_v17  ;;  %v3333_v30 = vor.u32 %v3698_v21, %v3330_v35  ;;  %v3228_v36 = vld [vmem:[%s5637_s6 + $0x50] sm:$0xf] }
 0x124   :  { %2125 = vmatpush.bf16.msra.mxu2 %v3401_v7  ;;  %v3677_v7 = vld [vmem:[%s5637_s6 + $0x7c] sm:$0xf]  ;;  %v3465_v14 = vor.u32 %v3731_v0, %v3462_v1  ;;  %v3426_v37 = vld [vmem:[%s5637_s6 + $0x1ec] sm:$0xf0]  ;;  %v3229_v45 = vor.u32 %v3673_v38, %v3228_v36  ;;  %v3692_v49 = vld [vmem:[%s5637_s6 + $0xf4] sm:$0xf] }
 0x125   :  { %1679 = vmatmul.bf16.vlgmr.msrb.gmra.mxu1 %v4981_v34  ;;  %v3366_v34 = vld [vmem:[%s5637_s6 + $0x174] sm:$0xf0]  ;;  %v3670_v53 = vld [vmem:[%s5637_s6 + $0x40] sm:$0xf0]  ;;  %v3719_v59 = vld [vmem:[%s5637_s6 + $0x1cc] sm:$0xf] }
 0x126   :  { %2111 = vmatpush.bf16.msra.mxu1 %v3317_v15  ;;  %v3369_v50 = vor.u32 %v3707_v31, %v3366_v34  ;;  %v3728_v15 = vld [vmem:[%s5637_s6 + $0x214] sm:$0xf]  ;;  %v3695_v34 = vld [vmem:[%s5637_s6 + $0x10c] sm:$0xf]  ;;  %v3414_v60 = vld [vmem:[%s5637_s6 + $0x1d4] sm:$0xf0] }
 0x127   :  { %1703 = vmatpush.bf16.msrb.mxu3 %v3109_v18  ;;  %2100 = vmatpush.bf16.msra.mxu0 %v3197_v19  ;;  %v3345_v18 = vor.u32 %v3701_v8, %v3342_v12  ;;  %v3253_v19 = vor.u32 %v3679_v13, %v3252_v58  ;;  %v3453_v25 = vor.u32 %v3728_v15, %v3450_v16  ;;  %v3665_v42 = vld [vmem:[%s5637_s6 + $0x1c] sm:$0xf]  ;;  %v3198_v51 = vld [vmem:[%s5637_s6 + $0x24] sm:$0xf0]  ;;  %v3204_v23 = vld [vmem:[%s5637_s6 + $0x20] sm:$0xf] }
 0x128   :  { %2126 = vmatpush.bf16.msra.mxu2 %v3389_v22  ;;  %v3240_v22 = vld [vmem:[%s5637_s6 + $0x68] sm:$0xf]  ;;  %v3321_v41 = vor.u32 %v3695_v34, %v3318_v33  ;;  %v3689_v62 = vld [vmem:[%s5637_s6 + $0xdc] sm:$0xf]  ;;  %v3417_v0 = vor.u32 %v3719_v59, %v3414_v60  ;;  %v3201_v1 = vor.u32 %v3665_v42, %v3198_v51  ;;  %v3186_v9 = vld [vmem:[%s5637_s6 + $0xc] sm:$0xf0] }
 0x129   :  { %v3241_v31 = vor.u32 %v3676_v24, %v3240_v22  ;;  %v3294_v63 = vld [vmem:[%s5637_s6 + $0xe4] sm:$0xf0]  ;;  %v3282_v12 = vld [vmem:[%s5637_s6 + $0xcc] sm:$0xf0]  ;;  %v3664_v13 = vld [vmem:[%s5637_s6 + $0x10] sm:$0xf0] }
 0x12a   :  { %2112 = vmatpush.bf16.msra.mxu1 %v3305_v3  ;;  %v3222_v3 = vld [vmem:[%s5637_s6 + $0x54] sm:$0xf0]  ;;  %v3192_v58 = vld [vmem:[%s5637_s6 + $0x8] sm:$0xf]  ;;  %v3709_v15 = vld [vmem:[%s5637_s6 + $0x178] sm:$0xf0] }
 0x12b   :  { %1704 = vmatpush.bf16.msrb.mxu3 %v3097_v40  ;;  %2101 = vmatpush.bf16.msra.mxu0 %v3185_v56  ;;  %v3225_v40 = vor.u32 %v3671_v32, %v3222_v3  ;;  %v3722_v56 = vld [vmem:[%s5637_s6 + $0x1e4] sm:$0xf]  ;;  %v3468_v16 = vld [vmem:[%s5637_s6 + $0x230] sm:$0xf]  ;;  %v3733_v17 = vld [vmem:[%s5637_s6 + $0x238] sm:$0xf0]  ;;  %v3193_v21 = vor.u32 %v3664_v13, %v3192_v58 }
 0x12c   :  { %2127 = vmatpush.bf16.msra.mxu2 %v3377_v46  ;;  %v3668_v46 = vld [vmem:[%s5637_s6 + $0x34] sm:$0xf]  ;;  %v3429_v54 = vor.u32 %v3722_v56, %v3426_v37  ;;  %v3390_v20 = vld [vmem:[%s5637_s6 + $0x1a4] sm:$0xf0]  ;;  %v3469_v22 = vor.u32 %v3733_v17, %v3468_v16  ;;  %v3360_v24 = vld [vmem:[%s5637_s6 + $0x158] sm:$0xf] }
 0x12d   :  { %v3456_v28 = vld [vmem:[%s5637_s6 + $0x218] sm:$0xf]  ;;  %v3730_v29 = vld [vmem:[%s5637_s6 + $0x220] sm:$0xf0]  ;;  %v3348_v33 = vld [vmem:[%s5637_s6 + $0x140] sm:$0xf] }
 0x12e   :  { %2113 = vmatpush.bf16.msra.mxu1 %v3293_v4  ;;  %1705 = vmatmul.bf16.vlgmr.msrb.gmra.mxu3 %v5050_v10  ;;  %v3249_v10 = vor.u32 %v3677_v7, %v3246_v6  ;;  %v3662_v7 = vld [vmem:[%s5637_s6 + $0x4] sm:$0xf]  ;;  %v3297_v6 = vor.u32 %v3689_v62, %v3294_v63  ;;  %v3457_v3 = vor.u32 %v3730_v29, %v3456_v28  ;;  %v3703_v36 = vld [vmem:[%s5637_s6 + $0x148] sm:$0xf0]  ;;  %v3444_v38 = vld [vmem:[%s5637_s6 + $0x200] sm:$0xf] }
 0x12f   :  { %2133 = vmatpush.bf16.msra.mxu3 %v3273_v48  ;;  %2146 = vmatpush.bf16.msrb.mxu0 %v3369_v50  ;;  %v3210_v48 = vld [vmem:[%s5637_s6 + $0x3c] sm:$0xf0]  ;;  %v3336_v37 = vld [vmem:[%s5637_s6 + $0x128] sm:$0xf]  ;;  %v3312_v59 = vld [vmem:[%s5637_s6 + $0xf8] sm:$0xf] }
 0x130   :  { %2172 = vmatpush.bf16.msrb.mxu2 %v3277_v52  ;;  %2102 = vmatmul.bf16.vlgmr.msra.gmra.mxu0 %v5260_v61  ;;  %v3306_v50 = vld [vmem:[%s5637_s6 + $0xfc] sm:$0xf0]  ;;  %v3216_v52 = vld [vmem:[%s5637_s6 + $0x38] sm:$0xf]  ;;  %v3213_v55 = vor.u32 %v3668_v46, %v3210_v48  ;;  %v3694_v60 = vld [vmem:[%s5637_s6 + $0x100] sm:$0xf0] }
 0x131   :  { %2128 = vmatmul.bf16.vlgmr.msra.gmra.mxu2 %v5268_v47  ;;  %v3309_v4 = vor.u32 %v3692_v49, %v3306_v50  ;;  %v3217_v57 = vor.u32 %v3670_v53, %v3216_v52  ;;  %v3324_v49 = vld [vmem:[%s5637_s6 + $0x110] sm:$0xf]  ;;  %v3697_v50 = vld [vmem:[%s5637_s6 + $0x118] sm:$0xf0]  ;;  %v3313_v42 = vor.u32 %v3694_v60, %v3312_v59  ;;  %v3300_v62 = vld [vmem:[%s5637_s6 + $0xe0] sm:$0xf] }
 0x132   :  { %2114 = vmatpush.bf16.msra.mxu1 %v3281_v11  ;;  %v3686_v11 = vld [vmem:[%s5637_s6 + $0xc4] sm:$0xf]  ;;  %v3420_v52 = vld [vmem:[%s5637_s6 + $0x1d0] sm:$0xf]  ;;  %v3721_v53 = vld [vmem:[%s5637_s6 + $0x1d8] sm:$0xf0] }
 0x133   :  { %2134 = vmatpush.bf16.msra.mxu3 %v3261_v44  ;;  %2147 = vmatpush.bf16.msrb.mxu0 %v3357_v2  ;;  %v3667_v44 = vld [vmem:[%s5637_s6 + $0x28] sm:$0xf0]  ;;  %v3716_v2 = vld [vmem:[%s5637_s6 + $0x1b4] sm:$0xf]  ;;  %v3285_v43 = vor.u32 %v3686_v11, %v3282_v12  ;;  %v3818_v59 = vld [vmem:[%s5639_s9 + $0x60] sm:$0xff] }
 0x134   :  { %2173 = vmatpush.bf16.msrb.mxu2 %v3265_v5  ;;  %v3402_v5 = vld [vmem:[%s5637_s6 + $0x1bc] sm:$0xf0]  ;;  %v3205_v8 = vor.u32 %v3667_v44, %v3204_v23  ;;  %v3691_v63 = vld [vmem:[%s5637_s6 + $0xe8] sm:$0xf0]  ;;  %v3812_v17 = vld [vmem:[%s5639_s9 + $0x30] sm:$0xff] }
 0x135   :  { %2115 = vmatmul.bf16.vlgmr.msra.gmra.mxu1 %v5319_v26  ;;  %v3396_v23 = vld [vmem:[%s5637_s6 + $0x1a0] sm:$0xf]  ;;  %v3715_v44 = vld [vmem:[%s5637_s6 + $0x1a8] sm:$0xf0]  ;;  %v3808_v28 = vld [vmem:[%s5639_s9 + $0x10] sm:$0xff] }
 0x136   :  { %2159 = vmatpush.bf16.msrb.mxu1 %v3465_v14  ;;  %v3372_v14 = vld [vmem:[%s5637_s6 + $0x170] sm:$0xf]  ;;  %v3817_v60 = vld [vmem:[%s5639_s9 + $0x58] sm:$0xff] }
 0x137   :  { %2135 = vmatpush.bf16.msra.mxu3 %v3249_v10  ;;  %2148 = vmatpush.bf16.msrb.mxu0 %v3345_v18  ;;  %v3405_v10 = vor.u32 %v3716_v2, %v3402_v5  ;;  %v3189_v18 = vor.u32 %v3662_v7, %v3186_v9  ;;  %v3373_v35 = vor.u32 %v3709_v15, %v3372_v14  ;;  %v3288_v2 = vld [vmem:[%s5637_s6 + $0xc8] sm:$0xf]  ;;  %v3688_v5 = vld [vmem:[%s5637_s6 + $0xd0] sm:$0xf0] }
 0x138   :  { %2174 = vmatpush.bf16.msrb.mxu2 %v3253_v19  ;;  %v3713_v19 = vld [vmem:[%s5637_s6 + $0x19c] sm:$0xf]  ;;  %v3384_v7 = vld [vmem:[%s5637_s6 + $0x188] sm:$0xf] }
 0x13a   :  { %2160 = vmatpush.bf16.msrb.mxu1 %v3453_v25  ;;  %v3393_v25 = vor.u32 %v3713_v19, %v3390_v20 }
 0x13b   :  { %2136 = vmatpush.bf16.msra.mxu3 %v3237_v27  ;;  %2149 = vmatpush.bf16.msrb.mxu0 %v3333_v30  ;;  %v3706_v27 = vld [vmem:[%s5637_s6 + $0x160] sm:$0xf0] }
 0x13c   :  { %2175 = vmatpush.bf16.msrb.mxu2 %v3241_v31  ;;  %v3710_v30 = vld [vmem:[%s5637_s6 + $0x184] sm:$0xf]  ;;  %v3378_v31 = vld [vmem:[%s5637_s6 + $0x18c] sm:$0xf0]  ;;  %v3361_v32 = vor.u32 %v3706_v27, %v3360_v24  ;;  %v3809_v24 = vld [vmem:[%s5639_s9 + $0x18] sm:$0xff] }
 0x13d   :  { %v3381_v34 = vor.u32 %v3710_v30, %v3378_v31 }
 0x13e   :  { %2161 = vmatpush.bf16.msrb.mxu1 %v3441_v39  ;;  %v3727_v39 = vld [vmem:[%s5637_s6 + $0x208] sm:$0xf0] }
 0x13f   :  { %2137 = vmatpush.bf16.msra.mxu3 %v3225_v40  ;;  %2150 = vmatpush.bf16.msrb.mxu0 %v3321_v41  ;;  %v3349_v40 = vor.u32 %v3703_v36, %v3348_v33  ;;  %v3445_v56 = vor.u32 %v3727_v39, %v3444_v38  ;;  %v3432_v41 = vld [vmem:[%s5637_s6 + $0x1e8] sm:$0xf]  ;;  %v5567_v36 = vld [vmem:[%s5640_s8] sm:$0x7] }
 0x140   :  { %2176 = vmatpush.bf16.msrb.mxu2 %v3229_v45  ;;  %v3724_v45 = vld [vmem:[%s5637_s6 + $0x1f0] sm:$0xf0] }
 0x141   :  { %v3433_v48 = vor.u32 %v3724_v45, %v3432_v41 }
 0x142   :  { %2162 = vmatpush.bf16.msrb.mxu1 %v3429_v54  ;;  %v3325_v54 = vor.u32 %v3697_v50, %v3324_v49 }
 0x143   :  { %2138 = vmatpush.bf16.msra.mxu3 %v3213_v55  ;;  %2151 = vmatpush.bf16.msrb.mxu0 %v3309_v4  ;;  %v3421_v55 = vor.u32 %v3721_v53, %v3420_v52  ;;  %v3408_v4 = vld [vmem:[%s5637_s6 + $0x1b8] sm:$0xf]  ;;  %v3819_v53 = vld [vmem:[%s5639_s9 + $0x68] sm:$0xff] }
 0x144   :  { %2177 = vmatpush.bf16.msrb.mxu2 %v3217_v57  ;;  %v3718_v57 = vld [vmem:[%s5637_s6 + $0x1c0] sm:$0xf0] }
 0x145   :  { %v3409_v51 = vor.u32 %v3718_v57, %v3408_v4 }
 0x146   :  { %2163 = vmatpush.bf16.msrb.mxu1 %v3417_v0  ;;  %v3301_v0 = vor.u32 %v3691_v63, %v3300_v62 }
 0x147   :  { %2139 = vmatpush.bf16.msra.mxu3 %v3201_v1  ;;  %2152 = vmatpush.bf16.msrb.mxu0 %v3297_v6  ;;  %v3397_v1 = vor.u32 %v3715_v44, %v3396_v23  ;;  %v3712_v6 = vld [vmem:[%s5637_s6 + $0x190] sm:$0xf0]  ;;  %v3815_v44 = vld [vmem:[%s5639_s9 + $0x48] sm:$0xff] }
 0x148   :  { %2178 = vmatpush.bf16.msrb.mxu2 %v3205_v8  ;;  %v3289_v8 = vor.u32 %v3688_v5, %v3288_v2  ;;  %v3385_v9 = vor.u32 %v3712_v6, %v3384_v7  ;;  %v3829_v5 = vld [vmem:[%s5639_s9 + $0xb8] sm:$0xff] }
 0x14a   :  { %2164 = vmatpush.bf16.msrb.mxu1 %v3405_v10  ;;  %v3813_v10 = vld [vmem:[%s5639_s9 + $0x38] sm:$0xff] }
 0x14b   :  { %2140 = vmatpush.bf16.msra.mxu3 %v3189_v18  ;;  %2153 = vmatpush.bf16.msrb.mxu0 %v3285_v43  ;;  %v3811_v18 = vld [vmem:[%s5639_s9 + $0x28] sm:$0xff]  ;;  %v3810_v43 = vld [vmem:[%s5639_s9 + $0x20] sm:$0xff] }
 0x14c   :  { %2179 = vmatpush.bf16.msrb.mxu2 %v3193_v21 }
 0x14e   :  { %2165 = vmatpush.bf16.msrb.mxu1 %v3393_v25  ;;  %2141 = vmatmul.bf16.vlgmr.msra.gmra.mxu3 %v5260_v61 }
 0x14f   :  { %2185 = vmatpush.bf16.msrb.mxu3 %v3373_v35  ;;  %2198 = vmatpush.bf16.msra.mxu0 %v3469_v22 }
 0x150   :  { %2154 = vmatmul.bf16.vlgmr.msrb.gmra.mxu0 %v5319_v26  ;;  %2180 = vmatmul.bf16.vlgmr.msrb.gmra.mxu2 %v5260_v61  ;;  %v3700_v61 = vld [vmem:[%s5637_s6 + $0x130] sm:$0xf0] }
 0x151   :  { %v3337_v46 = vor.u32 %v3700_v61, %v3336_v37  ;;  %v2213_v61 = vperm.slane %v5567_v36, 0 }
 0x152   :  { %2166 = vmatpush.bf16.msrb.mxu1 %v3381_v34  ;;  %v3806_v34 = vld [vmem:[%s5639_s9] sm:$0xff] }
 0x153   :  { %2186 = vmatpush.bf16.msrb.mxu3 %v3361_v32  ;;  %2199 = vmatpush.bf16.msra.mxu0 %v3457_v3  ;;  %v3807_v32 = vld [vmem:[%s5639_s9 + $0x8] sm:$0xff] }
 0x155   :  { %2167 = vmatmul.bf16.vlgmr.msrb.gmra.mxu1 %v5268_v47 }
 0x156   :  { %2463 = vmatpush.bf16.msra.mxu1 %v3813_v10 }
 0x157   :  { %2187 = vmatpush.bf16.msrb.mxu3 %v3349_v40  ;;  %2200 = vmatpush.bf16.msra.mxu0 %v3445_v56  ;;  %v3821_v40 = vld [vmem:[%s5639_s9 + $0x78] sm:$0xff] }
 0x158   :  { %2476 = vmatpush.bf16.msra.mxu2 %v3821_v40 }
 0x15a   :  { %2464 = vmatpush.bf16.msra.mxu1 %v3812_v17  ;;  %v3828_v17 = vld [vmem:[%s5639_s9 + $0xb0] sm:$0xff] }
 0x15b   :  { %2188 = vmatpush.bf16.msrb.mxu3 %v3337_v46  ;;  %2201 = vmatpush.bf16.msra.mxu0 %v3433_v48  ;;  %v3820_v46 = vld [vmem:[%s5639_s9 + $0x70] sm:$0xff] }
 0x15c   :  { %2477 = vmatpush.bf16.msra.mxu2 %v3820_v46 }
 0x15e   :  { %2465 = vmatpush.bf16.msra.mxu1 %v3811_v18 }
 0x15f   :  { %2189 = vmatpush.bf16.msrb.mxu3 %v3325_v54  ;;  %2202 = vmatpush.bf16.msra.mxu0 %v3421_v55 }
 0x160   :  { %2478 = vmatpush.bf16.msra.mxu2 %v3819_v53 }
 0x162   :  { %2466 = vmatpush.bf16.msra.mxu1 %v3810_v43 }
 0x163   :  { %2190 = vmatpush.bf16.msrb.mxu3 %v3313_v42  ;;  %2203 = vmatpush.bf16.msra.mxu0 %v3409_v51  ;;  %v3816_v51 = vld [vmem:[%s5639_s9 + $0x50] sm:$0xff] }
 0x164   :  { %2479 = vmatpush.bf16.msra.mxu2 %v3818_v59 }
 0x166   :  { %2467 = vmatpush.bf16.msra.mxu1 %v3809_v24  ;;  %v3826_v24 = vld [vmem:[%s5639_s9 + $0xa0] sm:$0xff] }
 0x167   :  { %2191 = vmatpush.bf16.msrb.mxu3 %v3301_v0  ;;  %2204 = vmatpush.bf16.msra.mxu0 %v3397_v1 }
 0x168   :  { %2480 = vmatpush.bf16.msra.mxu2 %v3817_v60 }
 0x16a   :  { %2468 = vmatpush.bf16.msra.mxu1 %v3808_v28  ;;  %v3824_v28 = vld [vmem:[%s5639_s9 + $0x90] sm:$0xff] }
 0x16b   :  { %2192 = vmatpush.bf16.msrb.mxu3 %v3289_v8  ;;  %2205 = vmatpush.bf16.msra.mxu0 %v3385_v9  ;;  %v3814_v9 = vld [vmem:[%s5639_s9 + $0x40] sm:$0xff] }
 0x16c   :  { %2481 = vmatpush.bf16.msra.mxu2 %v3816_v51 }
 0x16e   :  { %2193 = vmatmul.bf16.vlgmr.msrb.gmra.mxu3 %v5319_v26  ;;  %2206 = vmatmul.bf16.vlgmr.msra.gmra.mxu0 %v5268_v47 }
 0x16f   :  { %2469 = vmatpush.bf16.msra.mxu1 %v3807_v32  ;;  %2489 = vmatpush.bf16.msra.mxu3 %v3829_v5  ;;  %v3823_v32 = vld [vmem:[%s5639_s9 + $0x88] sm:$0xff] }
 0x170   :  { %2482 = vmatpush.bf16.msra.mxu2 %v3815_v44 }
 0x173   :  { %2470 = vmatpush.bf16.msra.mxu1 %v3806_v34  ;;  %2490 = vmatpush.bf16.msra.mxu3 %v3828_v17 }
 0x174   :  { %2483 = vmatpush.bf16.msra.mxu2 %v3814_v9 }
 0x18b   :  { %v1615_v11 = vpop.f32.mrf.mxu0 }
 0x190   :  { %v1602_v12 = vpop.f32.mrf.mxu3  ;;  %v5532_v58 = vpop.f32.mrf.mxu2 }
 0x191   :  { %v1616_v30 = vadd.f32 %v1615_v11, %v1602_v12 }
 0x192   :  { %v1628_v13 = vpop.f32.mrf.mxu1 }
 0x193   :  { %v1617_v14 = vpop.f32.mrf.mxu0  ;;  %v1629_v3 = vadd.f32 %v1628_v13, %v1616_v30 }
 0x198   :  { %v1604_v15 = vpop.f32.mrf.mxu3  ;;  %v1643_v16 = vpop.f32.mrf.mxu2 }
 0x199   :  { %v2214_v15 = vperm.slane %v5567_v36, 1 }
 0x19a   :  { %v1630_v26 = vpop.f32.mrf.mxu1 }
 0x19b   :  { %v5540_v47 = vpop.f32.mrf.mxu0 }
 0x1a0   :  { %v1654_v19 = vpop.f32.mrf.mxu3  ;;  %v1693_v20 = vpop.f32.mrf.mxu2 }
 0x1a1   :  { %v1655_v62 = vadd.f32 %v1654_v19, %v5532_v58  ;;  %v3827_v19 = vld [vmem:[%s5639_s9 + $0xa8] sm:$0xff] }
 0x1a2   :  { %v1680_v21 = vpop.f32.mrf.mxu1  ;;  %2491 = vmatpush.bf16.msra.mxu3 %v3827_v19 }
 0x1a3   :  { %v5548_v35 = vadd.f32 %v1693_v20, %v1680_v21  ;;  %v1669_v22 = vpop.f32.mrf.mxu0  ;;  %v1668_v2 = vadd.f32 %v5540_v47, %v1655_v62 }
 0x1a6   :  { %2492 = vmatpush.bf16.msra.mxu3 %v3826_v24 }
 0x1a8   :  { %v1656_v25 = vpop.f32.mrf.mxu3  ;;  %v1695_v27 = vpop.f32.mrf.mxu2 }
 0x1a9   :  { %v3825_v27 = vld [vmem:[%s5639_s9 + $0x98] sm:$0xff] }
 0x1aa   :  { %v1682_v29 = vpop.f32.mrf.mxu1  ;;  %2493 = vmatpush.bf16.msra.mxu3 %v3825_v27 }
 0x1ad   :  { %v2103_v31 = vpop.f32.mrf.mxu0 }
 0x1ae   :  { %v2104_v38 = vadd.f32 %v2103_v31, %v1629_v3  ;;  %2494 = vmatpush.bf16.msra.mxu3 %v3824_v28 }
 0x1b1   :  { %v5562_v33 = vpop.f32.mrf.mxu3 }
 0x1b2   :  { %v2116_v56 = vpop.f32.mrf.mxu1  ;;  %2495 = vmatpush.bf16.msra.mxu3 %v3823_v32  ;;  %v1707_v40 = vadd.f32 %v5562_v33, %v5548_v35 }
 0x1b3   :  { %v2117_v37 = vadd.f32 %v2116_v56, %v2104_v38  ;;  %v3822_v38 = vld [vmem:[%s5639_s9 + $0x80] sm:$0xff] }
 0x1b4   :  { %v2129_v39 = vpop.f32.mrf.mxu2 }
 0x1b5   :  { %v2105_v41 = vpop.f32.mrf.mxu0  ;;  %v2130_v45 = vadd.f32 %v2129_v39, %v2117_v37 }
 0x1b6   :  { %2496 = vmatpush.bf16.msra.mxu3 %v3822_v38 }
 0x1b7   :  { %v2219_v48 = vadd.f32 %v2213_v61, %v2130_v45 }
 0x1b9   :  { %v1708_v49 = vpop.f32.mrf.mxu3  ;;  %v2225_v50 = vmin.f32 %v2219_v48, 20.0  ;;  %vm2222_vm15 = vcmp.gt.f32.partialorder %v2219_v48, 20.0 }
 0x1ba   :  { %v2118_v54 = vpop.f32.mrf.mxu1  ;;  %v2215_v49 = vperm.slane %v5567_v36, 2 }
 0x1bb   :  { %v2228_v55 = vmul.f32 1.442695, %v2225_v50 }
 0x1bc   :  { %v2131_v52 = vpop.f32.mrf.mxu2 }
 0x1bd   :  { %3855 = vpow2.f32 %v2228_v55 }
 0x1c3   :  { %v3856_v4 = vpop.eup %3855 }
 0x1c4   :  { %v2234_v57 = vadd.f32 1.0, %v3856_v4  ;;  %v2237_v42 = vmul.f32 -0.5, %v3856_v4  ;;  %v2240_v0 = vand.u32 2147483647, %v3856_v4 }
 0x1c6   :  { %3857 = vlog2.f32 %v2234_v57  ;;  %v2238_v23 = vadd.f32 1.0, %v2237_v42  ;;  %vm2241_vm14 = vcmp.lt.f32.partialorder %v2240_v0, 0.0004427343 }
 0x1c8   :  { %v2239_v6 = vmul.f32 %v3856_v4, %v2238_v23 }
 0x1cc   :  { %v3858_v1 = vpop.eup %3857 }
 0x1cd   :  { %v2155_v63 = vpop.f32.mrf.mxu0  ;;  %v2236_v7 = vmul.f32 0.6931472, %v3858_v1 }
 0x1cf   :  { %v2242_v13 = vsel %vm2241_vm14, %v2239_v6, %v2236_v7  ;;  %v3830_v6 = vld [vmem:[%s5638_s10] ss:$0 sm:$0xff] }
 0x1d0   :  { %v2261_v14 = vsel %vm2222_vm15, %v2219_v48, %v2242_v13 }
 0x1d1   :  { %v2142_v8 = vpop.f32.mrf.mxu3  ;;  %v2264_v26 = vpack.c.bf16 %v2261_v14, %v2261_v14 }
 0x1d2   :  { %v2143_v11 = vadd.f32 %v2142_v8, %v1668_v2  ;;  %v2168_v12 = vpop.f32.mrf.mxu1 }
 0x1d3   :  { %v2181_v58 = vpop.f32.mrf.mxu2  ;;  %2471 = vmatmul.bf16.vlgmr.msra.gmra.mxu1 %v2264_v26 }
 0x1d4   :  { %v2156_v10 = vadd.f32 %v2155_v63, %v2143_v11  ;;  %v2182_v41 = vadd.f32 %v2181_v58, %v1707_v40 }
 0x1d5   :  { %v2157_v16 = vpop.f32.mrf.mxu0 }
 0x1d6   :  { %v2169_v47 = vadd.f32 %v2168_v12, %v2156_v10 }
 0x1d8   :  { %v2220_v18 = vadd.f32 %v2214_v15, %v2169_v47 }
 0x1d9   :  { %v2144_v20 = vpop.f32.mrf.mxu3 }
 0x1da   :  { %v2226_v43 = vmin.f32 %v2220_v18, 20.0  ;;  %v2170_v21 = vpop.f32.mrf.mxu1  ;;  %vm2223_vm1 = vcmp.gt.f32.partialorder %v2220_v18, 20.0 }
 0x1db   :  { %v2183_v22 = vpop.f32.mrf.mxu2 }
 0x1dc   :  { %v2230_v25 = vmul.f32 1.442695, %v2226_v43 }
 0x1de   :  { %3859 = vpow2.f32 %v2230_v25 }
 0x1e4   :  { %v3860_v29 = vpop.eup %3859 }
 0x1e5   :  { %v2243_v30 = vadd.f32 1.0, %v3860_v29  ;;  %v2246_v31 = vmul.f32 -0.5, %v3860_v29  ;;  %v2249_v39 = vand.u32 2147483647, %v3860_v29 }
 0x1e7   :  { %3861 = vlog2.f32 %v2243_v30  ;;  %v2247_v3 = vadd.f32 1.0, %v2246_v31  ;;  %vm2250_vm0 = vcmp.lt.f32.partialorder %v2249_v39, 0.0004427343 }
 0x1e9   :  { %v2248_v61 = vmul.f32 %v3860_v29, %v2247_v3 }
 0x1eb   :  { %v2207_v34 = vpop.f32.mrf.mxu0 }
 0x1ed   :  { %v3862_v56 = vpop.eup %3861 }
 0x1ee   :  { %v2245_v37 = vmul.f32 0.6931472, %v3862_v56 }
 0x1f0   :  { %v2251_v46 = vsel %vm2250_vm0, %v2248_v61, %v2245_v37 }
 0x1f1   :  { %v2194_v45 = vpop.f32.mrf.mxu3  ;;  %v2262_v50 = vsel %vm2223_vm1, %v2220_v18, %v2251_v46 }
 0x1f2   :  { %v2195_v48 = vadd.f32 %v2194_v45, %v2182_v41  ;;  %v2265_v52 = vpack.c.bf16 %v2262_v50, %v2262_v50 }
 0x1f3   :  { %v2209_v54 = vpop.f32.mrf.mxu0 }
 0x1f4   :  { %v2208_v53 = vadd.f32 %v2207_v34, %v2195_v48  ;;  %2484 = vmatmul.bf16.vlgmr.msra.gmra.mxu2 %v2265_v52 }
 0x1f6   :  { %v2221_v55 = vadd.f32 %v2215_v49, %v2208_v53 }
 0x1f8   :  { %v2227_v59 = vmin.f32 %v2221_v55, 20.0  ;;  %vm2224_vm3 = vcmp.gt.f32.partialorder %v2221_v55, 20.0 }
 0x1f9   :  { %v2196_v35 = vpop.f32.mrf.mxu3 }
 0x1fa   :  { %v2232_v33 = vmul.f32 1.442695, %v2227_v59 }
 0x1fc   :  { %3863 = vpow2.f32 %v2232_v33 }
 0x202   :  { %v3864_v60 = vpop.eup %3863 }
 0x203   :  { %v2252_v4 = vadd.f32 1.0, %v3864_v60  ;;  %v2255_v57 = vmul.f32 -0.5, %v3864_v60  ;;  %v2258_v51 = vand.u32 2147483647, %v3864_v60 }
 0x205   :  { %3865 = vlog2.f32 %v2252_v4  ;;  %v2256_v42 = vadd.f32 1.0, %v2255_v57  ;;  %vm2259_vm2 = vcmp.lt.f32.partialorder %v2258_v51, 0.0004427343 }
 0x207   :  { %v2257_v23 = vmul.f32 %v3864_v60, %v2256_v42 }
 0x20b   :  { %v3866_v62 = vpop.eup %3865 }
 0x20c   :  { %v2254_v63 = vmul.f32 0.6931472, %v3866_v62 }
 0x20e   :  { %v2260_v36 = vsel %vm2259_vm2, %v2257_v23, %v2254_v63 }
 0x20f   :  { %v2263_v44 = vsel %vm2224_vm3, %v2221_v55, %v2260_v36 }
 0x210   :  { %v2266_v0 = vpack.c.bf16 %v2263_v44, %v2263_v44 }
 0x212   :  { %2497 = vmatmul.bf16.vlgmr.msra.gmra.mxu3 %v2266_v0 }
 0x250   :  { %v2472_v1 = vpop.f32.mrf.mxu1 }
 0x251   :  { %v2473_v8 = vadd.f32 %v3830_v6, %v2472_v1 }
 0x258   :  { %v2474_v2 = vpop.f32.mrf.mxu1 }
 0x277   :  { %v2485_v5 = vpop.f32.mrf.mxu2 }
 0x278   :  { %v2486_v9 = vadd.f32 %v2485_v5, %v2473_v8 }
 0x27f   :  { %v2487_v7 = vpop.f32.mrf.mxu2 }
 0x295   :  { %v2498_v11 = vpop.f32.mrf.mxu3 }
 0x296   :  { %v2499_v12 = vadd.f32 %v2498_v11, %v2486_v9 }
 0x298   :  { %2502 = vst [vmem:[%s5641_s11] sm:$0x3] %v2499_v12 }
 0x29d   :  { %v2500_v58 = vpop.f32.mrf.mxu3 }

</bundles_post_ra>
